<compile_context>
chip_gen: v5e
topology: v5e:2x2
jax: 0.10.0
libtpu: 0.0.40
codegen_flags: <defaults>
</compile_context>

<pallas_src>
import functools

import jax
import jax.numpy as jnp
from jax import lax
from jax.experimental import pallas as pl
from jax.experimental.pallas import tpu as pltpu

_TIME_BLOCK = 32           # recurrence steps per grid iteration (upper bound)
_VMEM_FALLBACK = 48 * 1024 * 1024


def _round_up(x, m):
    return ((x + m - 1) // m) * m


@functools.lru_cache(maxsize=None)
def _vmem_limit_bytes():
    """Generation-aware scoped-VMEM limit: ~75% of physical VMEM."""
    try:
        info = pltpu.get_tpu_info()
        cap = getattr(info, "vmem_capacity_bytes", None)
        if cap is None:
            return _VMEM_FALLBACK
        return int(cap) * 3 // 4
    except Exception:
        return _VMEM_FALLBACK


# ---------------------------------------------------------------------------
# Tiled matmul + bias kernel:  o = x @ w + b
# Used for the (hoisted) LSTM input projection and the output projection.
# x / w are bf16 (MXU-native), accumulation f32, bias f32.
# ---------------------------------------------------------------------------
def _matmul_bias_kernel(x_ref, w_ref, b_ref, o_ref):
    acc = jnp.dot(x_ref[...], w_ref[...], preferred_element_type=jnp.float32)
    o_ref[...] = (acc + b_ref[...]).astype(o_ref.dtype)


def matmul_bias(x, w, b, *, out_dtype=jnp.float32, block_m=512, block_n=512):
    """x: (M, K); w: (K, N); b: (1, N) -> (M, N).  M % 8 == 0, N % 128 == 0."""
    M, K = x.shape
    N = w.shape[1]
    tm = min(block_m, M)          # M is a multiple of 8 by construction
    tn = min(block_n, N)          # N is a multiple of 128 by construction
    grid = (pl.cdiv(M, tm), pl.cdiv(N, tn))
    return pl.pallas_call(
        _matmul_bias_kernel,
        out_shape=jax.ShapeDtypeStruct((M, N), out_dtype),
        grid=grid,
        in_specs=[
            pl.BlockSpec((tm, K), lambda i, j: (i, 0)),
            pl.BlockSpec((K, tn), lambda i, j: (0, j)),
            pl.BlockSpec((1, tn), lambda i, j: (0, j)),
        ],
        out_specs=pl.BlockSpec((tm, tn), lambda i, j: (i, j)),
        compiler_params=pltpu.CompilerParams(
            dimension_semantics=("parallel", "parallel"),
            vmem_limit_bytes=_vmem_limit_bytes(),
        ),
    )(x, w, b)


# ---------------------------------------------------------------------------
# LSTM recurrence kernel.  Input gates gx = x @ W_ih + (b_ih + b_hh) are
# precomputed (bf16), so each time step only needs the recurrent matmul and
# the gate nonlinearities.  Gate layout along the 4H axis: [i | f | g | o]
# (PyTorch ordering).  Grid: (batch_groups [parallel], time [sequential]).
# h / c live in f32 VMEM scratch; W_hh is copied once into a single bf16
# VMEM scratch buffer (no double-buffering of the grid-invariant weight).
# ---------------------------------------------------------------------------
def _lstm_recurrent_kernel(gx_ref, whh_hbm, y_ref,
                           h_sc, c_sc, whh_sc, cp_sem, *, block_t):
    tb = pl.program_id(1)
    H = h_sc.shape[-1]

    @pl.when(tb == 0)
    def _():
        h_sc[...] = jnp.zeros_like(h_sc)
        c_sc[...] = jnp.zeros_like(c_sc)
        cp = pltpu.make_async_copy(whh_hbm, whh_sc, cp_sem)
        cp.start()
        cp.wait()

    def step(i, carry):
        h, c = carry
        h_b = h.astype(jnp.bfloat16)

        # Per-gate dots: the EUP (sigmoid/tanh) of an already-finished gate
        # overlaps the MXU work of the next one, and the (Bb, 4H) f32
        # pre-activation is never live all at once.
        def gate(k):
            pre = gx_ref[i, :, k * H:(k + 1) * H].astype(jnp.float32)
            return pre + jnp.dot(h_b, whh_sc[:, k * H:(k + 1) * H],
                                 preferred_element_type=jnp.float32)

        i_g = jax.nn.sigmoid(gate(0))
        f_g = jax.nn.sigmoid(gate(1))
        g_g = jnp.tanh(gate(2))
        o_g = jax.nn.sigmoid(gate(3))
        c_new = f_g * c + i_g * g_g
        h_new = o_g * jnp.tanh(c_new)
        y_ref[i] = h_new.astype(y_ref.dtype)
        return h_new, c_new

    h, c = lax.fori_loop(0, block_t, step, (h_sc[...], c_sc[...]), unroll=True)
    h_sc[...] = h
    c_sc[...] = c


def lstm_recurrent(gx, w_hh, *, block_t):
    """gx: (T, B, 4H) precomputed input gates (bf16); w_hh: (H, 4H) bf16.

    Returns y: (T, B, H) bf16.  T % block_t == 0, B % 8 == 0, H % 128 == 0.
    """
    T, B, H4 = gx.shape
    H = w_hh.shape[0]
    assert T % block_t == 0 and B % 8 == 0 and H % 128 == 0

    # Use both TensorCores (v7x megacore) when the batch is big enough.
    Bb = B // 2 if (B >= 16 and B % 16 == 0) else B

    grid = (B // Bb, T // block_t)     # batch groups outer, time inner
    return pl.pallas_call(
        functools.partial(_lstm_recurrent_kernel, block_t=block_t),
        out_shape=jax.ShapeDtypeStruct((T, B, H), jnp.bfloat16),
        grid_spec=pltpu.PrefetchScalarGridSpec(
            num_scalar_prefetch=0,
            grid=grid,
            in_specs=[
                pl.BlockSpec((block_t, Bb, H4), lambda bg, tb: (tb, bg, 0)),
                pl.BlockSpec(memory_space=pl.ANY),     # W_hh stays in HBM
            ],
            out_specs=pl.BlockSpec((block_t, Bb, H), lambda bg, tb: (tb, bg, 0)),
            scratch_shapes=[
                pltpu.VMEM((Bb, H), jnp.float32),      # h (f32 state)
                pltpu.VMEM((Bb, H), jnp.float32),      # c (f32 state)
                pltpu.VMEM((H, H4), jnp.bfloat16),     # resident W_hh (single buffer)
                pltpu.SemaphoreType.DMA,               # W_hh copy semaphore
            ],
        ),
        compiler_params=pltpu.CompilerParams(
            dimension_semantics=("parallel", "arbitrary"),
            vmem_limit_bytes=_vmem_limit_bytes(),
        ),
    )(gx, w_hh)


# ---------------------------------------------------------------------------
# Parameters (PyTorch-like logical layout) and one-time TPU preparation
# (gate fusion, padding to (8,128)-friendly shapes, bf16 weight storage).
# ---------------------------------------------------------------------------
def init_params(key, vocab_size, embed_size, hidden_size, num_layers):
    ks = jax.random.split(key, 2 + 4 * num_layers)
    scale = 1.0 / jnp.sqrt(hidden_size)
    params = {
        "embed": jax.random.normal(ks[0], (vocab_size, embed_size), jnp.float32),
        "fc_w": jax.random.uniform(ks[1], (hidden_size, vocab_size),
                                   jnp.float32, -scale, scale),
        "fc_b": jnp.zeros((1, vocab_size), jnp.float32),
        "lstm": [],
    }
    for l in range(num_layers):
        in_size = embed_size if l == 0 else hidden_size
        k0, k1, k2, k3 = ks[2 + 4 * l: 6 + 4 * l]
        w_ih = jax.random.uniform(k0, (4, in_size, hidden_size),
                                  jnp.float32, -scale, scale)
        w_hh = jax.random.uniform(k1, (4, hidden_size, hidden_size),
                                  jnp.float32, -scale, scale)
        b_ih = jax.random.uniform(k2, (4, 1, hidden_size), jnp.float32, -scale, scale)
        b_hh = jax.random.uniform(k3, (4, 1, hidden_size), jnp.float32, -scale, scale)
        params["lstm"].append((w_ih, w_hh, b_ih + b_hh))   # fold the two biases
    return params


def prepare_params(params):
    """Run once: pad to lane/sublane sizes, fuse gates to (in,4H), cast to bf16.

    Zero padding keeps padded hidden columns exactly 0 through the recurrence
    (pre-activation 0 => i=f=o=0.5, g=0 => c=h=0), so nothing leaks into the
    logits.  Biases stay f32 (added to the f32 accumulator).
    """
    embed = params["embed"]
    V, E = embed.shape
    H = params["lstm"][0][1].shape[-1]
    E_pad = _round_up(E, 128)
    H_pad = _round_up(H, 128)
    V_pad = _round_up(V, 128)

    def pad2(a, r, c):
        return jnp.pad(a, ((0, r - a.shape[0]), (0, c - a.shape[1])))

    prep = {
        "embed": jnp.pad(embed, ((0, 0), (0, E_pad - E))).astype(jnp.bfloat16),
        "fc_w": pad2(params["fc_w"], H_pad, V_pad).astype(jnp.bfloat16),
        "fc_b": jnp.pad(params["fc_b"], ((0, 0), (0, V_pad - V))),     # f32
        "layers": [],
    }
    for l, (w_ih, w_hh, b) in enumerate(params["lstm"]):
        in_pad = E_pad if l == 0 else H_pad
        # Pad each gate separately so gate k occupies columns [k*H_pad,(k+1)*H_pad).
        w_ih_cat = jnp.concatenate(
            [pad2(w_ih[k], in_pad, H_pad) for k in range(4)], axis=-1)
        w_hh_cat = jnp.concatenate(
            [pad2(w_hh[k], H_pad, H_pad) for k in range(4)], axis=-1)
        b_cat = jnp.concatenate(
            [jnp.pad(b[k], ((0, 0), (0, H_pad - H))) for k in range(4)], axis=-1)
        prep["layers"].append((w_ih_cat.astype(jnp.bfloat16),
                               w_hh_cat.astype(jnp.bfloat16),
                               b_cat))                                  # f32 bias
    return prep


@jax.jit
def lstm_model_forward(prep, tokens):
    """tokens: (B, T) int32 -> logits: (B, T, vocab) f32."""
    V = prep["embed"].shape[0]          # embed rows are unpadded -> true vocab
    B, T = tokens.shape
    B_pad = _round_up(B, 8)

    # Time blocking for the recurrence: pad T to a whole number of blocks
    # (no divisor search -> no silent Tb=1 cliff for awkward T).
    n_blocks = pl.cdiv(T, _TIME_BLOCK)
    Tb = pl.cdiv(T, n_blocks)
    T_pad = n_blocks * Tb

    tok_p = jnp.pad(tokens, ((0, B_pad - B), (0, T_pad - T)))

    # Time-major embedding gather (bf16); no activation transposes later.
    x = jnp.take(prep["embed"], tok_p.T, axis=0)            # (T_pad, B_pad, E_pad)

    for (w_ih, w_hh, b) in prep["layers"]:
        in_dim = w_ih.shape[0]
        H4 = w_ih.shape[1]
        # Hoisted input projection: one big pipelined bf16 MXU matmul over all
        # steps; gx emitted in bf16 (largest HBM stream, written/read once).
        gx = matmul_bias(x.reshape(T_pad * B_pad, in_dim), w_ih, b,
                         out_dtype=jnp.bfloat16)
        gx = gx.reshape(T_pad, B_pad, H4)
        # Sequential recurrence (only h @ W_hh + gates per step), bf16 output.
        x = lstm_recurrent(gx, w_hh, block_t=Tb)             # (T_pad, B_pad, H_pad)

    H_pad = x.shape[-1]
    logits = matmul_bias(x.reshape(T_pad * B_pad, H_pad),
                         prep["fc_w"], prep["fc_b"], out_dtype=jnp.float32)
    # Slice off batch/time/vocab padding BEFORE the transpose so the transpose
    # only touches real data.
    logits = logits.reshape(T_pad, B_pad, -1)[:T, :B, :V]
    return logits.transpose(1, 0, 2)                         # (B, T, V)


# ---------------------------------------------------------------------------
# Pure-JAX f32 reference (PyTorch semantics) for a correctness spot-check.
# ---------------------------------------------------------------------------
def _reference_forward(params, tokens):
    B, T = tokens.shape
    x = jnp.take(params["embed"], tokens, axis=0)             # (B, T, E)
    for (w_ih, w_hh, b) in params["lstm"]:
        Hh = w_hh.shape[-1]
        h = jnp.zeros((B, Hh), jnp.float32)
        c = jnp.zeros((B, Hh), jnp.float32)
        outs = []
        for t in range(T):
            xt = x[:, t, :]
            g = lambda k: xt @ w_ih[k] + h @ w_hh[k] + b[k]
            i_g = jax.nn.sigmoid(g(0))
            f_g = jax.nn.sigmoid(g(1))
            g_g = jnp.tanh(g(2))
            o_g = jax.nn.sigmoid(g(3))
            c = f_g * c + i_g * g_g
            h = o_g * jnp.tanh(c)
            outs.append(h)
        x = jnp.stack(outs, axis=1)                           # (B, T, H)
    return x @ params["fc_w"] + params["fc_b"]                # (B, T, V)


if __name__ == "__main__":
    vocab_size, embed_size, hidden_size, num_layers = 64, 32, 32, 2
    B, T = 2, 8

    key = jax.random.PRNGKey(0)
    pkey, tkey = jax.random.split(key)
    params = init_params(pkey, vocab_size, embed_size, hidden_size, num_layers)
    tokens = jax.random.randint(tkey, (B, T), 0, vocab_size, dtype=jnp.int32)

    prep = prepare_params(params)
    logits = jax.block_until_ready(lstm_model_forward(prep, tokens))

    ref = _reference_forward(params, tokens)
    assert logits.shape == (B, T, vocab_size)
    # bf16 MXU operands / bf16 intermediates (f32 accumulation + f32 gates):
    # compare against the f32 reference with a bf16-appropriate tolerance.
    max_err = float(jnp.max(jnp.abs(logits - ref)))
    assert jnp.allclose(logits, ref, atol=3e-2, rtol=3e-2), max_err

    print("KERNEL_OK")
</pallas_src>

<mosaic_0001>
module attributes {stable_mosaic.version = 11 : i64} {
  func.func @_matmul_bias_kernel(%arg0: i32, %arg1: i32, %arg2: memref<64x128xbf16, #tpu.memory_space<vmem>>, %arg3: memref<128x512xbf16, #tpu.memory_space<vmem>>, %arg4: memref<1x512xf32, #tpu.memory_space<vmem>>, %arg5: memref<64x512xbf16, #tpu.memory_space<vmem>>) attributes {dimension_semantics = [#tpu.dimension_semantics<parallel>, #tpu.dimension_semantics<parallel>], iteration_bounds = array<i64: 1, 1>, scalar_prefetch = 0 : i64, scratch_operands = 0 : i64, tpu.core_type = #tpu.core_type<tc>, window_params = [{transform_indices = @transform_0, window_bounds = array<i64: 64, 128>}, {transform_indices = @transform_1, window_bounds = array<i64: 128, 512>}, {transform_indices = @transform_2, window_bounds = array<i64: 1, 512>}, {transform_indices = @transform_3, window_bounds = array<i64: 64, 512>}]} {
    %c0 = arith.constant 0 : index
    %c0_0 = arith.constant 0 : index
    %0 = vector.load %arg2[%c0, %c0_0] : memref<64x128xbf16, #tpu.memory_space<vmem>>, vector<64x128xbf16>
    %c0_1 = arith.constant 0 : index
    %c0_2 = arith.constant 0 : index
    %1 = vector.load %arg3[%c0_1, %c0_2] : memref<128x512xbf16, #tpu.memory_space<vmem>>, vector<128x512xbf16>
    %cst = arith.constant dense<0.000000e+00> : vector<64x512xf32>
    %2 = tpu.matmul %0, %1, %cst {dimension_numbers = #tpu.dot_dimension_numbers<[1], [0], [0], [1], [0, 0, 1, 1], [], []>} : vector<64x128xbf16>, vector<128x512xbf16>, vector<64x512xf32> -> vector<64x512xf32>
    %c0_3 = arith.constant 0 : index
    %c0_4 = arith.constant 0 : index
    %3 = vector.load %arg4[%c0_3, %c0_4] : memref<1x512xf32, #tpu.memory_space<vmem>>, vector<1x512xf32>
    %4 = vector.broadcast %3 : vector<1x512xf32> to vector<64x512xf32>
    %5 = arith.addf %2, %4 : vector<64x512xf32>
    %6 = arith.truncf %5 : vector<64x512xf32> to vector<64x512xbf16>
    %c0_5 = arith.constant 0 : index
    %c0_6 = arith.constant 0 : index
    %7 = vector.load %arg5[%c0_5, %c0_6] : memref<64x512xbf16, #tpu.memory_space<vmem>>, vector<64x512xbf16>
    tpu.vector_store %arg5[%c0_5, %c0_6], %6 {strides = array<i32>} : memref<64x512xbf16, #tpu.memory_space<vmem>>, vector<64x512xbf16>,
    return
  }
  func.func @transform_0(%arg0: i32, %arg1: i32) -> (i32, i32) {
    %c0_i32 = arith.constant 0 : i32
    %c0_i32_0 = arith.constant 0 : i32
    return %arg0, %c0_i32 : i32, i32
  }
  func.func @transform_1(%arg0: i32, %arg1: i32) -> (i32, i32) {
    %c0_i32 = arith.constant 0 : i32
    %c0_i32_0 = arith.constant 0 : i32
    return %c0_i32, %arg1 : i32, i32
  }
  func.func @transform_2(%arg0: i32, %arg1: i32) -> (i32, i32) {
    %c0_i32 = arith.constant 0 : i32
    %c0_i32_0 = arith.constant 0 : i32
    return %c0_i32, %arg1 : i32, i32
  }
  func.func @transform_3(%arg0: i32, %arg1: i32) -> (i32, i32) {
    %c0_i32 = arith.constant 0 : i32
    return %arg0, %arg1 : i32, i32
  }
}

module attributes {stable_mosaic.version = 11 : i64} {
  func.func @_matmul_bias_kernel(%arg0: i32, %arg1: i32, %arg2: memref<64x128xbf16, #tpu.memory_space<vmem>>, %arg3: memref<128x512xbf16, #tpu.memory_space<vmem>>, %arg4: memref<1x512xf32, #tpu.memory_space<vmem>>, %arg5: memref<64x512xbf16, #tpu.memory_space<vmem>>) attributes {dimension_semantics = [#tpu.dimension_semantics<parallel>, #tpu.dimension_semantics<parallel>], iteration_bounds = array<i64: 1, 1>, scalar_prefetch = 0 : i64, scratch_operands = 0 : i64, tpu.core_type = #tpu.core_type<tc>, window_params = [{transform_indices = @transform_0, window_bounds = array<i64: 64, 128>}, {transform_indices = @transform_1, window_bounds = array<i64: 128, 512>}, {transform_indices = @transform_2, window_bounds = array<i64: 1, 512>}, {transform_indices = @transform_3, window_bounds = array<i64: 64, 512>}]} {
    %c0 = arith.constant 0 : index
    %c0_0 = arith.constant 0 : index
    %0 = vector.load %arg2[%c0, %c0_0] : memref<64x128xbf16, #tpu.memory_space<vmem>>, vector<64x128xbf16>
    %c0_1 = arith.constant 0 : index
    %c0_2 = arith.constant 0 : index
    %1 = vector.load %arg3[%c0_1, %c0_2] : memref<128x512xbf16, #tpu.memory_space<vmem>>, vector<128x512xbf16>
    %cst = arith.constant dense<0.000000e+00> : vector<64x512xf32>
    %2 = tpu.matmul %0, %1, %cst {dimension_numbers = #tpu.dot_dimension_numbers<[1], [0], [0], [1], [0, 0, 1, 1], [], []>} : vector<64x128xbf16>, vector<128x512xbf16>, vector<64x512xf32> -> vector<64x512xf32>
    %c0_3 = arith.constant 0 : index
    %c0_4 = arith.constant 0 : index
    %3 = vector.load %arg4[%c0_3, %c0_4] : memref<1x512xf32, #tpu.memory_space<vmem>>, vector<1x512xf32>
    %4 = vector.broadcast %3 : vector<1x512xf32> to vector<64x512xf32>
    %5 = arith.addf %2, %4 : vector<64x512xf32>
    %6 = arith.truncf %5 : vector<64x512xf32> to vector<64x512xbf16>
    %c0_5 = arith.constant 0 : index
    %c0_6 = arith.constant 0 : index
    %7 = vector.load %arg5[%c0_5, %c0_6] : memref<64x512xbf16, #tpu.memory_space<vmem>>, vector<64x512xbf16>
    tpu.vector_store %arg5[%c0_5, %c0_6], %6 {strides = array<i32>} : memref<64x512xbf16, #tpu.memory_space<vmem>>, vector<64x512xbf16>,
    return
  }
  func.func @transform_0(%arg0: i32, %arg1: i32) -> (i32, i32) {
    %c0_i32 = arith.constant 0 : i32
    %c0_i32_0 = arith.constant 0 : i32
    return %arg0, %c0_i32 : i32, i32
  }
  func.func @transform_1(%arg0: i32, %arg1: i32) -> (i32, i32) {
    %c0_i32 = arith.constant 0 : i32
    %c0_i32_0 = arith.constant 0 : i32
    return %c0_i32, %arg1 : i32, i32
  }
  func.func @transform_2(%arg0: i32, %arg1: i32) -> (i32, i32) {
    %c0_i32 = arith.constant 0 : i32
    %c0_i32_0 = arith.constant 0 : i32
    return %c0_i32, %arg1 : i32, i32
  }
  func.func @transform_3(%arg0: i32, %arg1: i32) -> (i32, i32) {
    %c0_i32 = arith.constant 0 : i32
    return %arg0, %arg1 : i32, i32
  }
}

module attributes {stable_mosaic.version = 11 : i64} {
  func.func @_matmul_bias_kernel(%arg0: i32, %arg1: i32, %arg2: memref<64x128xbf16, #tpu.memory_space<vmem>>, %arg3: memref<128x128xbf16, #tpu.memory_space<vmem>>, %arg4: memref<1x128xf32, #tpu.memory_space<vmem>>, %arg5: memref<64x128xf32, #tpu.memory_space<vmem>>) attributes {dimension_semantics = [#tpu.dimension_semantics<parallel>, #tpu.dimension_semantics<parallel>], iteration_bounds = array<i64: 1, 1>, scalar_prefetch = 0 : i64, scratch_operands = 0 : i64, tpu.core_type = #tpu.core_type<tc>, window_params = [{transform_indices = @transform_0, window_bounds = array<i64: 64, 128>}, {transform_indices = @transform_1, window_bounds = array<i64: 128, 128>}, {transform_indices = @transform_2, window_bounds = array<i64: 1, 128>}, {transform_indices = @transform_3, window_bounds = array<i64: 64, 128>}]} {
    %c0 = arith.constant 0 : index
    %c0_0 = arith.constant 0 : index
    %0 = vector.load %arg2[%c0, %c0_0] : memref<64x128xbf16, #tpu.memory_space<vmem>>, vector<64x128xbf16>
    %c0_1 = arith.constant 0 : index
    %c0_2 = arith.constant 0 : index
    %1 = vector.load %arg3[%c0_1, %c0_2] : memref<128x128xbf16, #tpu.memory_space<vmem>>, vector<128x128xbf16>
    %cst = arith.constant dense<0.000000e+00> : vector<64x128xf32>
    %2 = tpu.matmul %0, %1, %cst {dimension_numbers = #tpu.dot_dimension_numbers<[1], [0], [0], [1], [0, 0, 1, 1], [], []>} : vector<64x128xbf16>, vector<128x128xbf16>, vector<64x128xf32> -> vector<64x128xf32>
    %c0_3 = arith.constant 0 : index
    %c0_4 = arith.constant 0 : index
    %3 = vector.load %arg4[%c0_3, %c0_4] : memref<1x128xf32, #tpu.memory_space<vmem>>, vector<1x128xf32>
    %4 = vector.broadcast %3 : vector<1x128xf32> to vector<64x128xf32>
    %5 = arith.addf %2, %4 : vector<64x128xf32>
    %c0_5 = arith.constant 0 : index
    %c0_6 = arith.constant 0 : index
    %6 = vector.load %arg5[%c0_5, %c0_6] : memref<64x128xf32, #tpu.memory_space<vmem>>, vector<64x128xf32>
    tpu.vector_store %arg5[%c0_5, %c0_6], %5 {strides = array<i32>} : memref<64x128xf32, #tpu.memory_space<vmem>>, vector<64x128xf32>,
    return
  }
  func.func @transform_0(%arg0: i32, %arg1: i32) -> (i32, i32) {
    %c0_i32 = arith.constant 0 : i32
    %c0_i32_0 = arith.constant 0 : i32
    return %arg0, %c0_i32 : i32, i32
  }
  func.func @transform_1(%arg0: i32, %arg1: i32) -> (i32, i32) {
    %c0_i32 = arith.constant 0 : i32
    %c0_i32_0 = arith.constant 0 : i32
    return %c0_i32, %arg1 : i32, i32
  }
  func.func @transform_2(%arg0: i32, %arg1: i32) -> (i32, i32) {
    %c0_i32 = arith.constant 0 : i32
    %c0_i32_0 = arith.constant 0 : i32
    return %c0_i32, %arg1 : i32, i32
  }
  func.func @transform_3(%arg0: i32, %arg1: i32) -> (i32, i32) {
    %c0_i32 = arith.constant 0 : i32
    return %arg0, %arg1 : i32, i32
  }
}

module attributes {stable_mosaic.version = 11 : i64} {
  func.func @_lstm_recurrent_kernel(%arg0: i32, %arg1: i32, %arg2: memref<8x8x512xbf16, #tpu.memory_space<vmem>>, %arg3: memref<128x512xbf16, #tpu.memory_space<any>>, %arg4: memref<8x8x128xbf16, #tpu.memory_space<vmem>>, %arg5: memref<8x128xf32, #tpu.memory_space<vmem>>, %arg6: memref<8x128xf32, #tpu.memory_space<vmem>>, %arg7: memref<128x512xbf16, #tpu.memory_space<vmem>>, %arg8: memref<!tpu.dma_semaphore, #tpu.memory_space<semaphore_mem>>) attributes {dimension_semantics = [#tpu.dimension_semantics<parallel>, #tpu.dimension_semantics<arbitrary>], iteration_bounds = array<i64: 1, 1>, scalar_prefetch = 0 : i64, scratch_operands = 4 : i64, tpu.core_type = #tpu.core_type<tc>, window_params = [{transform_indices = @transform_0, window_bounds = array<i64: 8, 8, 512>}, {}, {transform_indices = @transform_2, window_bounds = array<i64: 8, 8, 128>}]} {
    %c0_i32 = arith.constant 0 : i32
    %0 = arith.cmpi eq, %arg1, %c0_i32 : i32
    %1 = arith.extui %0 : i1 to i32
    %c0_i32_0 = arith.constant 0 : i32
    %2 = arith.cmpi ne, %1, %c0_i32_0 : i32
    scf.if %2 {
      %cst_205 = arith.constant 0.000000e+00 : f32
      %447 = vector.broadcast %cst_205 : f32 to vector<8x128xf32>
      %c0_206 = arith.constant 0 : index
      %c0_207 = arith.constant 0 : index
      %448 = vector.load %arg5[%c0_206, %c0_207] : memref<8x128xf32, #tpu.memory_space<vmem>>, vector<8x128xf32>
      tpu.vector_store %arg5[%c0_206, %c0_207], %447 {strides = array<i32>} : memref<8x128xf32, #tpu.memory_space<vmem>>, vector<8x128xf32>,
      %cst_208 = arith.constant 0.000000e+00 : f32
      %449 = vector.broadcast %cst_208 : f32 to vector<8x128xf32>
      %c0_209 = arith.constant 0 : index
      %c0_210 = arith.constant 0 : index
      %450 = vector.load %arg6[%c0_209, %c0_210] : memref<8x128xf32, #tpu.memory_space<vmem>>, vector<8x128xf32>
      tpu.vector_store %arg6[%c0_209, %c0_210], %449 {strides = array<i32>} : memref<8x128xf32, #tpu.memory_space<vmem>>, vector<8x128xf32>,
      tpu.enqueue_dma source(%arg3 : memref<128x512xbf16, #tpu.memory_space<any>>) target(%arg7 : memref<128x512xbf16, #tpu.memory_space<vmem>>) target_semaphore(%arg8 : memref<!tpu.dma_semaphore, #tpu.memory_space<semaphore_mem>>)
      tpu.wait_dma2 semaphore(%arg8 : memref<!tpu.dma_semaphore, #tpu.memory_space<semaphore_mem>>) src(%arg3 : memref<128x512xbf16, #tpu.memory_space<any>>) dst(%arg7 : memref<128x512xbf16, #tpu.memory_space<vmem>>)
    } else {
    }
    %c0 = arith.constant 0 : index
    %c0_1 = arith.constant 0 : index
    %3 = vector.load %arg5[%c0, %c0_1] : memref<8x128xf32, #tpu.memory_space<vmem>>, vector<8x128xf32>
    %c0_2 = arith.constant 0 : index
    %c0_3 = arith.constant 0 : index
    %4 = vector.load %arg6[%c0_2, %c0_3] : memref<8x128xf32, #tpu.memory_space<vmem>>, vector<8x128xf32>
    %c0_i32_4 = arith.constant 0 : i32
    %5 = arith.truncf %3 : vector<8x128xf32> to vector<8x128xbf16>
    %6 = arith.index_cast %c0_i32_4 : i32 to index
    %c0_5 = arith.constant 0 : index
    %c0_6 = arith.constant 0 : index
    %7 = vector.load %arg2[%6, %c0_5, %c0_6] : memref<8x8x512xbf16, #tpu.memory_space<vmem>>, vector<1x8x128xbf16>
    %8 = vector.shape_cast %7 : vector<1x8x128xbf16> to vector<8x128xbf16>
    %9 = arith.extf %8 : vector<8x128xbf16> to vector<8x128xf32>
    %c0_7 = arith.constant 0 : index
    %c0_8 = arith.constant 0 : index
    %10 = vector.load %arg7[%c0_7, %c0_8] : memref<128x512xbf16, #tpu.memory_space<vmem>>, vector<128x128xbf16>
    %cst = arith.constant dense<0.000000e+00> : vector<8x128xf32>
    %11 = tpu.matmul %5, %10, %cst {dimension_numbers = #tpu.dot_dimension_numbers<[1], [0], [0], [1], [0, 0, 1, 1], [], []>} : vector<8x128xbf16>, vector<128x128xbf16>, vector<8x128xf32> -> vector<8x128xf32>
    %12 = arith.addf %9, %11 : vector<8x128xf32>
    %13 = arith.negf %12 : vector<8x128xf32>
    %14 = math.exp %13 : vector<8x128xf32>
    %cst_9 = arith.constant 1.000000e+00 : f32
    %15 = vector.broadcast %cst_9 : f32 to vector<8x128xf32>
    %16 = arith.addf %15, %14 : vector<8x128xf32>
    %17 = arith.divf %15, %16 : vector<8x128xf32>
    %18 = arith.index_cast %c0_i32_4 : i32 to index
    %c0_10 = arith.constant 0 : index
    %c128 = arith.constant 128 : index
    %19 = vector.load %arg2[%18, %c0_10, %c128] : memref<8x8x512xbf16, #tpu.memory_space<vmem>>, vector<1x8x128xbf16>
    %20 = vector.shape_cast %19 : vector<1x8x128xbf16> to vector<8x128xbf16>
    %21 = arith.extf %20 : vector<8x128xbf16> to vector<8x128xf32>
    %c0_11 = arith.constant 0 : index
    %c128_12 = arith.constant 128 : index
    %22 = vector.load %arg7[%c0_11, %c128_12] : memref<128x512xbf16, #tpu.memory_space<vmem>>, vector<128x128xbf16>
    %cst_13 = arith.constant dense<0.000000e+00> : vector<8x128xf32>
    %23 = tpu.matmul %5, %22, %cst_13 {dimension_numbers = #tpu.dot_dimension_numbers<[1], [0], [0], [1], [0, 0, 1, 1], [], []>} : vector<8x128xbf16>, vector<128x128xbf16>, vector<8x128xf32> -> vector<8x128xf32>
    %24 = arith.addf %21, %23 : vector<8x128xf32>
    %25 = arith.negf %24 : vector<8x128xf32>
    %26 = math.exp %25 : vector<8x128xf32>
    %cst_14 = arith.constant 1.000000e+00 : f32
    %27 = vector.broadcast %cst_14 : f32 to vector<8x128xf32>
    %28 = arith.addf %27, %26 : vector<8x128xf32>
    %29 = arith.divf %27, %28 : vector<8x128xf32>
    %30 = arith.index_cast %c0_i32_4 : i32 to index
    %c0_15 = arith.constant 0 : index
    %c256 = arith.constant 256 : index
    %31 = vector.load %arg2[%30, %c0_15, %c256] : memref<8x8x512xbf16, #tpu.memory_space<vmem>>, vector<1x8x128xbf16>
    %32 = vector.shape_cast %31 : vector<1x8x128xbf16> to vector<8x128xbf16>
    %33 = arith.extf %32 : vector<8x128xbf16> to vector<8x128xf32>
    %c0_16 = arith.constant 0 : index
    %c256_17 = arith.constant 256 : index
    %34 = vector.load %arg7[%c0_16, %c256_17] : memref<128x512xbf16, #tpu.memory_space<vmem>>, vector<128x128xbf16>
    %cst_18 = arith.constant dense<0.000000e+00> : vector<8x128xf32>
    %35 = tpu.matmul %5, %34, %cst_18 {dimension_numbers = #tpu.dot_dimension_numbers<[1], [0], [0], [1], [0, 0, 1, 1], [], []>} : vector<8x128xbf16>, vector<128x128xbf16>, vector<8x128xf32> -> vector<8x128xf32>
    %36 = arith.addf %33, %35 : vector<8x128xf32>
    %37 = math.tanh %36 : vector<8x128xf32>
    %38 = arith.index_cast %c0_i32_4 : i32 to index
    %c0_19 = arith.constant 0 : index
    %c384 = arith.constant 384 : index
    %39 = vector.load %arg2[%38, %c0_19, %c384] : memref<8x8x512xbf16, #tpu.memory_space<vmem>>, vector<1x8x128xbf16>
    %40 = vector.shape_cast %39 : vector<1x8x128xbf16> to vector<8x128xbf16>
    %41 = arith.extf %40 : vector<8x128xbf16> to vector<8x128xf32>
    %c0_20 = arith.constant 0 : index
    %c384_21 = arith.constant 384 : index
    %42 = vector.load %arg7[%c0_20, %c384_21] : memref<128x512xbf16, #tpu.memory_space<vmem>>, vector<128x128xbf16>
    %cst_22 = arith.constant dense<0.000000e+00> : vector<8x128xf32>
    %43 = tpu.matmul %5, %42, %cst_22 {dimension_numbers = #tpu.dot_dimension_numbers<[1], [0], [0], [1], [0, 0, 1, 1], [], []>} : vector<8x128xbf16>, vector<128x128xbf16>, vector<8x128xf32> -> vector<8x128xf32>
    %44 = arith.addf %41, %43 : vector<8x128xf32>
    %45 = arith.negf %44 : vector<8x128xf32>
    %46 = math.exp %45 : vector<8x128xf32>
    %cst_23 = arith.constant 1.000000e+00 : f32
    %47 = vector.broadcast %cst_23 : f32 to vector<8x128xf32>
    %48 = arith.addf %47, %46 : vector<8x128xf32>
    %49 = arith.divf %47, %48 : vector<8x128xf32>
    %50 = arith.mulf %29, %4 : vector<8x128xf32>
    %51 = arith.mulf %17, %37 : vector<8x128xf32>
    %52 = arith.addf %50, %51 : vector<8x128xf32>
    %53 = math.tanh %52 : vector<8x128xf32>
    %54 = arith.mulf %49, %53 : vector<8x128xf32>
    %55 = arith.truncf %54 : vector<8x128xf32> to vector<8x128xbf16>
    %56 = arith.index_cast %c0_i32_4 : i32 to index
    %c0_24 = arith.constant 0 : index
    %c0_25 = arith.constant 0 : index
    %57 = vector.load %arg4[%56, %c0_24, %c0_25] : memref<8x8x128xbf16, #tpu.memory_space<vmem>>, vector<1x8x128xbf16>
    %58 = vector.shape_cast %57 : vector<1x8x128xbf16> to vector<8x128xbf16>
    %59 = vector.shape_cast %55 : vector<8x128xbf16> to vector<1x8x128xbf16>
    tpu.vector_store %arg4[%56, %c0_24, %c0_25], %59 {strides = array<i32>} : memref<8x8x128xbf16, #tpu.memory_space<vmem>>, vector<1x8x128xbf16>,
    %c1_i32 = arith.constant 1 : i32
    %60 = arith.truncf %54 : vector<8x128xf32> to vector<8x128xbf16>
    %61 = arith.index_cast %c1_i32 : i32 to index
    %c0_26 = arith.constant 0 : index
    %c0_27 = arith.constant 0 : index
    %62 = vector.load %arg2[%61, %c0_26, %c0_27] : memref<8x8x512xbf16, #tpu.memory_space<vmem>>, vector<1x8x128xbf16>
    %63 = vector.shape_cast %62 : vector<1x8x128xbf16> to vector<8x128xbf16>
    %64 = arith.extf %63 : vector<8x128xbf16> to vector<8x128xf32>
    %c0_28 = arith.constant 0 : index
    %c0_29 = arith.constant 0 : index
    %65 = vector.load %arg7[%c0_28, %c0_29] : memref<128x512xbf16, #tpu.memory_space<vmem>>, vector<128x128xbf16>
    %cst_30 = arith.constant dense<0.000000e+00> : vector<8x128xf32>
    %66 = tpu.matmul %60, %65, %cst_30 {dimension_numbers = #tpu.dot_dimension_numbers<[1], [0], [0], [1], [0, 0, 1, 1], [], []>} : vector<8x128xbf16>, vector<128x128xbf16>, vector<8x128xf32> -> vector<8x128xf32>
    %67 = arith.addf %64, %66 : vector<8x128xf32>
    %68 = arith.negf %67 : vector<8x128xf32>
    %69 = math.exp %68 : vector<8x128xf32>
    %cst_31 = arith.constant 1.000000e+00 : f32
    %70 = vector.broadcast %cst_31 : f32 to vector<8x128xf32>
    %71 = arith.addf %70, %69 : vector<8x128xf32>
    %72 = arith.divf %70, %71 : vector<8x128xf32>
    %73 = arith.index_cast %c1_i32 : i32 to index
    %c0_32 = arith.constant 0 : index
    %c128_33 = arith.constant 128 : index
    %74 = vector.load %arg2[%73, %c0_32, %c128_33] : memref<8x8x512xbf16, #tpu.memory_space<vmem>>, vector<1x8x128xbf16>
    %75 = vector.shape_cast %74 : vector<1x8x128xbf16> to vector<8x128xbf16>
    %76 = arith.extf %75 : vector<8x128xbf16> to vector<8x128xf32>
    %c0_34 = arith.constant 0 : index
    %c128_35 = arith.constant 128 : index
    %77 = vector.load %arg7[%c0_34, %c128_35] : memref<128x512xbf16, #tpu.memory_space<vmem>>, vector<128x128xbf16>
    %cst_36 = arith.constant dense<0.000000e+00> : vector<8x128xf32>
    %78 = tpu.matmul %60, %77, %cst_36 {dimension_numbers = #tpu.dot_dimension_numbers<[1], [0], [0], [1], [0, 0, 1, 1], [], []>} : vector<8x128xbf16>, vector<128x128xbf16>, vector<8x128xf32> -> vector<8x128xf32>
    %79 = arith.addf %76, %78 : vector<8x128xf32>
    %80 = arith.negf %79 : vector<8x128xf32>
    %81 = math.exp %80 : vector<8x128xf32>
    %cst_37 = arith.constant 1.000000e+00 : f32
    %82 = vector.broadcast %cst_37 : f32 to vector<8x128xf32>
    %83 = arith.addf %82, %81 : vector<8x128xf32>
    %84 = arith.divf %82, %83 : vector<8x128xf32>
    %85 = arith.index_cast %c1_i32 : i32 to index
    %c0_38 = arith.constant 0 : index
    %c256_39 = arith.constant 256 : index
    %86 = vector.load %arg2[%85, %c0_38, %c256_39] : memref<8x8x512xbf16, #tpu.memory_space<vmem>>, vector<1x8x128xbf16>
    %87 = vector.shape_cast %86 : vector<1x8x128xbf16> to vector<8x128xbf16>
    %88 = arith.extf %87 : vector<8x128xbf16> to vector<8x128xf32>
    %c0_40 = arith.constant 0 : index
    %c256_41 = arith.constant 256 : index
    %89 = vector.load %arg7[%c0_40, %c256_41] : memref<128x512xbf16, #tpu.memory_space<vmem>>, vector<128x128xbf16>
    %cst_42 = arith.constant dense<0.000000e+00> : vector<8x128xf32>
    %90 = tpu.matmul %60, %89, %cst_42 {dimension_numbers = #tpu.dot_dimension_numbers<[1], [0], [0], [1], [0, 0, 1, 1], [], []>} : vector<8x128xbf16>, vector<128x128xbf16>, vector<8x128xf32> -> vector<8x128xf32>
    %91 = arith.addf %88, %90 : vector<8x128xf32>
    %92 = math.tanh %91 : vector<8x128xf32>
    %93 = arith.index_cast %c1_i32 : i32 to index
    %c0_43 = arith.constant 0 : index
    %c384_44 = arith.constant 384 : index
    %94 = vector.load %arg2[%93, %c0_43, %c384_44] : memref<8x8x512xbf16, #tpu.memory_space<vmem>>, vector<1x8x128xbf16>
    %95 = vector.shape_cast %94 : vector<1x8x128xbf16> to vector<8x128xbf16>
    %96 = arith.extf %95 : vector<8x128xbf16> to vector<8x128xf32>
    %c0_45 = arith.constant 0 : index
    %c384_46 = arith.constant 384 : index
    %97 = vector.load %arg7[%c0_45, %c384_46] : memref<128x512xbf16, #tpu.memory_space<vmem>>, vector<128x128xbf16>
    %cst_47 = arith.constant dense<0.000000e+00> : vector<8x128xf32>
    %98 = tpu.matmul %60, %97, %cst_47 {dimension_numbers = #tpu.dot_dimension_numbers<[1], [0], [0], [1], [0, 0, 1, 1], [], []>} : vector<8x128xbf16>, vector<128x128xbf16>, vector<8x128xf32> -> vector<8x128xf32>
    %99 = arith.addf %96, %98 : vector<8x128xf32>
    %100 = arith.negf %99 : vector<8x128xf32>
    %101 = math.exp %100 : vector<8x128xf32>
    %cst_48 = arith.constant 1.000000e+00 : f32
    %102 = vector.broadcast %cst_48 : f32 to vector<8x128xf32>
    %103 = arith.addf %102, %101 : vector<8x128xf32>
    %104 = arith.divf %102, %103 : vector<8x128xf32>
    %105 = arith.mulf %84, %52 : vector<8x128xf32>
    %106 = arith.mulf %72, %92 : vector<8x128xf32>
    %107 = arith.addf %105, %106 : vector<8x128xf32>
    %108 = math.tanh %107 : vector<8x128xf32>
    %109 = arith.mulf %104, %108 : vector<8x128xf32>
    %110 = arith.truncf %109 : vector<8x128xf32> to vector<8x128xbf16>
    %111 = arith.index_cast %c1_i32 : i32 to index
    %c0_49 = arith.constant 0 : index
    %c0_50 = arith.constant 0 : index
    %112 = vector.load %arg4[%111, %c0_49, %c0_50] : memref<8x8x128xbf16, #tpu.memory_space<vmem>>, vector<1x8x128xbf16>
    %113 = vector.shape_cast %112 : vector<1x8x128xbf16> to vector<8x128xbf16>
    %114 = vector.shape_cast %110 : vector<8x128xbf16> to vector<1x8x128xbf16>
    tpu.vector_store %arg4[%111, %c0_49, %c0_50], %114 {strides = array<i32>} : memref<8x8x128xbf16, #tpu.memory_space<vmem>>, vector<1x8x128xbf16>,
    %c2_i32 = arith.constant 2 : i32
    %115 = arith.truncf %109 : vector<8x128xf32> to vector<8x128xbf16>
    %116 = arith.index_cast %c2_i32 : i32 to index
    %c0_51 = arith.constant 0 : index
    %c0_52 = arith.constant 0 : index
    %117 = vector.load %arg2[%116, %c0_51, %c0_52] : memref<8x8x512xbf16, #tpu.memory_space<vmem>>, vector<1x8x128xbf16>
    %118 = vector.shape_cast %117 : vector<1x8x128xbf16> to vector<8x128xbf16>
    %119 = arith.extf %118 : vector<8x128xbf16> to vector<8x128xf32>
    %c0_53 = arith.constant 0 : index
    %c0_54 = arith.constant 0 : index
    %120 = vector.load %arg7[%c0_53, %c0_54] : memref<128x512xbf16, #tpu.memory_space<vmem>>, vector<128x128xbf16>
    %cst_55 = arith.constant dense<0.000000e+00> : vector<8x128xf32>
    %121 = tpu.matmul %115, %120, %cst_55 {dimension_numbers = #tpu.dot_dimension_numbers<[1], [0], [0], [1], [0, 0, 1, 1], [], []>} : vector<8x128xbf16>, vector<128x128xbf16>, vector<8x128xf32> -> vector<8x128xf32>
    %122 = arith.addf %119, %121 : vector<8x128xf32>
    %123 = arith.negf %122 : vector<8x128xf32>
    %124 = math.exp %123 : vector<8x128xf32>
    %cst_56 = arith.constant 1.000000e+00 : f32
    %125 = vector.broadcast %cst_56 : f32 to vector<8x128xf32>
    %126 = arith.addf %125, %124 : vector<8x128xf32>
    %127 = arith.divf %125, %126 : vector<8x128xf32>
    %128 = arith.index_cast %c2_i32 : i32 to index
    %c0_57 = arith.constant 0 : index
    %c128_58 = arith.constant 128 : index
    %129 = vector.load %arg2[%128, %c0_57, %c128_58] : memref<8x8x512xbf16, #tpu.memory_space<vmem>>, vector<1x8x128xbf16>
    %130 = vector.shape_cast %129 : vector<1x8x128xbf16> to vector<8x128xbf16>
    %131 = arith.extf %130 : vector<8x128xbf16> to vector<8x128xf32>
    %c0_59 = arith.constant 0 : index
    %c128_60 = arith.constant 128 : index
    %132 = vector.load %arg7[%c0_59, %c128_60] : memref<128x512xbf16, #tpu.memory_space<vmem>>, vector<128x128xbf16>
    %cst_61 = arith.constant dense<0.000000e+00> : vector<8x128xf32>
    %133 = tpu.matmul %115, %132, %cst_61 {dimension_numbers = #tpu.dot_dimension_numbers<[1], [0], [0], [1], [0, 0, 1, 1], [], []>} : vector<8x128xbf16>, vector<128x128xbf16>, vector<8x128xf32> -> vector<8x128xf32>
    %134 = arith.addf %131, %133 : vector<8x128xf32>
    %135 = arith.negf %134 : vector<8x128xf32>
    %136 = math.exp %135 : vector<8x128xf32>
    %cst_62 = arith.constant 1.000000e+00 : f32
    %137 = vector.broadcast %cst_62 : f32 to vector<8x128xf32>
    %138 = arith.addf %137, %136 : vector<8x128xf32>
    %139 = arith.divf %137, %138 : vector<8x128xf32>
    %140 = arith.index_cast %c2_i32 : i32 to index
    %c0_63 = arith.constant 0 : index
    %c256_64 = arith.constant 256 : index
    %141 = vector.load %arg2[%140, %c0_63, %c256_64] : memref<8x8x512xbf16, #tpu.memory_space<vmem>>, vector<1x8x128xbf16>
    %142 = vector.shape_cast %141 : vector<1x8x128xbf16> to vector<8x128xbf16>
    %143 = arith.extf %142 : vector<8x128xbf16> to vector<8x128xf32>
    %c0_65 = arith.constant 0 : index
    %c256_66 = arith.constant 256 : index
    %144 = vector.load %arg7[%c0_65, %c256_66] : memref<128x512xbf16, #tpu.memory_space<vmem>>, vector<128x128xbf16>
    %cst_67 = arith.constant dense<0.000000e+00> : vector<8x128xf32>
    %145 = tpu.matmul %115, %144, %cst_67 {dimension_numbers = #tpu.dot_dimension_numbers<[1], [0], [0], [1], [0, 0, 1, 1], [], []>} : vector<8x128xbf16>, vector<128x128xbf16>, vector<8x128xf32> -> vector<8x128xf32>
    %146 = arith.addf %143, %145 : vector<8x128xf32>
    %147 = math.tanh %146 : vector<8x128xf32>
    %148 = arith.index_cast %c2_i32 : i32 to index
    %c0_68 = arith.constant 0 : index
    %c384_69 = arith.constant 384 : index
    %149 = vector.load %arg2[%148, %c0_68, %c384_69] : memref<8x8x512xbf16, #tpu.memory_space<vmem>>, vector<1x8x128xbf16>
    %150 = vector.shape_cast %149 : vector<1x8x128xbf16> to vector<8x128xbf16>
    %151 = arith.extf %150 : vector<8x128xbf16> to vector<8x128xf32>
    %c0_70 = arith.constant 0 : index
    %c384_71 = arith.constant 384 : index
    %152 = vector.load %arg7[%c0_70, %c384_71] : memref<128x512xbf16, #tpu.memory_space<vmem>>, vector<128x128xbf16>
    %cst_72 = arith.constant dense<0.000000e+00> : vector<8x128xf32>
    %153 = tpu.matmul %115, %152, %cst_72 {dimension_numbers = #tpu.dot_dimension_numbers<[1], [0], [0], [1], [0, 0, 1, 1], [], []>} : vector<8x128xbf16>, vector<128x128xbf16>, vector<8x128xf32> -> vector<8x128xf32>
    %154 = arith.addf %151, %153 : vector<8x128xf32>
    %155 = arith.negf %154 : vector<8x128xf32>
    %156 = math.exp %155 : vector<8x128xf32>
    %cst_73 = arith.constant 1.000000e+00 : f32
    %157 = vector.broadcast %cst_73 : f32 to vector<8x128xf32>
    %158 = arith.addf %157, %156 : vector<8x128xf32>
    %159 = arith.divf %157, %158 : vector<8x128xf32>
    %160 = arith.mulf %139, %107 : vector<8x128xf32>
    %161 = arith.mulf %127, %147 : vector<8x128xf32>
    %162 = arith.addf %160, %161 : vector<8x128xf32>
    %163 = math.tanh %162 : vector<8x128xf32>
    %164 = arith.mulf %159, %163 : vector<8x128xf32>
    %165 = arith.truncf %164 : vector<8x128xf32> to vector<8x128xbf16>
    %166 = arith.index_cast %c2_i32 : i32 to index
    %c0_74 = arith.constant 0 : index
    %c0_75 = arith.constant 0 : index
    %167 = vector.load %arg4[%166, %c0_74, %c0_75] : memref<8x8x128xbf16, #tpu.memory_space<vmem>>, vector<1x8x128xbf16>
    %168 = vector.shape_cast %167 : vector<1x8x128xbf16> to vector<8x128xbf16>
    %169 = vector.shape_cast %165 : vector<8x128xbf16> to vector<1x8x128xbf16>
    tpu.vector_store %arg4[%166, %c0_74, %c0_75], %169 {strides = array<i32>} : memref<8x8x128xbf16, #tpu.memory_space<vmem>>, vector<1x8x128xbf16>,
    %c3_i32 = arith.constant 3 : i32
    %170 = arith.truncf %164 : vector<8x128xf32> to vector<8x128xbf16>
    %171 = arith.index_cast %c3_i32 : i32 to index
    %c0_76 = arith.constant 0 : index
    %c0_77 = arith.constant 0 : index
    %172 = vector.load %arg2[%171, %c0_76, %c0_77] : memref<8x8x512xbf16, #tpu.memory_space<vmem>>, vector<1x8x128xbf16>
    %173 = vector.shape_cast %172 : vector<1x8x128xbf16> to vector<8x128xbf16>
    %174 = arith.extf %173 : vector<8x128xbf16> to vector<8x128xf32>
    %c0_78 = arith.constant 0 : index
    %c0_79 = arith.constant 0 : index
    %175 = vector.load %arg7[%c0_78, %c0_79] : memref<128x512xbf16, #tpu.memory_space<vmem>>, vector<128x128xbf16>
    %cst_80 = arith.constant dense<0.000000e+00> : vector<8x128xf32>
    %176 = tpu.matmul %170, %175, %cst_80 {dimension_numbers = #tpu.dot_dimension_numbers<[1], [0], [0], [1], [0, 0, 1, 1], [], []>} : vector<8x128xbf16>, vector<128x128xbf16>, vector<8x128xf32> -> vector<8x128xf32>
    %177 = arith.addf %174, %176 : vector<8x128xf32>
    %178 = arith.negf %177 : vector<8x128xf32>
    %179 = math.exp %178 : vector<8x128xf32>
    %cst_81 = arith.constant 1.000000e+00 : f32
    %180 = vector.broadcast %cst_81 : f32 to vector<8x128xf32>
    %181 = arith.addf %180, %179 : vector<8x128xf32>
    %182 = arith.divf %180, %181 : vector<8x128xf32>
    %183 = arith.index_cast %c3_i32 : i32 to index
    %c0_82 = arith.constant 0 : index
    %c128_83 = arith.constant 128 : index
    %184 = vector.load %arg2[%183, %c0_82, %c128_83] : memref<8x8x512xbf16, #tpu.memory_space<vmem>>, vector<1x8x128xbf16>
    %185 = vector.shape_cast %184 : vector<1x8x128xbf16> to vector<8x128xbf16>
    %186 = arith.extf %185 : vector<8x128xbf16> to vector<8x128xf32>
    %c0_84 = arith.constant 0 : index
    %c128_85 = arith.constant 128 : index
    %187 = vector.load %arg7[%c0_84, %c128_85] : memref<128x512xbf16, #tpu.memory_space<vmem>>, vector<128x128xbf16>
    %cst_86 = arith.constant dense<0.000000e+00> : vector<8x128xf32>
    %188 = tpu.matmul %170, %187, %cst_86 {dimension_numbers = #tpu.dot_dimension_numbers<[1], [0], [0], [1], [0, 0, 1, 1], [], []>} : vector<8x128xbf16>, vector<128x128xbf16>, vector<8x128xf32> -> vector<8x128xf32>
    %189 = arith.addf %186, %188 : vector<8x128xf32>
    %190 = arith.negf %189 : vector<8x128xf32>
    %191 = math.exp %190 : vector<8x128xf32>
    %cst_87 = arith.constant 1.000000e+00 : f32
    %192 = vector.broadcast %cst_87 : f32 to vector<8x128xf32>
    %193 = arith.addf %192, %191 : vector<8x128xf32>
    %194 = arith.divf %192, %193 : vector<8x128xf32>
    %195 = arith.index_cast %c3_i32 : i32 to index
    %c0_88 = arith.constant 0 : index
    %c256_89 = arith.constant 256 : index
    %196 = vector.load %arg2[%195, %c0_88, %c256_89] : memref<8x8x512xbf16, #tpu.memory_space<vmem>>, vector<1x8x128xbf16>
    %197 = vector.shape_cast %196 : vector<1x8x128xbf16> to vector<8x128xbf16>
    %198 = arith.extf %197 : vector<8x128xbf16> to vector<8x128xf32>
    %c0_90 = arith.constant 0 : index
    %c256_91 = arith.constant 256 : index
    %199 = vector.load %arg7[%c0_90, %c256_91] : memref<128x512xbf16, #tpu.memory_space<vmem>>, vector<128x128xbf16>
    %cst_92 = arith.constant dense<0.000000e+00> : vector<8x128xf32>
    %200 = tpu.matmul %170, %199, %cst_92 {dimension_numbers = #tpu.dot_dimension_numbers<[1], [0], [0], [1], [0, 0, 1, 1], [], []>} : vector<8x128xbf16>, vector<128x128xbf16>, vector<8x128xf32> -> vector<8x128xf32>
    %201 = arith.addf %198, %200 : vector<8x128xf32>
    %202 = math.tanh %201 : vector<8x128xf32>
    %203 = arith.index_cast %c3_i32 : i32 to index
    %c0_93 = arith.constant 0 : index
    %c384_94 = arith.constant 384 : index
    %204 = vector.load %arg2[%203, %c0_93, %c384_94] : memref<8x8x512xbf16, #tpu.memory_space<vmem>>, vector<1x8x128xbf16>
    %205 = vector.shape_cast %204 : vector<1x8x128xbf16> to vector<8x128xbf16>
    %206 = arith.extf %205 : vector<8x128xbf16> to vector<8x128xf32>
    %c0_95 = arith.constant 0 : index
    %c384_96 = arith.constant 384 : index
    %207 = vector.load %arg7[%c0_95, %c384_96] : memref<128x512xbf16, #tpu.memory_space<vmem>>, vector<128x128xbf16>
    %cst_97 = arith.constant dense<0.000000e+00> : vector<8x128xf32>
    %208 = tpu.matmul %170, %207, %cst_97 {dimension_numbers = #tpu.dot_dimension_numbers<[1], [0], [0], [1], [0, 0, 1, 1], [], []>} : vector<8x128xbf16>, vector<128x128xbf16>, vector<8x128xf32> -> vector<8x128xf32>
    %209 = arith.addf %206, %208 : vector<8x128xf32>
    %210 = arith.negf %209 : vector<8x128xf32>
    %211 = math.exp %210 : vector<8x128xf32>
    %cst_98 = arith.constant 1.000000e+00 : f32
    %212 = vector.broadcast %cst_98 : f32 to vector<8x128xf32>
    %213 = arith.addf %212, %211 : vector<8x128xf32>
    %214 = arith.divf %212, %213 : vector<8x128xf32>
    %215 = arith.mulf %194, %162 : vector<8x128xf32>
    %216 = arith.mulf %182, %202 : vector<8x128xf32>
    %217 = arith.addf %215, %216 : vector<8x128xf32>
    %218 = math.tanh %217 : vector<8x128xf32>
    %219 = arith.mulf %214, %218 : vector<8x128xf32>
    %220 = arith.truncf %219 : vector<8x128xf32> to vector<8x128xbf16>
    %221 = arith.index_cast %c3_i32 : i32 to index
    %c0_99 = arith.constant 0 : index
    %c0_100 = arith.constant 0 : index
    %222 = vector.load %arg4[%221, %c0_99, %c0_100] : memref<8x8x128xbf16, #tpu.memory_space<vmem>>, vector<1x8x128xbf16>
    %223 = vector.shape_cast %222 : vector<1x8x128xbf16> to vector<8x128xbf16>
    %224 = vector.shape_cast %220 : vector<8x128xbf16> to vector<1x8x128xbf16>
    tpu.vector_store %arg4[%221, %c0_99, %c0_100], %224 {strides = array<i32>} : memref<8x8x128xbf16, #tpu.memory_space<vmem>>, vector<1x8x128xbf16>,
    %c4_i32 = arith.constant 4 : i32
    %225 = arith.truncf %219 : vector<8x128xf32> to vector<8x128xbf16>
    %226 = arith.index_cast %c4_i32 : i32 to index
    %c0_101 = arith.constant 0 : index
    %c0_102 = arith.constant 0 : index
    %227 = vector.load %arg2[%226, %c0_101, %c0_102] : memref<8x8x512xbf16, #tpu.memory_space<vmem>>, vector<1x8x128xbf16>
    %228 = vector.shape_cast %227 : vector<1x8x128xbf16> to vector<8x128xbf16>
    %229 = arith.extf %228 : vector<8x128xbf16> to vector<8x128xf32>
    %c0_103 = arith.constant 0 : index
    %c0_104 = arith.constant 0 : index
    %230 = vector.load %arg7[%c0_103, %c0_104] : memref<128x512xbf16, #tpu.memory_space<vmem>>, vector<128x128xbf16>
    %cst_105 = arith.constant dense<0.000000e+00> : vector<8x128xf32>
    %231 = tpu.matmul %225, %230, %cst_105 {dimension_numbers = #tpu.dot_dimension_numbers<[1], [0], [0], [1], [0, 0, 1, 1], [], []>} : vector<8x128xbf16>, vector<128x128xbf16>, vector<8x128xf32> -> vector<8x128xf32>
    %232 = arith.addf %229, %231 : vector<8x128xf32>
    %233 = arith.negf %232 : vector<8x128xf32>
    %234 = math.exp %233 : vector<8x128xf32>
    %cst_106 = arith.constant 1.000000e+00 : f32
    %235 = vector.broadcast %cst_106 : f32 to vector<8x128xf32>
    %236 = arith.addf %235, %234 : vector<8x128xf32>
    %237 = arith.divf %235, %236 : vector<8x128xf32>
    %238 = arith.index_cast %c4_i32 : i32 to index
    %c0_107 = arith.constant 0 : index
    %c128_108 = arith.constant 128 : index
    %239 = vector.load %arg2[%238, %c0_107, %c128_108] : memref<8x8x512xbf16, #tpu.memory_space<vmem>>, vector<1x8x128xbf16>
    %240 = vector.shape_cast %239 : vector<1x8x128xbf16> to vector<8x128xbf16>
    %241 = arith.extf %240 : vector<8x128xbf16> to vector<8x128xf32>
    %c0_109 = arith.constant 0 : index
    %c128_110 = arith.constant 128 : index
    %242 = vector.load %arg7[%c0_109, %c128_110] : memref<128x512xbf16, #tpu.memory_space<vmem>>, vector<128x128xbf16>
    %cst_111 = arith.constant dense<0.000000e+00> : vector<8x128xf32>
    %243 = tpu.matmul %225, %242, %cst_111 {dimension_numbers = #tpu.dot_dimension_numbers<[1], [0], [0], [1], [0, 0, 1, 1], [], []>} : vector<8x128xbf16>, vector<128x128xbf16>, vector<8x128xf32> -> vector<8x128xf32>
    %244 = arith.addf %241, %243 : vector<8x128xf32>
    %245 = arith.negf %244 : vector<8x128xf32>
    %246 = math.exp %245 : vector<8x128xf32>
    %cst_112 = arith.constant 1.000000e+00 : f32
    %247 = vector.broadcast %cst_112 : f32 to vector<8x128xf32>
    %248 = arith.addf %247, %246 : vector<8x128xf32>
    %249 = arith.divf %247, %248 : vector<8x128xf32>
    %250 = arith.index_cast %c4_i32 : i32 to index
    %c0_113 = arith.constant 0 : index
    %c256_114 = arith.constant 256 : index
    %251 = vector.load %arg2[%250, %c0_113, %c256_114] : memref<8x8x512xbf16, #tpu.memory_space<vmem>>, vector<1x8x128xbf16>
    %252 = vector.shape_cast %251 : vector<1x8x128xbf16> to vector<8x128xbf16>
    %253 = arith.extf %252 : vector<8x128xbf16> to vector<8x128xf32>
    %c0_115 = arith.constant 0 : index
    %c256_116 = arith.constant 256 : index
    %254 = vector.load %arg7[%c0_115, %c256_116] : memref<128x512xbf16, #tpu.memory_space<vmem>>, vector<128x128xbf16>
    %cst_117 = arith.constant dense<0.000000e+00> : vector<8x128xf32>
    %255 = tpu.matmul %225, %254, %cst_117 {dimension_numbers = #tpu.dot_dimension_numbers<[1], [0], [0], [1], [0, 0, 1, 1], [], []>} : vector<8x128xbf16>, vector<128x128xbf16>, vector<8x128xf32> -> vector<8x128xf32>
    %256 = arith.addf %253, %255 : vector<8x128xf32>
    %257 = math.tanh %256 : vector<8x128xf32>
    %258 = arith.index_cast %c4_i32 : i32 to index
    %c0_118 = arith.constant 0 : index
    %c384_119 = arith.constant 384 : index
    %259 = vector.load %arg2[%258, %c0_118, %c384_119] : memref<8x8x512xbf16, #tpu.memory_space<vmem>>, vector<1x8x128xbf16>
    %260 = vector.shape_cast %259 : vector<1x8x128xbf16> to vector<8x128xbf16>
    %261 = arith.extf %260 : vector<8x128xbf16> to vector<8x128xf32>
    %c0_120 = arith.constant 0 : index
    %c384_121 = arith.constant 384 : index
    %262 = vector.load %arg7[%c0_120, %c384_121] : memref<128x512xbf16, #tpu.memory_space<vmem>>, vector<128x128xbf16>
    %cst_122 = arith.constant dense<0.000000e+00> : vector<8x128xf32>
    %263 = tpu.matmul %225, %262, %cst_122 {dimension_numbers = #tpu.dot_dimension_numbers<[1], [0], [0], [1], [0, 0, 1, 1], [], []>} : vector<8x128xbf16>, vector<128x128xbf16>, vector<8x128xf32> -> vector<8x128xf32>
    %264 = arith.addf %261, %263 : vector<8x128xf32>
    %265 = arith.negf %264 : vector<8x128xf32>
    %266 = math.exp %265 : vector<8x128xf32>
    %cst_123 = arith.constant 1.000000e+00 : f32
    %267 = vector.broadcast %cst_123 : f32 to vector<8x128xf32>
    %268 = arith.addf %267, %266 : vector<8x128xf32>
    %269 = arith.divf %267, %268 : vector<8x128xf32>
    %270 = arith.mulf %249, %217 : vector<8x128xf32>
    %271 = arith.mulf %237, %257 : vector<8x128xf32>
    %272 = arith.addf %270, %271 : vector<8x128xf32>
    %273 = math.tanh %272 : vector<8x128xf32>
    %274 = arith.mulf %269, %273 : vector<8x128xf32>
    %275 = arith.truncf %274 : vector<8x128xf32> to vector<8x128xbf16>
    %276 = arith.index_cast %c4_i32 : i32 to index
    %c0_124 = arith.constant 0 : index
    %c0_125 = arith.constant 0 : index
    %277 = vector.load %arg4[%276, %c0_124, %c0_125] : memref<8x8x128xbf16, #tpu.memory_space<vmem>>, vector<1x8x128xbf16>
    %278 = vector.shape_cast %277 : vector<1x8x128xbf16> to vector<8x128xbf16>
    %279 = vector.shape_cast %275 : vector<8x128xbf16> to vector<1x8x128xbf16>
    tpu.vector_store %arg4[%276, %c0_124, %c0_125], %279 {strides = array<i32>} : memref<8x8x128xbf16, #tpu.memory_space<vmem>>, vector<1x8x128xbf16>,
    %c5_i32 = arith.constant 5 : i32
    %280 = arith.truncf %274 : vector<8x128xf32> to vector<8x128xbf16>
    %281 = arith.index_cast %c5_i32 : i32 to index
    %c0_126 = arith.constant 0 : index
    %c0_127 = arith.constant 0 : index
    %282 = vector.load %arg2[%281, %c0_126, %c0_127] : memref<8x8x512xbf16, #tpu.memory_space<vmem>>, vector<1x8x128xbf16>
    %283 = vector.shape_cast %282 : vector<1x8x128xbf16> to vector<8x128xbf16>
    %284 = arith.extf %283 : vector<8x128xbf16> to vector<8x128xf32>
    %c0_128 = arith.constant 0 : index
    %c0_129 = arith.constant 0 : index
    %285 = vector.load %arg7[%c0_128, %c0_129] : memref<128x512xbf16, #tpu.memory_space<vmem>>, vector<128x128xbf16>
    %cst_130 = arith.constant dense<0.000000e+00> : vector<8x128xf32>
    %286 = tpu.matmul %280, %285, %cst_130 {dimension_numbers = #tpu.dot_dimension_numbers<[1], [0], [0], [1], [0, 0, 1, 1], [], []>} : vector<8x128xbf16>, vector<128x128xbf16>, vector<8x128xf32> -> vector<8x128xf32>
    %287 = arith.addf %284, %286 : vector<8x128xf32>
    %288 = arith.negf %287 : vector<8x128xf32>
    %289 = math.exp %288 : vector<8x128xf32>
    %cst_131 = arith.constant 1.000000e+00 : f32
    %290 = vector.broadcast %cst_131 : f32 to vector<8x128xf32>
    %291 = arith.addf %290, %289 : vector<8x128xf32>
    %292 = arith.divf %290, %291 : vector<8x128xf32>
    %293 = arith.index_cast %c5_i32 : i32 to index
    %c0_132 = arith.constant 0 : index
    %c128_133 = arith.constant 128 : index
    %294 = vector.load %arg2[%293, %c0_132, %c128_133] : memref<8x8x512xbf16, #tpu.memory_space<vmem>>, vector<1x8x128xbf16>
    %295 = vector.shape_cast %294 : vector<1x8x128xbf16> to vector<8x128xbf16>
    %296 = arith.extf %295 : vector<8x128xbf16> to vector<8x128xf32>
    %c0_134 = arith.constant 0 : index
    %c128_135 = arith.constant 128 : index
    %297 = vector.load %arg7[%c0_134, %c128_135] : memref<128x512xbf16, #tpu.memory_space<vmem>>, vector<128x128xbf16>
    %cst_136 = arith.constant dense<0.000000e+00> : vector<8x128xf32>
    %298 = tpu.matmul %280, %297, %cst_136 {dimension_numbers = #tpu.dot_dimension_numbers<[1], [0], [0], [1], [0, 0, 1, 1], [], []>} : vector<8x128xbf16>, vector<128x128xbf16>, vector<8x128xf32> -> vector<8x128xf32>
    %299 = arith.addf %296, %298 : vector<8x128xf32>
    %300 = arith.negf %299 : vector<8x128xf32>
    %301 = math.exp %300 : vector<8x128xf32>
    %cst_137 = arith.constant 1.000000e+00 : f32
    %302 = vector.broadcast %cst_137 : f32 to vector<8x128xf32>
    %303 = arith.addf %302, %301 : vector<8x128xf32>
    %304 = arith.divf %302, %303 : vector<8x128xf32>
    %305 = arith.index_cast %c5_i32 : i32 to index
    %c0_138 = arith.constant 0 : index
    %c256_139 = arith.constant 256 : index
    %306 = vector.load %arg2[%305, %c0_138, %c256_139] : memref<8x8x512xbf16, #tpu.memory_space<vmem>>, vector<1x8x128xbf16>
    %307 = vector.shape_cast %306 : vector<1x8x128xbf16> to vector<8x128xbf16>
    %308 = arith.extf %307 : vector<8x128xbf16> to vector<8x128xf32>
    %c0_140 = arith.constant 0 : index
    %c256_141 = arith.constant 256 : index
    %309 = vector.load %arg7[%c0_140, %c256_141] : memref<128x512xbf16, #tpu.memory_space<vmem>>, vector<128x128xbf16>
    %cst_142 = arith.constant dense<0.000000e+00> : vector<8x128xf32>
    %310 = tpu.matmul %280, %309, %cst_142 {dimension_numbers = #tpu.dot_dimension_numbers<[1], [0], [0], [1], [0, 0, 1, 1], [], []>} : vector<8x128xbf16>, vector<128x128xbf16>, vector<8x128xf32> -> vector<8x128xf32>
    %311 = arith.addf %308, %310 : vector<8x128xf32>
    %312 = math.tanh %311 : vector<8x128xf32>
    %313 = arith.index_cast %c5_i32 : i32 to index
    %c0_143 = arith.constant 0 : index
    %c384_144 = arith.constant 384 : index
    %314 = vector.load %arg2[%313, %c0_143, %c384_144] : memref<8x8x512xbf16, #tpu.memory_space<vmem>>, vector<1x8x128xbf16>
    %315 = vector.shape_cast %314 : vector<1x8x128xbf16> to vector<8x128xbf16>
    %316 = arith.extf %315 : vector<8x128xbf16> to vector<8x128xf32>
    %c0_145 = arith.constant 0 : index
    %c384_146 = arith.constant 384 : index
    %317 = vector.load %arg7[%c0_145, %c384_146] : memref<128x512xbf16, #tpu.memory_space<vmem>>, vector<128x128xbf16>
    %cst_147 = arith.constant dense<0.000000e+00> : vector<8x128xf32>
    %318 = tpu.matmul %280, %317, %cst_147 {dimension_numbers = #tpu.dot_dimension_numbers<[1], [0], [0], [1], [0, 0, 1, 1], [], []>} : vector<8x128xbf16>, vector<128x128xbf16>, vector<8x128xf32> -> vector<8x128xf32>
    %319 = arith.addf %316, %318 : vector<8x128xf32>
    %320 = arith.negf %319 : vector<8x128xf32>
    %321 = math.exp %320 : vector<8x128xf32>
    %cst_148 = arith.constant 1.000000e+00 : f32
    %322 = vector.broadcast %cst_148 : f32 to vector<8x128xf32>
    %323 = arith.addf %322, %321 : vector<8x128xf32>
    %324 = arith.divf %322, %323 : vector<8x128xf32>
    %325 = arith.mulf %304, %272 : vector<8x128xf32>
    %326 = arith.mulf %292, %312 : vector<8x128xf32>
    %327 = arith.addf %325, %326 : vector<8x128xf32>
    %328 = math.tanh %327 : vector<8x128xf32>
    %329 = arith.mulf %324, %328 : vector<8x128xf32>
    %330 = arith.truncf %329 : vector<8x128xf32> to vector<8x128xbf16>
    %331 = arith.index_cast %c5_i32 : i32 to index
    %c0_149 = arith.constant 0 : index
    %c0_150 = arith.constant 0 : index
    %332 = vector.load %arg4[%331, %c0_149, %c0_150] : memref<8x8x128xbf16, #tpu.memory_space<vmem>>, vector<1x8x128xbf16>
    %333 = vector.shape_cast %332 : vector<1x8x128xbf16> to vector<8x128xbf16>
    %334 = vector.shape_cast %330 : vector<8x128xbf16> to vector<1x8x128xbf16>
    tpu.vector_store %arg4[%331, %c0_149, %c0_150], %334 {strides = array<i32>} : memref<8x8x128xbf16, #tpu.memory_space<vmem>>, vector<1x8x128xbf16>,
    %c6_i32 = arith.constant 6 : i32
    %335 = arith.truncf %329 : vector<8x128xf32> to vector<8x128xbf16>
    %336 = arith.index_cast %c6_i32 : i32 to index
    %c0_151 = arith.constant 0 : index
    %c0_152 = arith.constant 0 : index
    %337 = vector.load %arg2[%336, %c0_151, %c0_152] : memref<8x8x512xbf16, #tpu.memory_space<vmem>>, vector<1x8x128xbf16>
    %338 = vector.shape_cast %337 : vector<1x8x128xbf16> to vector<8x128xbf16>
    %339 = arith.extf %338 : vector<8x128xbf16> to vector<8x128xf32>
    %c0_153 = arith.constant 0 : index
    %c0_154 = arith.constant 0 : index
    %340 = vector.load %arg7[%c0_153, %c0_154] : memref<128x512xbf16, #tpu.memory_space<vmem>>, vector<128x128xbf16>
    %cst_155 = arith.constant dense<0.000000e+00> : vector<8x128xf32>
    %341 = tpu.matmul %335, %340, %cst_155 {dimension_numbers = #tpu.dot_dimension_numbers<[1], [0], [0], [1], [0, 0, 1, 1], [], []>} : vector<8x128xbf16>, vector<128x128xbf16>, vector<8x128xf32> -> vector<8x128xf32>
    %342 = arith.addf %339, %341 : vector<8x128xf32>
    %343 = arith.negf %342 : vector<8x128xf32>
    %344 = math.exp %343 : vector<8x128xf32>
    %cst_156 = arith.constant 1.000000e+00 : f32
    %345 = vector.broadcast %cst_156 : f32 to vector<8x128xf32>
    %346 = arith.addf %345, %344 : vector<8x128xf32>
    %347 = arith.divf %345, %346 : vector<8x128xf32>
    %348 = arith.index_cast %c6_i32 : i32 to index
    %c0_157 = arith.constant 0 : index
    %c128_158 = arith.constant 128 : index
    %349 = vector.load %arg2[%348, %c0_157, %c128_158] : memref<8x8x512xbf16, #tpu.memory_space<vmem>>, vector<1x8x128xbf16>
    %350 = vector.shape_cast %349 : vector<1x8x128xbf16> to vector<8x128xbf16>
    %351 = arith.extf %350 : vector<8x128xbf16> to vector<8x128xf32>
    %c0_159 = arith.constant 0 : index
    %c128_160 = arith.constant 128 : index
    %352 = vector.load %arg7[%c0_159, %c128_160] : memref<128x512xbf16, #tpu.memory_space<vmem>>, vector<128x128xbf16>
    %cst_161 = arith.constant dense<0.000000e+00> : vector<8x128xf32>
    %353 = tpu.matmul %335, %352, %cst_161 {dimension_numbers = #tpu.dot_dimension_numbers<[1], [0], [0], [1], [0, 0, 1, 1], [], []>} : vector<8x128xbf16>, vector<128x128xbf16>, vector<8x128xf32> -> vector<8x128xf32>
    %354 = arith.addf %351, %353 : vector<8x128xf32>
    %355 = arith.negf %354 : vector<8x128xf32>
    %356 = math.exp %355 : vector<8x128xf32>
    %cst_162 = arith.constant 1.000000e+00 : f32
    %357 = vector.broadcast %cst_162 : f32 to vector<8x128xf32>
    %358 = arith.addf %357, %356 : vector<8x128xf32>
    %359 = arith.divf %357, %358 : vector<8x128xf32>
    %360 = arith.index_cast %c6_i32 : i32 to index
    %c0_163 = arith.constant 0 : index
    %c256_164 = arith.constant 256 : index
    %361 = vector.load %arg2[%360, %c0_163, %c256_164] : memref<8x8x512xbf16, #tpu.memory_space<vmem>>, vector<1x8x128xbf16>
    %362 = vector.shape_cast %361 : vector<1x8x128xbf16> to vector<8x128xbf16>
    %363 = arith.extf %362 : vector<8x128xbf16> to vector<8x128xf32>
    %c0_165 = arith.constant 0 : index
    %c256_166 = arith.constant 256 : index
    %364 = vector.load %arg7[%c0_165, %c256_166] : memref<128x512xbf16, #tpu.memory_space<vmem>>, vector<128x128xbf16>
    %cst_167 = arith.constant dense<0.000000e+00> : vector<8x128xf32>
    %365 = tpu.matmul %335, %364, %cst_167 {dimension_numbers = #tpu.dot_dimension_numbers<[1], [0], [0], [1], [0, 0, 1, 1], [], []>} : vector<8x128xbf16>, vector<128x128xbf16>, vector<8x128xf32> -> vector<8x128xf32>
    %366 = arith.addf %363, %365 : vector<8x128xf32>
    %367 = math.tanh %366 : vector<8x128xf32>
    %368 = arith.index_cast %c6_i32 : i32 to index
    %c0_168 = arith.constant 0 : index
    %c384_169 = arith.constant 384 : index
    %369 = vector.load %arg2[%368, %c0_168, %c384_169] : memref<8x8x512xbf16, #tpu.memory_space<vmem>>, vector<1x8x128xbf16>
    %370 = vector.shape_cast %369 : vector<1x8x128xbf16> to vector<8x128xbf16>
    %371 = arith.extf %370 : vector<8x128xbf16> to vector<8x128xf32>
    %c0_170 = arith.constant 0 : index
    %c384_171 = arith.constant 384 : index
    %372 = vector.load %arg7[%c0_170, %c384_171] : memref<128x512xbf16, #tpu.memory_space<vmem>>, vector<128x128xbf16>
    %cst_172 = arith.constant dense<0.000000e+00> : vector<8x128xf32>
    %373 = tpu.matmul %335, %372, %cst_172 {dimension_numbers = #tpu.dot_dimension_numbers<[1], [0], [0], [1], [0, 0, 1, 1], [], []>} : vector<8x128xbf16>, vector<128x128xbf16>, vector<8x128xf32> -> vector<8x128xf32>
    %374 = arith.addf %371, %373 : vector<8x128xf32>
    %375 = arith.negf %374 : vector<8x128xf32>
    %376 = math.exp %375 : vector<8x128xf32>
    %cst_173 = arith.constant 1.000000e+00 : f32
    %377 = vector.broadcast %cst_173 : f32 to vector<8x128xf32>
    %378 = arith.addf %377, %376 : vector<8x128xf32>
    %379 = arith.divf %377, %378 : vector<8x128xf32>
    %380 = arith.mulf %359, %327 : vector<8x128xf32>
    %381 = arith.mulf %347, %367 : vector<8x128xf32>
    %382 = arith.addf %380, %381 : vector<8x128xf32>
    %383 = math.tanh %382 : vector<8x128xf32>
    %384 = arith.mulf %379, %383 : vector<8x128xf32>
    %385 = arith.truncf %384 : vector<8x128xf32> to vector<8x128xbf16>
    %386 = arith.index_cast %c6_i32 : i32 to index
    %c0_174 = arith.constant 0 : index
    %c0_175 = arith.constant 0 : index
    %387 = vector.load %arg4[%386, %c0_174, %c0_175] : memref<8x8x128xbf16, #tpu.memory_space<vmem>>, vector<1x8x128xbf16>
    %388 = vector.shape_cast %387 : vector<1x8x128xbf16> to vector<8x128xbf16>
    %389 = vector.shape_cast %385 : vector<8x128xbf16> to vector<1x8x128xbf16>
    tpu.vector_store %arg4[%386, %c0_174, %c0_175], %389 {strides = array<i32>} : memref<8x8x128xbf16, #tpu.memory_space<vmem>>, vector<1x8x128xbf16>,
    %c7_i32 = arith.constant 7 : i32
    %390 = arith.truncf %384 : vector<8x128xf32> to vector<8x128xbf16>
    %391 = arith.index_cast %c7_i32 : i32 to index
    %c0_176 = arith.constant 0 : index
    %c0_177 = arith.constant 0 : index
    %392 = vector.load %arg2[%391, %c0_176, %c0_177] : memref<8x8x512xbf16, #tpu.memory_space<vmem>>, vector<1x8x128xbf16>
    %393 = vector.shape_cast %392 : vector<1x8x128xbf16> to vector<8x128xbf16>
    %394 = arith.extf %393 : vector<8x128xbf16> to vector<8x128xf32>
    %c0_178 = arith.constant 0 : index
    %c0_179 = arith.constant 0 : index
    %395 = vector.load %arg7[%c0_178, %c0_179] : memref<128x512xbf16, #tpu.memory_space<vmem>>, vector<128x128xbf16>
    %cst_180 = arith.constant dense<0.000000e+00> : vector<8x128xf32>
    %396 = tpu.matmul %390, %395, %cst_180 {dimension_numbers = #tpu.dot_dimension_numbers<[1], [0], [0], [1], [0, 0, 1, 1], [], []>} : vector<8x128xbf16>, vector<128x128xbf16>, vector<8x128xf32> -> vector<8x128xf32>
    %397 = arith.addf %394, %396 : vector<8x128xf32>
    %398 = arith.negf %397 : vector<8x128xf32>
    %399 = math.exp %398 : vector<8x128xf32>
    %cst_181 = arith.constant 1.000000e+00 : f32
    %400 = vector.broadcast %cst_181 : f32 to vector<8x128xf32>
    %401 = arith.addf %400, %399 : vector<8x128xf32>
    %402 = arith.divf %400, %401 : vector<8x128xf32>
    %403 = arith.index_cast %c7_i32 : i32 to index
    %c0_182 = arith.constant 0 : index
    %c128_183 = arith.constant 128 : index
    %404 = vector.load %arg2[%403, %c0_182, %c128_183] : memref<8x8x512xbf16, #tpu.memory_space<vmem>>, vector<1x8x128xbf16>
    %405 = vector.shape_cast %404 : vector<1x8x128xbf16> to vector<8x128xbf16>
    %406 = arith.extf %405 : vector<8x128xbf16> to vector<8x128xf32>
    %c0_184 = arith.constant 0 : index
    %c128_185 = arith.constant 128 : index
    %407 = vector.load %arg7[%c0_184, %c128_185] : memref<128x512xbf16, #tpu.memory_space<vmem>>, vector<128x128xbf16>
    %cst_186 = arith.constant dense<0.000000e+00> : vector<8x128xf32>
    %408 = tpu.matmul %390, %407, %cst_186 {dimension_numbers = #tpu.dot_dimension_numbers<[1], [0], [0], [1], [0, 0, 1, 1], [], []>} : vector<8x128xbf16>, vector<128x128xbf16>, vector<8x128xf32> -> vector<8x128xf32>
    %409 = arith.addf %406, %408 : vector<8x128xf32>
    %410 = arith.negf %409 : vector<8x128xf32>
    %411 = math.exp %410 : vector<8x128xf32>
    %cst_187 = arith.constant 1.000000e+00 : f32
    %412 = vector.broadcast %cst_187 : f32 to vector<8x128xf32>
    %413 = arith.addf %412, %411 : vector<8x128xf32>
    %414 = arith.divf %412, %413 : vector<8x128xf32>
    %415 = arith.index_cast %c7_i32 : i32 to index
    %c0_188 = arith.constant 0 : index
    %c256_189 = arith.constant 256 : index
    %416 = vector.load %arg2[%415, %c0_188, %c256_189] : memref<8x8x512xbf16, #tpu.memory_space<vmem>>, vector<1x8x128xbf16>
    %417 = vector.shape_cast %416 : vector<1x8x128xbf16> to vector<8x128xbf16>
    %418 = arith.extf %417 : vector<8x128xbf16> to vector<8x128xf32>
    %c0_190 = arith.constant 0 : index
    %c256_191 = arith.constant 256 : index
    %419 = vector.load %arg7[%c0_190, %c256_191] : memref<128x512xbf16, #tpu.memory_space<vmem>>, vector<128x128xbf16>
    %cst_192 = arith.constant dense<0.000000e+00> : vector<8x128xf32>
    %420 = tpu.matmul %390, %419, %cst_192 {dimension_numbers = #tpu.dot_dimension_numbers<[1], [0], [0], [1], [0, 0, 1, 1], [], []>} : vector<8x128xbf16>, vector<128x128xbf16>, vector<8x128xf32> -> vector<8x128xf32>
    %421 = arith.addf %418, %420 : vector<8x128xf32>
    %422 = math.tanh %421 : vector<8x128xf32>
    %423 = arith.index_cast %c7_i32 : i32 to index
    %c0_193 = arith.constant 0 : index
    %c384_194 = arith.constant 384 : index
    %424 = vector.load %arg2[%423, %c0_193, %c384_194] : memref<8x8x512xbf16, #tpu.memory_space<vmem>>, vector<1x8x128xbf16>
    %425 = vector.shape_cast %424 : vector<1x8x128xbf16> to vector<8x128xbf16>
    %426 = arith.extf %425 : vector<8x128xbf16> to vector<8x128xf32>
    %c0_195 = arith.constant 0 : index
    %c384_196 = arith.constant 384 : index
    %427 = vector.load %arg7[%c0_195, %c384_196] : memref<128x512xbf16, #tpu.memory_space<vmem>>, vector<128x128xbf16>
    %cst_197 = arith.constant dense<0.000000e+00> : vector<8x128xf32>
    %428 = tpu.matmul %390, %427, %cst_197 {dimension_numbers = #tpu.dot_dimension_numbers<[1], [0], [0], [1], [0, 0, 1, 1], [], []>} : vector<8x128xbf16>, vector<128x128xbf16>, vector<8x128xf32> -> vector<8x128xf32>
    %429 = arith.addf %426, %428 : vector<8x128xf32>
    %430 = arith.negf %429 : vector<8x128xf32>
    %431 = math.exp %430 : vector<8x128xf32>
    %cst_198 = arith.constant 1.000000e+00 : f32
    %432 = vector.broadcast %cst_198 : f32 to vector<8x128xf32>
    %433 = arith.addf %432, %431 : vector<8x128xf32>
    %434 = arith.divf %432, %433 : vector<8x128xf32>
    %435 = arith.mulf %414, %382 : vector<8x128xf32>
    %436 = arith.mulf %402, %422 : vector<8x128xf32>
    %437 = arith.addf %435, %436 : vector<8x128xf32>
    %438 = math.tanh %437 : vector<8x128xf32>
    %439 = arith.mulf %434, %438 : vector<8x128xf32>
    %440 = arith.truncf %439 : vector<8x128xf32> to vector<8x128xbf16>
    %441 = arith.index_cast %c7_i32 : i32 to index
    %c0_199 = arith.constant 0 : index
    %c0_200 = arith.constant 0 : index
    %442 = vector.load %arg4[%441, %c0_199, %c0_200] : memref<8x8x128xbf16, #tpu.memory_space<vmem>>, vector<1x8x128xbf16>
    %443 = vector.shape_cast %442 : vector<1x8x128xbf16> to vector<8x128xbf16>
    %444 = vector.shape_cast %440 : vector<8x128xbf16> to vector<1x8x128xbf16>
    tpu.vector_store %arg4[%441, %c0_199, %c0_200], %444 {strides = array<i32>} : memref<8x8x128xbf16, #tpu.memory_space<vmem>>, vector<1x8x128xbf16>,
    %c8_i32 = arith.constant 8 : i32
    %c0_201 = arith.constant 0 : index
    %c0_202 = arith.constant 0 : index
    %445 = vector.load %arg5[%c0_201, %c0_202] : memref<8x128xf32, #tpu.memory_space<vmem>>, vector<8x128xf32>
    tpu.vector_store %arg5[%c0_201, %c0_202], %439 {strides = array<i32>} : memref<8x128xf32, #tpu.memory_space<vmem>>, vector<8x128xf32>,
    %c0_203 = arith.constant 0 : index
    %c0_204 = arith.constant 0 : index
    %446 = vector.load %arg6[%c0_203, %c0_204] : memref<8x128xf32, #tpu.memory_space<vmem>>, vector<8x128xf32>
    tpu.vector_store %arg6[%c0_203, %c0_204], %437 {strides = array<i32>} : memref<8x128xf32, #tpu.memory_space<vmem>>, vector<8x128xf32>,
    return
  }
  func.func @transform_0(%arg0: i32, %arg1: i32) -> (i32, i32, i32) {
    %c0_i32 = arith.constant 0 : i32
    %c0_i32_0 = arith.constant 0 : i32
    return %arg1, %arg0, %c0_i32 : i32, i32, i32
  }
  func.func @transform_2(%arg0: i32, %arg1: i32) -> (i32, i32, i32) {
    %c0_i32 = arith.constant 0 : i32
    %c0_i32_0 = arith.constant 0 : i32
    return %arg1, %arg0, %c0_i32 : i32, i32, i32
  }
}

</mosaic_0001>

<bundles_post_ra>
// kernel: lstm_model_forward.9
= control target key start
LH: loop header
LB: loop body
LE: loop exit
PB: predicated region body
PF: predicated region fallthrough
CT: control target
= control target key end

     0   :  { %s323_s1 = inlined_call_operand.vmem [shape: bf16[128,128], index: 1, kind: input, shape index: {}]   ;;  %s324_s2 = inlined_call_operand.vmem [shape: f32[1,128], index: 2, kind: input, shape index: {}]   ;;  %s325_s0 = inlined_call_operand.vmem [shape: bf16[64,128], index: 0, kind: input, shape index: {}]   ;;  %s326_s3 = inlined_call_operand.vmem [shape: f32[64,128], index: 3, kind: output, shape index: {}]  }
   0x1   :  { %v214_v0 = vld [vmem:[%s323_s1 + $0x38] sm:$0xff]  ;;  %v213_v1 = vld [vmem:[%s323_s1 + $0x30] sm:$0xff]  ;;  %v212_v2 = vld [vmem:[%s323_s1 + $0x28] sm:$0xff] }
   0x2   :  { %114 = vmatpush.bf16.msra.mxu0 %v214_v0  ;;  %215 = vmatpush.bf16.msra.mxu1 %v214_v0  ;;  %v211_v3 = vld [vmem:[%s323_s1 + $0x20] sm:$0xff]  ;;  %v210_v4 = vld [vmem:[%s323_s1 + $0x18] sm:$0xff]  ;;  %v209_v5 = vld [vmem:[%s323_s1 + $0x10] sm:$0xff] }
   0x3   :  { %216 = vmatpush.bf16.msra.mxu2 %v214_v0  ;;  %217 = vmatpush.bf16.msra.mxu3 %v214_v0  ;;  %v208_v6 = vld [vmem:[%s323_s1 + $0x8] sm:$0xff]  ;;  %v207_v7 = vld [vmem:[%s323_s1] sm:$0xff]  ;;  %v205_v10 = vld [vmem:[%s325_s0 + $0x10] sm:$0xff] }
   0x4   :  { %v203_v8 = vld [vmem:[%s325_s0] sm:$0xff]  ;;  %v204_v9 = vld [vmem:[%s325_s0 + $0x8] sm:$0xff]  ;;  %v206_v11 = vld [vmem:[%s325_s0 + $0x18] sm:$0xff] }
   0x5   :  { %v239_v12 = vld [vmem:[%s324_s2] ss:$0 sm:$0xff] }
   0x6   :  { %115 = vmatpush.bf16.msra.mxu0 %v213_v1  ;;  %218 = vmatpush.bf16.msra.mxu1 %v213_v1 }
   0x7   :  { %219 = vmatpush.bf16.msra.mxu2 %v213_v1  ;;  %220 = vmatpush.bf16.msra.mxu3 %v213_v1 }
   0xa   :  { %116 = vmatpush.bf16.msra.mxu0 %v212_v2  ;;  %221 = vmatpush.bf16.msra.mxu1 %v212_v2 }
   0xb   :  { %222 = vmatpush.bf16.msra.mxu2 %v212_v2  ;;  %223 = vmatpush.bf16.msra.mxu3 %v212_v2 }
   0xe   :  { %117 = vmatpush.bf16.msra.mxu0 %v211_v3  ;;  %224 = vmatpush.bf16.msra.mxu1 %v211_v3 }
   0xf   :  { %225 = vmatpush.bf16.msra.mxu2 %v211_v3  ;;  %226 = vmatpush.bf16.msra.mxu3 %v211_v3 }
  0x12   :  { %118 = vmatpush.bf16.msra.mxu0 %v210_v4  ;;  %227 = vmatpush.bf16.msra.mxu1 %v210_v4 }
  0x13   :  { %228 = vmatpush.bf16.msra.mxu2 %v210_v4  ;;  %229 = vmatpush.bf16.msra.mxu3 %v210_v4 }
  0x16   :  { %119 = vmatpush.bf16.msra.mxu0 %v209_v5  ;;  %230 = vmatpush.bf16.msra.mxu1 %v209_v5 }
  0x17   :  { %231 = vmatpush.bf16.msra.mxu2 %v209_v5  ;;  %232 = vmatpush.bf16.msra.mxu3 %v209_v5 }
  0x1a   :  { %120 = vmatpush.bf16.msra.mxu0 %v208_v6  ;;  %233 = vmatpush.bf16.msra.mxu1 %v208_v6 }
  0x1b   :  { %234 = vmatpush.bf16.msra.mxu2 %v208_v6  ;;  %235 = vmatpush.bf16.msra.mxu3 %v208_v6 }
  0x1e   :  { %121 = vmatpush.bf16.msra.mxu0 %v207_v7  ;;  %236 = vmatpush.bf16.msra.mxu1 %v207_v7 }
  0x1f   :  { %237 = vmatpush.bf16.msra.mxu2 %v207_v7  ;;  %238 = vmatpush.bf16.msra.mxu3 %v207_v7 }
  0x21   :  { %122 = vmatmul.bf16.vlgmr.msra.gmra.mxu0 %v203_v8  ;;  %127 = vmatmul.bf16.vlgmr.msra.gmra.mxu1 %v204_v9 }
  0x22   :  { %132 = vmatmul.bf16.vlgmr.msra.gmra.mxu2 %v205_v10  ;;  %137 = vmatmul.bf16.vlgmr.msra.gmra.mxu3 %v206_v11 }
  0x9e   :  { %v123_v13 = vpop.f32.mrf.mxu0  ;;  %v128_v14 = vpop.f32.mrf.mxu1 }
  0x9f   :  { %v124_v15 = vadd.f32 %v239_v12, %v123_v13  ;;  %v129_v16 = vadd.f32 %v239_v12, %v128_v14 }
  0xa1   :  { %143 = vst [vmem:[%s326_s3] sm:$0xff] %v124_v15 }
  0xa2   :  { %145 = vst [vmem:[%s326_s3 + $0x10] sm:$0xff] %v129_v16 }
  0xa5   :  { %v133_v17 = vpop.f32.mrf.mxu2  ;;  %v138_v18 = vpop.f32.mrf.mxu3 }
  0xa6   :  { %v134_v19 = vadd.f32 %v239_v12, %v133_v17  ;;  %v139_v20 = vadd.f32 %v239_v12, %v138_v18  ;;  %v125_v21 = vpop.f32.mrf.mxu0  ;;  %v130_v22 = vpop.f32.mrf.mxu1 }
  0xa7   :  { %v126_v23 = vadd.f32 %v239_v12, %v125_v21  ;;  %v131_v24 = vadd.f32 %v239_v12, %v130_v22 }
  0xa8   :  { %147 = vst [vmem:[%s326_s3 + $0x20] sm:$0xff] %v134_v19 }
  0xa9   :  { %149 = vst [vmem:[%s326_s3 + $0x30] sm:$0xff] %v139_v20 }
  0xaa   :  { %144 = vst [vmem:[%s326_s3 + $0x8] sm:$0xff] %v126_v23 }
  0xab   :  { %146 = vst [vmem:[%s326_s3 + $0x18] sm:$0xff] %v131_v24 }
  0xad   :  { %v135_v25 = vpop.f32.mrf.mxu2  ;;  %v140_v26 = vpop.f32.mrf.mxu3 }
  0xae   :  { %v136_v27 = vadd.f32 %v239_v12, %v135_v25  ;;  %v141_v28 = vadd.f32 %v239_v12, %v140_v26 }
  0xb0   :  { %148 = vst [vmem:[%s326_s3 + $0x28] sm:$0xff] %v136_v27 }
  0xb1   :  { %150 = vst [vmem:[%s326_s3 + $0x38] sm:$0xff] %v141_v28 }

// kernel: lstm_model_forward.5
= control target key start
LH: loop header
LB: loop body
LE: loop exit
PB: predicated region body
PF: predicated region fallthrough
CT: control target
= control target key end

     0   :  { %s895_s1 = inlined_call_operand.vmem [shape: bf16[128,512], index: 1, kind: input, shape index: {}]   ;;  %s896_s0 = inlined_call_operand.vmem [shape: bf16[64,128], index: 0, kind: input, shape index: {}]   ;;  %s897_s2 = inlined_call_operand.vmem [shape: f32[1,512], index: 2, kind: input, shape index: {}]   ;;  %s898_s3 = inlined_call_operand.vmem [shape: bf16[64,512], index: 3, kind: output, shape index: {}]  }
   0x1   :  { %v530_v0 = vld [vmem:[%s895_s1 + $0xe0] sm:$0xf]  ;;  %v578_v1 = vld [vmem:[%s895_s1 + $0xec] sm:$0xf0]  ;;  %v576_v2 = vld [vmem:[%s895_s1 + $0xe4] sm:$0xf] }
   0x2   :  { %v531_v3 = vor.u32 %v578_v1, %v530_v0  ;;  %v532_v4 = vld [vmem:[%s895_s1 + $0xf0] sm:$0xf0]  ;;  %v538_v5 = vld [vmem:[%s895_s1 + $0xe8] sm:$0xf]  ;;  %v579_v6 = vld [vmem:[%s895_s1 + $0xf4] sm:$0xf0] }
   0x3   :  { %v535_v7 = vor.u32 %v576_v2, %v532_v4  ;;  %v539_v8 = vor.u32 %v579_v6, %v538_v5  ;;  %v577_v9 = vld [vmem:[%s895_s1 + $0xec] sm:$0xf]  ;;  %v540_v10 = vld [vmem:[%s895_s1 + $0xf8] sm:$0xf0]  ;;  %v514_v11 = vld [vmem:[%s895_s1 + $0xc0] sm:$0xf] }
   0x4   :  { %248 = vmatpush.bf16.msra.mxu0 %v531_v3  ;;  %v543_v12 = vor.u32 %v577_v9, %v540_v10  ;;  %v574_v13 = vld [vmem:[%s895_s1 + $0xcc] sm:$0xf0]  ;;  %v572_v14 = vld [vmem:[%s895_s1 + $0xc4] sm:$0xf]  ;;  %v516_v15 = vld [vmem:[%s895_s1 + $0xd0] sm:$0xf0] }
   0x5   :  { %277 = vmatpush.bf16.msra.mxu1 %v535_v7  ;;  %306 = vmatpush.bf16.msra.mxu2 %v539_v8  ;;  %v515_v16 = vor.u32 %v574_v13, %v514_v11  ;;  %v519_v17 = vor.u32 %v572_v14, %v516_v15  ;;  %v522_v18 = vld [vmem:[%s895_s1 + $0xc8] sm:$0xf]  ;;  %v575_v19 = vld [vmem:[%s895_s1 + $0xd4] sm:$0xf0]  ;;  %v573_v20 = vld [vmem:[%s895_s1 + $0xcc] sm:$0xf] }
   0x6   :  { %335 = vmatpush.bf16.msra.mxu3 %v543_v12  ;;  %v523_v21 = vor.u32 %v575_v19, %v522_v18  ;;  %v524_v22 = vld [vmem:[%s895_s1 + $0xd8] sm:$0xf0]  ;;  %v498_v23 = vld [vmem:[%s895_s1 + $0xa0] sm:$0xf]  ;;  %v570_v24 = vld [vmem:[%s895_s1 + $0xac] sm:$0xf0] }
   0x7   :  { %v527_v25 = vor.u32 %v573_v20, %v524_v22  ;;  %v568_v26 = vld [vmem:[%s895_s1 + $0xa4] sm:$0xf]  ;;  %v500_v27 = vld [vmem:[%s895_s1 + $0xb0] sm:$0xf0]  ;;  %v506_v28 = vld [vmem:[%s895_s1 + $0xa8] sm:$0xf]  ;;  %v499_v29 = vor.u32 %v570_v24, %v498_v23 }
   0x8   :  { %249 = vmatpush.bf16.msra.mxu0 %v515_v16  ;;  %v571_v30 = vld [vmem:[%s895_s1 + $0xb4] sm:$0xf0]  ;;  %v569_v31 = vld [vmem:[%s895_s1 + $0xac] sm:$0xf]  ;;  %v508_v32 = vld [vmem:[%s895_s1 + $0xb8] sm:$0xf0]  ;;  %v503_v33 = vor.u32 %v568_v26, %v500_v27 }
   0x9   :  { %278 = vmatpush.bf16.msra.mxu1 %v519_v17  ;;  %307 = vmatpush.bf16.msra.mxu2 %v523_v21  ;;  %v507_v34 = vor.u32 %v571_v30, %v506_v28  ;;  %v482_v35 = vld [vmem:[%s895_s1 + $0x80] sm:$0xf]  ;;  %v566_v36 = vld [vmem:[%s895_s1 + $0x8c] sm:$0xf0]  ;;  %v564_v37 = vld [vmem:[%s895_s1 + $0x84] sm:$0xf]  ;;  %v511_v38 = vor.u32 %v569_v31, %v508_v32 }
   0xa   :  { %336 = vmatpush.bf16.msra.mxu3 %v527_v25  ;;  %v484_v39 = vld [vmem:[%s895_s1 + $0x90] sm:$0xf0]  ;;  %v490_v40 = vld [vmem:[%s895_s1 + $0x88] sm:$0xf]  ;;  %v567_v41 = vld [vmem:[%s895_s1 + $0x94] sm:$0xf0]  ;;  %v483_v44 = vor.u32 %v566_v36, %v482_v35 }
   0xb   :  { %v565_v42 = vld [vmem:[%s895_s1 + $0x8c] sm:$0xf]  ;;  %v492_v43 = vld [vmem:[%s895_s1 + $0x98] sm:$0xf0]  ;;  %v487_v45 = vor.u32 %v564_v37, %v484_v39  ;;  %v491_v46 = vor.u32 %v567_v41, %v490_v40  ;;  %v466_v47 = vld [vmem:[%s895_s1 + $0x60] sm:$0xf] }
   0xc   :  { %250 = vmatpush.bf16.msra.mxu0 %v499_v29  ;;  %v562_v48 = vld [vmem:[%s895_s1 + $0x6c] sm:$0xf0]  ;;  %v560_v49 = vld [vmem:[%s895_s1 + $0x64] sm:$0xf]  ;;  %v495_v50 = vor.u32 %v565_v42, %v492_v43  ;;  %v468_v51 = vld [vmem:[%s895_s1 + $0x70] sm:$0xf0] }
   0xd   :  { %279 = vmatpush.bf16.msra.mxu1 %v503_v33  ;;  %308 = vmatpush.bf16.msra.mxu2 %v507_v34  ;;  %v474_v52 = vld [vmem:[%s895_s1 + $0x68] sm:$0xf]  ;;  %v563_v53 = vld [vmem:[%s895_s1 + $0x74] sm:$0xf0]  ;;  %v561_v54 = vld [vmem:[%s895_s1 + $0x6c] sm:$0xf]  ;;  %v467_v56 = vor.u32 %v562_v48, %v466_v47  ;;  %v471_v57 = vor.u32 %v560_v49, %v468_v51 }
   0xe   :  { %337 = vmatpush.bf16.msra.mxu3 %v511_v38  ;;  %v476_v55 = vld [vmem:[%s895_s1 + $0x78] sm:$0xf0]  ;;  %v475_v58 = vor.u32 %v563_v53, %v474_v52  ;;  %v450_v59 = vld [vmem:[%s895_s1 + $0x40] sm:$0xf]  ;;  %v558_v60 = vld [vmem:[%s895_s1 + $0x4c] sm:$0xf0] }
   0xf   :  { %v556_v61 = vld [vmem:[%s895_s1 + $0x44] sm:$0xf]  ;;  %v479_v62 = vor.u32 %v561_v54, %v476_v55  ;;  %v452_v63 = vld [vmem:[%s895_s1 + $0x50] sm:$0xf0]  ;;  %v458_v0 = vld [vmem:[%s895_s1 + $0x48] sm:$0xf]  ;;  %v451_v4 = vor.u32 %v558_v60, %v450_v59 }
  0x10   :  { %251 = vmatpush.bf16.msra.mxu0 %v483_v44  ;;  %v559_v1 = vld [vmem:[%s895_s1 + $0x54] sm:$0xf0]  ;;  %v557_v2 = vld [vmem:[%s895_s1 + $0x4c] sm:$0xf]  ;;  %v460_v3 = vld [vmem:[%s895_s1 + $0x58] sm:$0xf0]  ;;  %v455_v5 = vor.u32 %v556_v61, %v452_v63 }
  0x11   :  { %280 = vmatpush.bf16.msra.mxu1 %v487_v45  ;;  %309 = vmatpush.bf16.msra.mxu2 %v491_v46  ;;  %v459_v6 = vor.u32 %v559_v1, %v458_v0  ;;  %v434_v7 = vld [vmem:[%s895_s1 + $0x20] sm:$0xf]  ;;  %v554_v8 = vld [vmem:[%s895_s1 + $0x2c] sm:$0xf0]  ;;  %v552_v9 = vld [vmem:[%s895_s1 + $0x24] sm:$0xf]  ;;  %v463_v10 = vor.u32 %v557_v2, %v460_v3 }
  0x12   :  { %338 = vmatpush.bf16.msra.mxu3 %v495_v50  ;;  %v436_v11 = vld [vmem:[%s895_s1 + $0x30] sm:$0xf0]  ;;  %v442_v12 = vld [vmem:[%s895_s1 + $0x28] sm:$0xf]  ;;  %v555_v13 = vld [vmem:[%s895_s1 + $0x34] sm:$0xf0]  ;;  %v435_v16 = vor.u32 %v554_v8, %v434_v7 }
  0x13   :  { %v553_v14 = vld [vmem:[%s895_s1 + $0x2c] sm:$0xf]  ;;  %v444_v15 = vld [vmem:[%s895_s1 + $0x38] sm:$0xf0]  ;;  %v439_v17 = vor.u32 %v552_v9, %v436_v11  ;;  %v443_v18 = vor.u32 %v555_v13, %v442_v12  ;;  %v418_v19 = vld [vmem:[%s895_s1] sm:$0xf] }
  0x14   :  { %252 = vmatpush.bf16.msra.mxu0 %v467_v56  ;;  %v550_v20 = vld [vmem:[%s895_s1 + $0xc] sm:$0xf0]  ;;  %v548_v21 = vld [vmem:[%s895_s1 + $0x4] sm:$0xf]  ;;  %v447_v22 = vor.u32 %v553_v14, %v444_v15  ;;  %v420_v23 = vld [vmem:[%s895_s1 + $0x10] sm:$0xf0] }
  0x15   :  { %281 = vmatpush.bf16.msra.mxu1 %v471_v57  ;;  %310 = vmatpush.bf16.msra.mxu2 %v475_v58  ;;  %v426_v24 = vld [vmem:[%s895_s1 + $0x8] sm:$0xf]  ;;  %v551_v25 = vld [vmem:[%s895_s1 + $0x14] sm:$0xf0]  ;;  %v549_v26 = vld [vmem:[%s895_s1 + $0xc] sm:$0xf]  ;;  %v419_v28 = vor.u32 %v550_v20, %v418_v19  ;;  %v423_v29 = vor.u32 %v548_v21, %v420_v23 }
  0x16   :  { %339 = vmatpush.bf16.msra.mxu3 %v479_v62  ;;  %v428_v27 = vld [vmem:[%s895_s1 + $0x18] sm:$0xf0]  ;;  %v427_v30 = vor.u32 %v551_v25, %v426_v24  ;;  %v544_v32 = vld [vmem:[%s896_s0] sm:$0xff]  ;;  %v545_v33 = vld [vmem:[%s896_s0 + $0x8] sm:$0xff] }
  0x17   :  { %v431_v31 = vor.u32 %v549_v26, %v428_v27  ;;  %v546_v34 = vld [vmem:[%s896_s0 + $0x10] sm:$0xff]  ;;  %v547_v35 = vld [vmem:[%s896_s0 + $0x18] sm:$0xff]  ;;  %v54_v36 = vld [vmem:[%s897_s2] sm:$0xf] }
  0x18   :  { %253 = vmatpush.bf16.msra.mxu0 %v451_v4  ;;  %v807_v37 = vperm.slane %v54_v36, 0  ;;  %v809_v38 = vperm.slane %v54_v36, 1  ;;  %v813_v44 = vperm.slane %v54_v36, 2  ;;  %v815_v45 = vperm.slane %v54_v36, 3 }
  0x19   :  { %282 = vmatpush.bf16.msra.mxu1 %v455_v5  ;;  %311 = vmatpush.bf16.msra.mxu2 %v459_v6 }
  0x1a   :  { %340 = vmatpush.bf16.msra.mxu3 %v463_v10 }
  0x1c   :  { %254 = vmatpush.bf16.msra.mxu0 %v435_v16 }
  0x1d   :  { %283 = vmatpush.bf16.msra.mxu1 %v439_v17  ;;  %312 = vmatpush.bf16.msra.mxu2 %v443_v18 }
  0x1e   :  { %341 = vmatpush.bf16.msra.mxu3 %v447_v22 }
  0x20   :  { %255 = vmatpush.bf16.msra.mxu0 %v419_v28 }
  0x21   :  { %284 = vmatpush.bf16.msra.mxu1 %v423_v29  ;;  %313 = vmatpush.bf16.msra.mxu2 %v427_v30 }
  0x22   :  { %342 = vmatpush.bf16.msra.mxu3 %v431_v31 }
  0x23   :  { %256 = vmatmul.bf16.vlgmr.msra.gmra.mxu0 %v544_v32 }
  0x24   :  { %285 = vmatmul.bf16.vlgmr.msra.gmra.mxu1 %v544_v32  ;;  %314 = vmatmul.bf16.vlgmr.msra.gmra.mxu2 %v544_v32 }
  0x25   :  { %343 = vmatmul.bf16.vlgmr.msra.gmra.mxu3 %v544_v32 }
  0x33   :  { %261 = vmatmul.bf16.gmra.mxu0 %v545_v33 }
  0x34   :  { %290 = vmatmul.bf16.gmra.mxu1 %v545_v33  ;;  %319 = vmatmul.bf16.gmra.mxu2 %v545_v33 }
  0x35   :  { %348 = vmatmul.bf16.gmra.mxu3 %v545_v33 }
  0x43   :  { %266 = vmatmul.bf16.gmra.mxu0 %v546_v34 }
  0x44   :  { %295 = vmatmul.bf16.gmra.mxu1 %v546_v34  ;;  %324 = vmatmul.bf16.gmra.mxu2 %v546_v34 }
  0x45   :  { %353 = vmatmul.bf16.gmra.mxu3 %v546_v34 }
  0x53   :  { %271 = vmatmul.bf16.gmra.mxu0 %v547_v35 }
  0x54   :  { %300 = vmatmul.bf16.gmra.mxu1 %v547_v35  ;;  %329 = vmatmul.bf16.gmra.mxu2 %v547_v35 }
  0x55   :  { %358 = vmatmul.bf16.gmra.mxu3 %v547_v35 }
  0xa0   :  { %v257_v39 = vpop.f32.mrf.mxu0 }
  0xa1   :  { %v258_v40 = vadd.f32 %v257_v39, %v807_v37  ;;  %v286_v41 = vpop.f32.mrf.mxu1 }
  0xa2   :  { %v287_v42 = vadd.f32 %v286_v41, %v809_v38 }
  0xa4   :  { %v364_v43 = vpack.c.bf16 %v287_v42, %v258_v40 }
  0xa6   :  { %380 = vst [vmem:[%s898_s3] sm:$0xff] %v364_v43 }
  0xa7   :  { %v315_v46 = vpop.f32.mrf.mxu2 }
  0xa8   :  { %v316_v47 = vadd.f32 %v315_v46, %v813_v44  ;;  %v344_v48 = vpop.f32.mrf.mxu3  ;;  %v259_v49 = vpop.f32.mrf.mxu0 }
  0xa9   :  { %v345_v50 = vadd.f32 %v344_v48, %v815_v45  ;;  %v260_v51 = vadd.f32 %v259_v49, %v807_v37  ;;  %v288_v52 = vpop.f32.mrf.mxu1 }
  0xaa   :  { %v289_v53 = vadd.f32 %v288_v52, %v809_v38 }
  0xab   :  { %v365_v54 = vpack.c.bf16 %v345_v50, %v316_v47 }
  0xac   :  { %v366_v55 = vpack.c.bf16 %v289_v53, %v260_v51 }
  0xad   :  { %381 = vst [vmem:[%s898_s3 + $0x8] sm:$0xff] %v365_v54 }
  0xae   :  { %382 = vst [vmem:[%s898_s3 + $0x10] sm:$0xff] %v366_v55 }
  0xaf   :  { %v317_v56 = vpop.f32.mrf.mxu2 }
  0xb0   :  { %v318_v57 = vadd.f32 %v317_v56, %v813_v44  ;;  %v346_v58 = vpop.f32.mrf.mxu3  ;;  %v262_v59 = vpop.f32.mrf.mxu0 }
  0xb1   :  { %v347_v60 = vadd.f32 %v346_v58, %v815_v45  ;;  %v263_v61 = vadd.f32 %v262_v59, %v807_v37  ;;  %v291_v62 = vpop.f32.mrf.mxu1 }
  0xb2   :  { %v292_v63 = vadd.f32 %v291_v62, %v809_v38 }
  0xb3   :  { %v367_v0 = vpack.c.bf16 %v347_v60, %v318_v57 }
  0xb4   :  { %v368_v1 = vpack.c.bf16 %v292_v63, %v263_v61 }
  0xb5   :  { %383 = vst [vmem:[%s898_s3 + $0x18] sm:$0xff] %v367_v0 }
  0xb6   :  { %384 = vst [vmem:[%s898_s3 + $0x20] sm:$0xff] %v368_v1 }
  0xb7   :  { %v320_v2 = vpop.f32.mrf.mxu2 }
  0xb8   :  { %v321_v3 = vadd.f32 %v320_v2, %v813_v44  ;;  %v349_v4 = vpop.f32.mrf.mxu3  ;;  %v264_v5 = vpop.f32.mrf.mxu0 }
  0xb9   :  { %v350_v6 = vadd.f32 %v349_v4, %v815_v45  ;;  %v265_v7 = vadd.f32 %v264_v5, %v807_v37  ;;  %v293_v8 = vpop.f32.mrf.mxu1 }
  0xba   :  { %v294_v9 = vadd.f32 %v293_v8, %v809_v38 }
  0xbb   :  { %v369_v10 = vpack.c.bf16 %v350_v6, %v321_v3 }
  0xbc   :  { %v370_v11 = vpack.c.bf16 %v294_v9, %v265_v7 }
  0xbd   :  { %385 = vst [vmem:[%s898_s3 + $0x28] sm:$0xff] %v369_v10 }
  0xbe   :  { %386 = vst [vmem:[%s898_s3 + $0x30] sm:$0xff] %v370_v11 }
  0xbf   :  { %v322_v12 = vpop.f32.mrf.mxu2 }
  0xc0   :  { %v323_v13 = vadd.f32 %v322_v12, %v813_v44  ;;  %v351_v14 = vpop.f32.mrf.mxu3  ;;  %v267_v15 = vpop.f32.mrf.mxu0 }
  0xc1   :  { %v352_v16 = vadd.f32 %v351_v14, %v815_v45  ;;  %v268_v17 = vadd.f32 %v267_v15, %v807_v37  ;;  %v296_v18 = vpop.f32.mrf.mxu1 }
  0xc2   :  { %v297_v19 = vadd.f32 %v296_v18, %v809_v38 }
  0xc3   :  { %v371_v20 = vpack.c.bf16 %v352_v16, %v323_v13 }
  0xc4   :  { %v372_v21 = vpack.c.bf16 %v297_v19, %v268_v17 }
  0xc5   :  { %387 = vst [vmem:[%s898_s3 + $0x38] sm:$0xff] %v371_v20 }
  0xc6   :  { %388 = vst [vmem:[%s898_s3 + $0x40] sm:$0xff] %v372_v21 }
  0xc7   :  { %v325_v22 = vpop.f32.mrf.mxu2 }
  0xc8   :  { %v326_v23 = vadd.f32 %v325_v22, %v813_v44  ;;  %v354_v24 = vpop.f32.mrf.mxu3  ;;  %v269_v25 = vpop.f32.mrf.mxu0 }
  0xc9   :  { %v355_v26 = vadd.f32 %v354_v24, %v815_v45  ;;  %v270_v27 = vadd.f32 %v269_v25, %v807_v37  ;;  %v298_v28 = vpop.f32.mrf.mxu1 }
  0xca   :  { %v299_v29 = vadd.f32 %v298_v28, %v809_v38 }
  0xcb   :  { %v373_v30 = vpack.c.bf16 %v355_v26, %v326_v23 }
  0xcc   :  { %v374_v31 = vpack.c.bf16 %v299_v29, %v270_v27 }
  0xcd   :  { %389 = vst [vmem:[%s898_s3 + $0x48] sm:$0xff] %v373_v30 }
  0xce   :  { %390 = vst [vmem:[%s898_s3 + $0x50] sm:$0xff] %v374_v31 }
  0xcf   :  { %v327_v32 = vpop.f32.mrf.mxu2 }
  0xd0   :  { %v328_v33 = vadd.f32 %v327_v32, %v813_v44  ;;  %v356_v34 = vpop.f32.mrf.mxu3  ;;  %v272_v35 = vpop.f32.mrf.mxu0 }
  0xd1   :  { %v357_v36 = vadd.f32 %v356_v34, %v815_v45  ;;  %v273_v39 = vadd.f32 %v272_v35, %v807_v37  ;;  %v301_v40 = vpop.f32.mrf.mxu1 }
  0xd2   :  { %v302_v41 = vadd.f32 %v301_v40, %v809_v38 }
  0xd3   :  { %v375_v42 = vpack.c.bf16 %v357_v36, %v328_v33 }
  0xd4   :  { %v376_v43 = vpack.c.bf16 %v302_v41, %v273_v39 }
  0xd5   :  { %391 = vst [vmem:[%s898_s3 + $0x58] sm:$0xff] %v375_v42 }
  0xd6   :  { %392 = vst [vmem:[%s898_s3 + $0x60] sm:$0xff] %v376_v43 }
  0xd7   :  { %v330_v46 = vpop.f32.mrf.mxu2 }
  0xd8   :  { %v331_v47 = vadd.f32 %v330_v46, %v813_v44  ;;  %v359_v48 = vpop.f32.mrf.mxu3  ;;  %v274_v49 = vpop.f32.mrf.mxu0 }
  0xd9   :  { %v360_v50 = vadd.f32 %v359_v48, %v815_v45  ;;  %v275_v51 = vadd.f32 %v274_v49, %v807_v37  ;;  %v303_v52 = vpop.f32.mrf.mxu1 }
  0xda   :  { %v304_v53 = vadd.f32 %v303_v52, %v809_v38 }
  0xdb   :  { %v377_v54 = vpack.c.bf16 %v360_v50, %v331_v47 }
  0xdc   :  { %v378_v55 = vpack.c.bf16 %v304_v53, %v275_v51 }
  0xdd   :  { %393 = vst [vmem:[%s898_s3 + $0x68] sm:$0xff] %v377_v54 }
  0xde   :  { %394 = vst [vmem:[%s898_s3 + $0x70] sm:$0xff] %v378_v55 }
  0xdf   :  { %v332_v56 = vpop.f32.mrf.mxu2 }
  0xe0   :  { %v333_v57 = vadd.f32 %v332_v56, %v813_v44  ;;  %v361_v58 = vpop.f32.mrf.mxu3 }
  0xe1   :  { %v362_v59 = vadd.f32 %v361_v58, %v815_v45 }
  0xe3   :  { %v379_v37 = vpack.c.bf16 %v362_v59, %v333_v57 }
  0xe5   :  { %395 = vst [vmem:[%s898_s3 + $0x78] sm:$0xff] %v379_v37 }

// kernel: lstm_model_forward.7
= control target key start
LH: loop header
LB: loop body
LE: loop exit
PB: predicated region body
PF: predicated region fallthrough
CT: control target
= control target key end

     0   :  { %8 = vsyncpa [#allocation3], 0  ;;  %s626_s15 = smov [#allocation2]   ;;  %s627_s17 = smov 256   ;;  %s755_s0 = inlined_call_operand.vmem [shape: bf16[64,128], index: 0, kind: input, shape index: {}]   ;;  %s756_s1 = inlined_call_operand.hbm [shape: bf16[128,512], index: 1, kind: input, shape index: {}]   ;;  %s757_s2 = inlined_call_operand.vmem [shape: f32[1,512], index: 2, kind: input, shape index: {}]   ;;  %s758_s3 = inlined_call_operand.vmem [shape: bf16[64,512], index: 3, kind: output, shape index: {}]  }
   0x1   :  { %s15_s14 = sshll.u32 %s756_s1, 4  ;;  %s17_s16 = sshll.u32 %s626_s15, 4  ;;  %s16_s14 = int_to_ptr.hbm [resolvable:$true] %s15_s14  ;;  %s18_s16 = int_to_ptr.vmem [resolvable:$true] %s17_s16 }
   0x2   :  { %s628_s18 = smov 16  }
   0x3   :  { %23 = dma.hbm_to_vmem [thread:$0]  %s16_s14, 4096, %s18_s16, [#allocation3], %s627_s17, %s627_s17, %s628_s18  }
   0x4   :  { %624 = dma.done.wait [#allocation3], 4096  }
   0x5   :  { %625 = vsyncadd [#allocation3], 4294963200  ;;  %v547_v0 = vld [vmem:[#allocation2 + $0xe0] sm:$0xf]  ;;  %v595_v1 = vld [vmem:[#allocation2 + $0xec] sm:$0xf0] }
   0x6   :  { %v593_v2 = vld [vmem:[#allocation2 + $0xe4] sm:$0xf]  ;;  %v548_v3 = vor.u32 %v595_v1, %v547_v0  ;;  %v549_v4 = vld [vmem:[#allocation2 + $0xf0] sm:$0xf0]  ;;  %v555_v5 = vld [vmem:[#allocation2 + $0xe8] sm:$0xf] }
   0x7   :  { %v596_v6 = vld [vmem:[#allocation2 + $0xf4] sm:$0xf0]  ;;  %v552_v7 = vor.u32 %v593_v2, %v549_v4  ;;  %v594_v9 = vld [vmem:[#allocation2 + $0xec] sm:$0xf]  ;;  %v557_v10 = vld [vmem:[#allocation2 + $0xf8] sm:$0xf0] }
   0x8   :  { %v556_v8 = vor.u32 %v596_v6, %v555_v5  ;;  %v531_v11 = vld [vmem:[#allocation2 + $0xc0] sm:$0xf]  ;;  %264 = vmatpush.bf16.msra.mxu0 %v548_v3  ;;  %v560_v12 = vor.u32 %v594_v9, %v557_v10  ;;  %v591_v13 = vld [vmem:[#allocation2 + $0xcc] sm:$0xf0]  ;;  %v589_v14 = vld [vmem:[#allocation2 + $0xc4] sm:$0xf] }
   0x9   :  { %v533_v15 = vld [vmem:[#allocation2 + $0xd0] sm:$0xf0]  ;;  %293 = vmatpush.bf16.msra.mxu1 %v552_v7  ;;  %v532_v16 = vor.u32 %v591_v13, %v531_v11  ;;  %v539_v18 = vld [vmem:[#allocation2 + $0xc8] sm:$0xf]  ;;  %v592_v19 = vld [vmem:[#allocation2 + $0xd4] sm:$0xf0] }
   0xa   :  { %322 = vmatpush.bf16.msra.mxu2 %v556_v8  ;;  %v536_v17 = vor.u32 %v589_v14, %v533_v15  ;;  %v590_v20 = vld [vmem:[#allocation2 + $0xcc] sm:$0xf]  ;;  %351 = vmatpush.bf16.msra.mxu3 %v560_v12  ;;  %v540_v21 = vor.u32 %v592_v19, %v539_v18  ;;  %v541_v22 = vld [vmem:[#allocation2 + $0xd8] sm:$0xf0]  ;;  %v515_v23 = vld [vmem:[#allocation2 + $0xa0] sm:$0xf] }
   0xb   :  { %v587_v24 = vld [vmem:[#allocation2 + $0xac] sm:$0xf0]  ;;  %v544_v25 = vor.u32 %v590_v20, %v541_v22  ;;  %v585_v26 = vld [vmem:[#allocation2 + $0xa4] sm:$0xf]  ;;  %v517_v27 = vld [vmem:[#allocation2 + $0xb0] sm:$0xf0] }
   0xc   :  { %v523_v28 = vld [vmem:[#allocation2 + $0xa8] sm:$0xf]  ;;  %265 = vmatpush.bf16.msra.mxu0 %v532_v16  ;;  %v516_v29 = vor.u32 %v587_v24, %v515_v23  ;;  %v588_v30 = vld [vmem:[#allocation2 + $0xb4] sm:$0xf0]  ;;  %v586_v31 = vld [vmem:[#allocation2 + $0xac] sm:$0xf]  ;;  %v520_v33 = vor.u32 %v585_v26, %v517_v27 }
   0xd   :  { %v525_v32 = vld [vmem:[#allocation2 + $0xb8] sm:$0xf0]  ;;  %294 = vmatpush.bf16.msra.mxu1 %v536_v17  ;;  %v524_v34 = vor.u32 %v588_v30, %v523_v28  ;;  %v499_v35 = vld [vmem:[#allocation2 + $0x80] sm:$0xf]  ;;  %v583_v36 = vld [vmem:[#allocation2 + $0x8c] sm:$0xf0] }
   0xe   :  { %323 = vmatpush.bf16.msra.mxu2 %v540_v21  ;;  %v581_v37 = vld [vmem:[#allocation2 + $0x84] sm:$0xf]  ;;  %352 = vmatpush.bf16.msra.mxu3 %v544_v25  ;;  %v528_v38 = vor.u32 %v586_v31, %v525_v32  ;;  %v501_v39 = vld [vmem:[#allocation2 + $0x90] sm:$0xf0]  ;;  %v507_v40 = vld [vmem:[#allocation2 + $0x88] sm:$0xf]  ;;  %v500_v44 = vor.u32 %v583_v36, %v499_v35 }
   0xf   :  { %v584_v41 = vld [vmem:[#allocation2 + $0x94] sm:$0xf0]  ;;  %v582_v42 = vld [vmem:[#allocation2 + $0x8c] sm:$0xf]  ;;  %v509_v43 = vld [vmem:[#allocation2 + $0x98] sm:$0xf0]  ;;  %v504_v45 = vor.u32 %v581_v37, %v501_v39 }
  0x10   :  { %266 = vmatpush.bf16.msra.mxu0 %v516_v29  ;;  %v508_v46 = vor.u32 %v584_v41, %v507_v40  ;;  %v483_v47 = vld [vmem:[#allocation2 + $0x60] sm:$0xf]  ;;  %v579_v48 = vld [vmem:[#allocation2 + $0x6c] sm:$0xf0]  ;;  %v577_v49 = vld [vmem:[#allocation2 + $0x64] sm:$0xf]  ;;  %v512_v50 = vor.u32 %v582_v42, %v509_v43 }
  0x11   :  { %295 = vmatpush.bf16.msra.mxu1 %v520_v33  ;;  %v485_v51 = vld [vmem:[#allocation2 + $0x70] sm:$0xf0]  ;;  %v491_v52 = vld [vmem:[#allocation2 + $0x68] sm:$0xf]  ;;  %v580_v53 = vld [vmem:[#allocation2 + $0x74] sm:$0xf0]  ;;  %v484_v56 = vor.u32 %v579_v48, %v483_v47 }
  0x12   :  { %324 = vmatpush.bf16.msra.mxu2 %v524_v34  ;;  %353 = vmatpush.bf16.msra.mxu3 %v528_v38  ;;  %v578_v54 = vld [vmem:[#allocation2 + $0x6c] sm:$0xf]  ;;  %v493_v55 = vld [vmem:[#allocation2 + $0x78] sm:$0xf0]  ;;  %v488_v57 = vor.u32 %v577_v49, %v485_v51  ;;  %v492_v58 = vor.u32 %v580_v53, %v491_v52  ;;  %v467_v59 = vld [vmem:[#allocation2 + $0x40] sm:$0xf] }
  0x13   :  { %v575_v60 = vld [vmem:[#allocation2 + $0x4c] sm:$0xf0]  ;;  %v573_v61 = vld [vmem:[#allocation2 + $0x44] sm:$0xf]  ;;  %v496_v62 = vor.u32 %v578_v54, %v493_v55  ;;  %v469_v63 = vld [vmem:[#allocation2 + $0x50] sm:$0xf0] }
  0x14   :  { %267 = vmatpush.bf16.msra.mxu0 %v500_v44  ;;  %v475_v0 = vld [vmem:[#allocation2 + $0x48] sm:$0xf]  ;;  %v576_v1 = vld [vmem:[#allocation2 + $0x54] sm:$0xf0]  ;;  %v574_v2 = vld [vmem:[#allocation2 + $0x4c] sm:$0xf]  ;;  %v468_v4 = vor.u32 %v575_v60, %v467_v59  ;;  %v472_v5 = vor.u32 %v573_v61, %v469_v63 }
  0x15   :  { %296 = vmatpush.bf16.msra.mxu1 %v504_v45  ;;  %v477_v3 = vld [vmem:[#allocation2 + $0x58] sm:$0xf0]  ;;  %v476_v6 = vor.u32 %v576_v1, %v475_v0  ;;  %v451_v7 = vld [vmem:[#allocation2 + $0x20] sm:$0xf]  ;;  %v571_v8 = vld [vmem:[#allocation2 + $0x2c] sm:$0xf0] }
  0x16   :  { %325 = vmatpush.bf16.msra.mxu2 %v508_v46  ;;  %354 = vmatpush.bf16.msra.mxu3 %v512_v50  ;;  %v569_v9 = vld [vmem:[#allocation2 + $0x24] sm:$0xf]  ;;  %v480_v10 = vor.u32 %v574_v2, %v477_v3  ;;  %v453_v11 = vld [vmem:[#allocation2 + $0x30] sm:$0xf0]  ;;  %v459_v12 = vld [vmem:[#allocation2 + $0x28] sm:$0xf]  ;;  %v452_v16 = vor.u32 %v571_v8, %v451_v7 }
  0x17   :  { %v572_v13 = vld [vmem:[#allocation2 + $0x34] sm:$0xf0]  ;;  %v570_v14 = vld [vmem:[#allocation2 + $0x2c] sm:$0xf]  ;;  %v461_v15 = vld [vmem:[#allocation2 + $0x38] sm:$0xf0]  ;;  %v456_v17 = vor.u32 %v569_v9, %v453_v11 }
  0x18   :  { %268 = vmatpush.bf16.msra.mxu0 %v484_v56  ;;  %v460_v18 = vor.u32 %v572_v13, %v459_v12  ;;  %v435_v19 = vld [vmem:[#allocation2] sm:$0xf]  ;;  %v567_v20 = vld [vmem:[#allocation2 + $0xc] sm:$0xf0]  ;;  %v565_v21 = vld [vmem:[#allocation2 + $0x4] sm:$0xf]  ;;  %v464_v22 = vor.u32 %v570_v14, %v461_v15 }
  0x19   :  { %297 = vmatpush.bf16.msra.mxu1 %v488_v57  ;;  %v437_v23 = vld [vmem:[#allocation2 + $0x10] sm:$0xf0]  ;;  %v443_v24 = vld [vmem:[#allocation2 + $0x8] sm:$0xf]  ;;  %v568_v25 = vld [vmem:[#allocation2 + $0x14] sm:$0xf0]  ;;  %v436_v28 = vor.u32 %v567_v20, %v435_v19 }
  0x1a   :  { %326 = vmatpush.bf16.msra.mxu2 %v492_v58  ;;  %355 = vmatpush.bf16.msra.mxu3 %v496_v62  ;;  %v566_v26 = vld [vmem:[#allocation2 + $0xc] sm:$0xf]  ;;  %v445_v27 = vld [vmem:[#allocation2 + $0x18] sm:$0xf0]  ;;  %v440_v29 = vor.u32 %v565_v21, %v437_v23  ;;  %v444_v30 = vor.u32 %v568_v25, %v443_v24  ;;  %v561_v32 = vld [vmem:[%s755_s0] sm:$0xff] }
  0x1b   :  { %v448_v31 = vor.u32 %v566_v26, %v445_v27  ;;  %v562_v33 = vld [vmem:[%s755_s0 + $0x8] sm:$0xff]  ;;  %v563_v34 = vld [vmem:[%s755_s0 + $0x10] sm:$0xff]  ;;  %v564_v35 = vld [vmem:[%s755_s0 + $0x18] sm:$0xff] }
  0x1c   :  { %269 = vmatpush.bf16.msra.mxu0 %v468_v4  ;;  %v70_v36 = vld [vmem:[%s757_s2] sm:$0xf] }
  0x1d   :  { %298 = vmatpush.bf16.msra.mxu1 %v472_v5  ;;  %v667_v37 = vperm.slane %v70_v36, 0  ;;  %v669_v38 = vperm.slane %v70_v36, 1  ;;  %v673_v44 = vperm.slane %v70_v36, 2  ;;  %v675_v45 = vperm.slane %v70_v36, 3 }
  0x1e   :  { %327 = vmatpush.bf16.msra.mxu2 %v476_v6  ;;  %356 = vmatpush.bf16.msra.mxu3 %v480_v10 }
  0x20   :  { %270 = vmatpush.bf16.msra.mxu0 %v452_v16 }
  0x21   :  { %299 = vmatpush.bf16.msra.mxu1 %v456_v17 }
  0x22   :  { %328 = vmatpush.bf16.msra.mxu2 %v460_v18  ;;  %357 = vmatpush.bf16.msra.mxu3 %v464_v22 }
  0x24   :  { %271 = vmatpush.bf16.msra.mxu0 %v436_v28 }
  0x25   :  { %300 = vmatpush.bf16.msra.mxu1 %v440_v29 }
  0x26   :  { %329 = vmatpush.bf16.msra.mxu2 %v444_v30  ;;  %358 = vmatpush.bf16.msra.mxu3 %v448_v31 }
  0x27   :  { %272 = vmatmul.bf16.vlgmr.msra.gmra.mxu0 %v561_v32 }
  0x28   :  { %301 = vmatmul.bf16.vlgmr.msra.gmra.mxu1 %v561_v32 }
  0x29   :  { %330 = vmatmul.bf16.vlgmr.msra.gmra.mxu2 %v561_v32  ;;  %359 = vmatmul.bf16.vlgmr.msra.gmra.mxu3 %v561_v32 }
  0x37   :  { %277 = vmatmul.bf16.gmra.mxu0 %v562_v33 }
  0x38   :  { %306 = vmatmul.bf16.gmra.mxu1 %v562_v33 }
  0x39   :  { %335 = vmatmul.bf16.gmra.mxu2 %v562_v33  ;;  %364 = vmatmul.bf16.gmra.mxu3 %v562_v33 }
  0x47   :  { %282 = vmatmul.bf16.gmra.mxu0 %v563_v34 }
  0x48   :  { %311 = vmatmul.bf16.gmra.mxu1 %v563_v34 }
  0x49   :  { %340 = vmatmul.bf16.gmra.mxu2 %v563_v34  ;;  %369 = vmatmul.bf16.gmra.mxu3 %v563_v34 }
  0x57   :  { %287 = vmatmul.bf16.gmra.mxu0 %v564_v35 }
  0x58   :  { %316 = vmatmul.bf16.gmra.mxu1 %v564_v35 }
  0x59   :  { %345 = vmatmul.bf16.gmra.mxu2 %v564_v35  ;;  %374 = vmatmul.bf16.gmra.mxu3 %v564_v35 }
  0xa4   :  { %v273_v39 = vpop.f32.mrf.mxu0 }
  0xa5   :  { %v274_v40 = vadd.f32 %v273_v39, %v667_v37  ;;  %v302_v41 = vpop.f32.mrf.mxu1 }
  0xa6   :  { %v303_v42 = vadd.f32 %v302_v41, %v669_v38 }
  0xa8   :  { %v380_v43 = vpack.c.bf16 %v303_v42, %v274_v40 }
  0xaa   :  { %396 = vst [vmem:[%s758_s3] sm:$0xff] %v380_v43 }
  0xac   :  { %v331_v46 = vpop.f32.mrf.mxu2  ;;  %v360_v48 = vpop.f32.mrf.mxu3 }
  0xad   :  { %v332_v47 = vadd.f32 %v331_v46, %v673_v44  ;;  %v275_v49 = vpop.f32.mrf.mxu0  ;;  %v361_v50 = vadd.f32 %v360_v48, %v675_v45  ;;  %v304_v52 = vpop.f32.mrf.mxu1 }
  0xae   :  { %v276_v51 = vadd.f32 %v275_v49, %v667_v37  ;;  %v305_v53 = vadd.f32 %v304_v52, %v669_v38 }
  0xaf   :  { %v381_v54 = vpack.c.bf16 %v361_v50, %v332_v47 }
  0xb0   :  { %v382_v55 = vpack.c.bf16 %v305_v53, %v276_v51 }
  0xb1   :  { %397 = vst [vmem:[%s758_s3 + $0x8] sm:$0xff] %v381_v54 }
  0xb2   :  { %398 = vst [vmem:[%s758_s3 + $0x10] sm:$0xff] %v382_v55 }
  0xb4   :  { %v333_v56 = vpop.f32.mrf.mxu2  ;;  %v362_v58 = vpop.f32.mrf.mxu3 }
  0xb5   :  { %v334_v57 = vadd.f32 %v333_v56, %v673_v44  ;;  %v278_v59 = vpop.f32.mrf.mxu0  ;;  %v363_v60 = vadd.f32 %v362_v58, %v675_v45  ;;  %v307_v62 = vpop.f32.mrf.mxu1 }
  0xb6   :  { %v279_v61 = vadd.f32 %v278_v59, %v667_v37  ;;  %v308_v63 = vadd.f32 %v307_v62, %v669_v38 }
  0xb7   :  { %v383_v0 = vpack.c.bf16 %v363_v60, %v334_v57 }
  0xb8   :  { %v384_v1 = vpack.c.bf16 %v308_v63, %v279_v61 }
  0xb9   :  { %399 = vst [vmem:[%s758_s3 + $0x18] sm:$0xff] %v383_v0 }
  0xba   :  { %400 = vst [vmem:[%s758_s3 + $0x20] sm:$0xff] %v384_v1 }
  0xbc   :  { %v336_v2 = vpop.f32.mrf.mxu2  ;;  %v365_v4 = vpop.f32.mrf.mxu3 }
  0xbd   :  { %v337_v3 = vadd.f32 %v336_v2, %v673_v44  ;;  %v280_v5 = vpop.f32.mrf.mxu0  ;;  %v366_v6 = vadd.f32 %v365_v4, %v675_v45  ;;  %v309_v8 = vpop.f32.mrf.mxu1 }
  0xbe   :  { %v281_v7 = vadd.f32 %v280_v5, %v667_v37  ;;  %v310_v9 = vadd.f32 %v309_v8, %v669_v38 }
  0xbf   :  { %v385_v10 = vpack.c.bf16 %v366_v6, %v337_v3 }
  0xc0   :  { %v386_v11 = vpack.c.bf16 %v310_v9, %v281_v7 }
  0xc1   :  { %401 = vst [vmem:[%s758_s3 + $0x28] sm:$0xff] %v385_v10 }
  0xc2   :  { %402 = vst [vmem:[%s758_s3 + $0x30] sm:$0xff] %v386_v11 }
  0xc4   :  { %v338_v12 = vpop.f32.mrf.mxu2  ;;  %v367_v14 = vpop.f32.mrf.mxu3 }
  0xc5   :  { %v339_v13 = vadd.f32 %v338_v12, %v673_v44  ;;  %v283_v15 = vpop.f32.mrf.mxu0  ;;  %v368_v16 = vadd.f32 %v367_v14, %v675_v45  ;;  %v312_v18 = vpop.f32.mrf.mxu1 }
  0xc6   :  { %v284_v17 = vadd.f32 %v283_v15, %v667_v37  ;;  %v313_v19 = vadd.f32 %v312_v18, %v669_v38 }
  0xc7   :  { %v387_v20 = vpack.c.bf16 %v368_v16, %v339_v13 }
  0xc8   :  { %v388_v21 = vpack.c.bf16 %v313_v19, %v284_v17 }
  0xc9   :  { %403 = vst [vmem:[%s758_s3 + $0x38] sm:$0xff] %v387_v20 }
  0xca   :  { %404 = vst [vmem:[%s758_s3 + $0x40] sm:$0xff] %v388_v21 }
  0xcc   :  { %v341_v22 = vpop.f32.mrf.mxu2  ;;  %v370_v24 = vpop.f32.mrf.mxu3 }
  0xcd   :  { %v342_v23 = vadd.f32 %v341_v22, %v673_v44  ;;  %v285_v25 = vpop.f32.mrf.mxu0  ;;  %v371_v26 = vadd.f32 %v370_v24, %v675_v45  ;;  %v314_v28 = vpop.f32.mrf.mxu1 }
  0xce   :  { %v286_v27 = vadd.f32 %v285_v25, %v667_v37  ;;  %v315_v29 = vadd.f32 %v314_v28, %v669_v38 }
  0xcf   :  { %v389_v30 = vpack.c.bf16 %v371_v26, %v342_v23 }
  0xd0   :  { %v390_v31 = vpack.c.bf16 %v315_v29, %v286_v27 }
  0xd1   :  { %405 = vst [vmem:[%s758_s3 + $0x48] sm:$0xff] %v389_v30 }
  0xd2   :  { %406 = vst [vmem:[%s758_s3 + $0x50] sm:$0xff] %v390_v31 }
  0xd4   :  { %v343_v32 = vpop.f32.mrf.mxu2  ;;  %v372_v34 = vpop.f32.mrf.mxu3 }
  0xd5   :  { %v344_v33 = vadd.f32 %v343_v32, %v673_v44  ;;  %v288_v35 = vpop.f32.mrf.mxu0  ;;  %v373_v36 = vadd.f32 %v372_v34, %v675_v45  ;;  %v317_v40 = vpop.f32.mrf.mxu1 }
  0xd6   :  { %v289_v39 = vadd.f32 %v288_v35, %v667_v37  ;;  %v318_v41 = vadd.f32 %v317_v40, %v669_v38 }
  0xd7   :  { %v391_v42 = vpack.c.bf16 %v373_v36, %v344_v33 }
  0xd8   :  { %v392_v43 = vpack.c.bf16 %v318_v41, %v289_v39 }
  0xd9   :  { %407 = vst [vmem:[%s758_s3 + $0x58] sm:$0xff] %v391_v42 }
  0xda   :  { %408 = vst [vmem:[%s758_s3 + $0x60] sm:$0xff] %v392_v43 }
  0xdc   :  { %v346_v46 = vpop.f32.mrf.mxu2  ;;  %v375_v48 = vpop.f32.mrf.mxu3 }
  0xdd   :  { %v347_v47 = vadd.f32 %v346_v46, %v673_v44  ;;  %v290_v49 = vpop.f32.mrf.mxu0  ;;  %v376_v50 = vadd.f32 %v375_v48, %v675_v45  ;;  %v319_v52 = vpop.f32.mrf.mxu1 }
  0xde   :  { %v291_v51 = vadd.f32 %v290_v49, %v667_v37  ;;  %v320_v53 = vadd.f32 %v319_v52, %v669_v38 }
  0xdf   :  { %v393_v54 = vpack.c.bf16 %v376_v50, %v347_v47 }
  0xe0   :  { %v394_v55 = vpack.c.bf16 %v320_v53, %v291_v51 }
  0xe1   :  { %409 = vst [vmem:[%s758_s3 + $0x68] sm:$0xff] %v393_v54 }
  0xe2   :  { %410 = vst [vmem:[%s758_s3 + $0x70] sm:$0xff] %v394_v55 }
  0xe4   :  { %v348_v56 = vpop.f32.mrf.mxu2  ;;  %v377_v58 = vpop.f32.mrf.mxu3 }
  0xe5   :  { %v349_v57 = vadd.f32 %v348_v56, %v673_v44  ;;  %v378_v59 = vadd.f32 %v377_v58, %v675_v45 }
  0xe7   :  { %v395_v37 = vpack.c.bf16 %v378_v59, %v349_v57 }
  0xe9   :  { %411 = vst [vmem:[%s758_s3 + $0x78] sm:$0xff] %v395_v37 }
  0xea   :  { %416 = vsyncpa [#allocation3], 1 }

// kernel: lstm_model_forward.6
= control target key start
LH: loop header
LB: loop body
LE: loop exit
PB: predicated region body
PF: predicated region fallthrough
CT: control target
= control target key end

     0   :  { %s4637_s12 = smov [#allocation4]   ;;  %s4812_s0 = inlined_call_operand.vmem [shape: bf16[8,8,512], index: 0, kind: input, shape index: {}]   ;;  %s4813_s1 = inlined_call_operand.hbm [shape: bf16[128,512], index: 1, kind: input, shape index: {}]   ;;  %s4814_s2 = inlined_call_operand.vmem [shape: bf16[8,8,128], index: 2, kind: output, shape index: {}]  }
   0x1   :  { %s22_s11 = sshll.u32 %s4813_s1, 4  ;;  %s24_s13 = sshll.u32 %s4637_s12, 4  ;;  %s23_s11 = int_to_ptr.hbm [resolvable:$true] %s22_s11  ;;  %s25_s13 = int_to_ptr.vmem [resolvable:$true] %s24_s13 }
   0x2   :  { %27 = dma.hbm_to_vmem [thread:$0]  %s23_s11, 4096, %s25_s13, [#allocation5] }
   0x3   :  { %4635 = dma.done.wait [#allocation5], 4096 }
   0x4   :  { %4636 = vsyncadd [#allocation5], 4294963200  ;;  %v3171_v0 = vld [vmem:[#allocation4 + $0xe0] sm:$0xf]  ;;  %v4232_v1 = vld [vmem:[#allocation4 + $0xec] sm:$0xf0] }
   0x5   :  { %v3204_v2 = vld [vmem:[#allocation4 + $0xe4] sm:$0xf]  ;;  %v3172_v3 = vor.u32 %v4232_v1, %v3171_v0  ;;  %v4240_v4 = vld [vmem:[#allocation4 + $0xf0] sm:$0xf0]  ;;  %v3269_v5 = vld [vmem:[#allocation4 + $0xec] sm:$0xf] }
   0x6   :  { %v4256_v6 = vld [vmem:[#allocation4 + $0xf8] sm:$0xf0]  ;;  %v3205_v7 = vor.u32 %v4240_v4, %v3204_v2  ;;  %v3167_v9 = vld [vmem:[#allocation4 + $0xc0] sm:$0xf]  ;;  %v4231_v10 = vld [vmem:[#allocation4 + $0xcc] sm:$0xf0] }
   0x7   :  { %v3270_v8 = vor.u32 %v4256_v6, %v3269_v5  ;;  %v3200_v11 = vld [vmem:[#allocation4 + $0xc4] sm:$0xf]  ;;  %101 = vmatpush.bf16.msra.mxu0 %v3172_v3  ;;  %v3168_v12 = vor.u32 %v4231_v10, %v3167_v9  ;;  %v4239_v13 = vld [vmem:[#allocation4 + $0xd0] sm:$0xf0]  ;;  %v3265_v14 = vld [vmem:[#allocation4 + $0xcc] sm:$0xf] }
   0x8   :  { %v4255_v15 = vld [vmem:[#allocation4 + $0xd8] sm:$0xf0]  ;;  %200 = vmatpush.bf16.msra.mxu1 %v3205_v7  ;;  %v3201_v16 = vor.u32 %v4239_v13, %v3200_v11  ;;  %v3237_v18 = vld [vmem:[#allocation4 + $0xe8] sm:$0xf]  ;;  %v4248_v19 = vld [vmem:[#allocation4 + $0xf4] sm:$0xf0] }
   0x9   :  { %380 = vmatpush.bf16.msra.mxu3 %v3270_v8  ;;  %v3266_v17 = vor.u32 %v4255_v15, %v3265_v14  ;;  %v3163_v20 = vld [vmem:[#allocation4 + $0xa0] sm:$0xf]  ;;  %v3238_v21 = vor.u32 %v4248_v19, %v3237_v18  ;;  %v4230_v22 = vld [vmem:[#allocation4 + $0xac] sm:$0xf0]  ;;  %v3196_v23 = vld [vmem:[#allocation4 + $0xa4] sm:$0xf] }
   0xa   :  { %v4238_v24 = vld [vmem:[#allocation4 + $0xb0] sm:$0xf0]  ;;  %v3261_v25 = vld [vmem:[#allocation4 + $0xac] sm:$0xf]  ;;  %v4254_v26 = vld [vmem:[#allocation4 + $0xb8] sm:$0xf0]  ;;  %v3164_v28 = vor.u32 %v4230_v22, %v3163_v20 }
   0xb   :  { %v3233_v27 = vld [vmem:[#allocation4 + $0xc8] sm:$0xf]  ;;  %102 = vmatpush.bf16.msra.mxu0 %v3168_v12  ;;  %299 = vmatpush.bf16.msra.mxu2 %v3238_v21  ;;  %v4247_v29 = vld [vmem:[#allocation4 + $0xd4] sm:$0xf0]  ;;  %v3159_v30 = vld [vmem:[#allocation4 + $0x80] sm:$0xf]  ;;  %v3197_v32 = vor.u32 %v4238_v24, %v3196_v23  ;;  %v3262_v33 = vor.u32 %v4254_v26, %v3261_v25 }
   0xc   :  { %v4229_v31 = vld [vmem:[#allocation4 + $0x8c] sm:$0xf0]  ;;  %201 = vmatpush.bf16.msra.mxu1 %v3201_v16  ;;  %v3234_v34 = vor.u32 %v4247_v29, %v3233_v27  ;;  %v3192_v35 = vld [vmem:[#allocation4 + $0x84] sm:$0xf]  ;;  %v4237_v36 = vld [vmem:[#allocation4 + $0x90] sm:$0xf0] }
   0xd   :  { %381 = vmatpush.bf16.msra.mxu3 %v3266_v17  ;;  %v3257_v37 = vld [vmem:[#allocation4 + $0x8c] sm:$0xf]  ;;  %v4253_v38 = vld [vmem:[#allocation4 + $0x98] sm:$0xf0]  ;;  %v3229_v39 = vld [vmem:[#allocation4 + $0xa8] sm:$0xf]  ;;  %v3160_v41 = vor.u32 %v4229_v31, %v3159_v30  ;;  %v3193_v45 = vor.u32 %v4237_v36, %v3192_v35 }
   0xe   :  { %v4246_v40 = vld [vmem:[#allocation4 + $0xb4] sm:$0xf0]  ;;  %v3155_v43 = vld [vmem:[#allocation4 + $0x60] sm:$0xf]  ;;  %v4228_v44 = vld [vmem:[#allocation4 + $0x6c] sm:$0xf0]  ;;  %v3258_v46 = vor.u32 %v4253_v38, %v3257_v37 }
   0xf   :  { %103 = vmatpush.bf16.msra.mxu0 %v3164_v28  ;;  %300 = vmatpush.bf16.msra.mxu2 %v3234_v34  ;;  %v3230_v42 = vor.u32 %v4246_v40, %v3229_v39  ;;  %v3188_v47 = vld [vmem:[#allocation4 + $0x64] sm:$0xf]  ;;  %v3225_v48 = vld [vmem:[#allocation4 + $0x88] sm:$0xf]  ;;  %v4245_v49 = vld [vmem:[#allocation4 + $0x94] sm:$0xf0]  ;;  %v3156_v53 = vor.u32 %v4228_v44, %v3155_v43 }
  0x10   :  { %202 = vmatpush.bf16.msra.mxu1 %v3197_v32  ;;  %v4236_v50 = vld [vmem:[#allocation4 + $0x70] sm:$0xf0]  ;;  %v3253_v51 = vld [vmem:[#allocation4 + $0x6c] sm:$0xf]  ;;  %v4252_v52 = vld [vmem:[#allocation4 + $0x78] sm:$0xf0]  ;;  %v3226_v54 = vor.u32 %v4245_v49, %v3225_v48 }
  0x11   :  { %382 = vmatpush.bf16.msra.mxu3 %v3262_v33  ;;  %v3151_v55 = vld [vmem:[#allocation4 + $0x40] sm:$0xf]  ;;  %v4227_v56 = vld [vmem:[#allocation4 + $0x4c] sm:$0xf0]  ;;  %v3189_v57 = vor.u32 %v4236_v50, %v3188_v47  ;;  %v3254_v58 = vor.u32 %v4252_v52, %v3253_v51  ;;  %v3184_v59 = vld [vmem:[#allocation4 + $0x44] sm:$0xf] }
  0x12   :  { %v3221_v60 = vld [vmem:[#allocation4 + $0x68] sm:$0xf]  ;;  %v4244_v61 = vld [vmem:[#allocation4 + $0x74] sm:$0xf0]  ;;  %v4235_v62 = vld [vmem:[#allocation4 + $0x50] sm:$0xf0]  ;;  %v3152_v1 = vor.u32 %v4227_v56, %v3151_v55 }
  0x13   :  { %104 = vmatpush.bf16.msra.mxu0 %v3160_v41  ;;  %301 = vmatpush.bf16.msra.mxu2 %v3230_v42  ;;  %v3249_v63 = vld [vmem:[#allocation4 + $0x4c] sm:$0xf]  ;;  %v4251_v0 = vld [vmem:[#allocation4 + $0x58] sm:$0xf0]  ;;  %v3222_v2 = vor.u32 %v4244_v61, %v3221_v60  ;;  %v3147_v3 = vld [vmem:[#allocation4 + $0x20] sm:$0xf]  ;;  %v3185_v5 = vor.u32 %v4235_v62, %v3184_v59 }
  0x14   :  { %203 = vmatpush.bf16.msra.mxu1 %v3193_v45  ;;  %v4226_v4 = vld [vmem:[#allocation4 + $0x2c] sm:$0xf0]  ;;  %v3250_v6 = vor.u32 %v4251_v0, %v3249_v63  ;;  %v3180_v7 = vld [vmem:[#allocation4 + $0x24] sm:$0xf]  ;;  %v3217_v8 = vld [vmem:[#allocation4 + $0x48] sm:$0xf] }
  0x15   :  { %383 = vmatpush.bf16.msra.mxu3 %v3258_v46  ;;  %v4243_v9 = vld [vmem:[#allocation4 + $0x54] sm:$0xf0]  ;;  %v4234_v10 = vld [vmem:[#allocation4 + $0x30] sm:$0xf0]  ;;  %v3245_v11 = vld [vmem:[#allocation4 + $0x2c] sm:$0xf]  ;;  %v3148_v13 = vor.u32 %v4226_v4, %v3147_v3 }
  0x16   :  { %v4250_v12 = vld [vmem:[#allocation4 + $0x38] sm:$0xf0]  ;;  %v3218_v14 = vor.u32 %v4243_v9, %v3217_v8  ;;  %v3143_v15 = vld [vmem:[#allocation4] sm:$0xf]  ;;  %v4225_v16 = vld [vmem:[#allocation4 + $0xc] sm:$0xf0]  ;;  %v3181_v17 = vor.u32 %v4234_v10, %v3180_v7 }
  0x17   :  { %105 = vmatpush.bf16.msra.mxu0 %v3156_v53  ;;  %302 = vmatpush.bf16.msra.mxu2 %v3226_v54  ;;  %v3246_v18 = vor.u32 %v4250_v12, %v3245_v11  ;;  %v3176_v19 = vld [vmem:[#allocation4 + $0x4] sm:$0xf]  ;;  %v3213_v20 = vld [vmem:[#allocation4 + $0x28] sm:$0xf]  ;;  %v4242_v21 = vld [vmem:[#allocation4 + $0x34] sm:$0xf0]  ;;  %v3144_v25 = vor.u32 %v4225_v16, %v3143_v15 }
  0x18   :  { %204 = vmatpush.bf16.msra.mxu1 %v3189_v57  ;;  %v4233_v22 = vld [vmem:[#allocation4 + $0x10] sm:$0xf0]  ;;  %v3241_v23 = vld [vmem:[#allocation4 + $0xc] sm:$0xf]  ;;  %v4249_v24 = vld [vmem:[#allocation4 + $0x18] sm:$0xf0]  ;;  %v3214_v26 = vor.u32 %v4242_v21, %v3213_v20 }
  0x19   :  { %384 = vmatpush.bf16.msra.mxu3 %v3254_v58  ;;  %v3177_v27 = vor.u32 %v4233_v22, %v3176_v19  ;;  %v3242_v28 = vor.u32 %v4249_v24, %v3241_v23  ;;  %v3209_v29 = vld [vmem:[#allocation4 + $0x8] sm:$0xf]  ;;  %v4241_v30 = vld [vmem:[#allocation4 + $0x14] sm:$0xf0]  ;;  %v4638_v32 = vmov 0.0|0.0   ;;  %v35_v4 = vld [vmem:[%s4812_s0] sm:$0xff]  }
  0x1a   :  { %v3210_v31 = vor.u32 %v4241_v30, %v3209_v29  ;;  %v3303_v33 = vld [vmem:[#allocation4 + $0xe0] sm:$0xf]  ;;  %v4264_v34 = vld [vmem:[#allocation4 + $0xec] sm:$0xf0]  ;;  %v3337_v35 = vld [vmem:[#allocation4 + $0xe4] sm:$0xf]  ;;  %v135_v19 = vunpack.c.h.bf16 %v35_v4 }
  0x1b   :  { %106 = vmatpush.bf16.msra.mxu0 %v3152_v1  ;;  %303 = vmatpush.bf16.msra.mxu2 %v3222_v2  ;;  %v3304_v36 = vor.u32 %v4264_v34, %v3303_v33  ;;  %v4272_v37 = vld [vmem:[#allocation4 + $0xf0] sm:$0xf0]  ;;  %v3371_v38 = vld [vmem:[#allocation4 + $0xe8] sm:$0xf]  ;;  %v4280_v39 = vld [vmem:[#allocation4 + $0xf4] sm:$0xf0] }
  0x1c   :  { %205 = vmatpush.bf16.msra.mxu1 %v3185_v5  ;;  %v3338_v40 = vor.u32 %v4272_v37, %v3337_v35  ;;  %v3372_v41 = vor.u32 %v4280_v39, %v3371_v38  ;;  %v3404_v42 = vld [vmem:[#allocation4 + $0xec] sm:$0xf]  ;;  %v4288_v43 = vld [vmem:[#allocation4 + $0xf8] sm:$0xf0]  ;;  %v3299_v45 = vld [vmem:[#allocation4 + $0xc0] sm:$0xf] }
  0x1d   :  { %385 = vmatpush.bf16.msra.mxu3 %v3250_v6  ;;  %v3405_v44 = vor.u32 %v4288_v43, %v3404_v42  ;;  %v4263_v46 = vld [vmem:[#allocation4 + $0xcc] sm:$0xf0]  ;;  %v3333_v47 = vld [vmem:[#allocation4 + $0xc4] sm:$0xf]  ;;  %v4271_v49 = vld [vmem:[#allocation4 + $0xd0] sm:$0xf0] }
  0x1e   :  { %v3300_v48 = vor.u32 %v4263_v46, %v3299_v45  ;;  %v3367_v50 = vld [vmem:[#allocation4 + $0xc8] sm:$0xf]  ;;  %v4279_v51 = vld [vmem:[#allocation4 + $0xd4] sm:$0xf0]  ;;  %v3334_v52 = vor.u32 %v4271_v49, %v3333_v47  ;;  %v3400_v54 = vld [vmem:[#allocation4 + $0xcc] sm:$0xf] }
  0x1f   :  { %107 = vmatpush.bf16.msra.mxu0 %v3148_v13  ;;  %304 = vmatpush.bf16.msra.mxu2 %v3218_v14  ;;  %v3368_v53 = vor.u32 %v4279_v51, %v3367_v50  ;;  %v4287_v55 = vld [vmem:[#allocation4 + $0xd8] sm:$0xf0]  ;;  %v3295_v57 = vld [vmem:[#allocation4 + $0xa0] sm:$0xf]  ;;  %v4262_v58 = vld [vmem:[#allocation4 + $0xac] sm:$0xf0] }
  0x20   :  { %206 = vmatpush.bf16.msra.mxu1 %v3181_v17  ;;  %v3401_v56 = vor.u32 %v4287_v55, %v3400_v54  ;;  %v3329_v59 = vld [vmem:[#allocation4 + $0xa4] sm:$0xf]  ;;  %v3296_v60 = vor.u32 %v4262_v58, %v3295_v57  ;;  %v4270_v61 = vld [vmem:[#allocation4 + $0xb0] sm:$0xf0]  ;;  %v3363_v62 = vld [vmem:[#allocation4 + $0xa8] sm:$0xf]  ;;  %v36_v17 = vunpack.c.l.bf16 %v35_v4 }
  0x21   :  { %386 = vmatpush.bf16.msra.mxu3 %v3246_v18  ;;  %v4278_v63 = vld [vmem:[#allocation4 + $0xb4] sm:$0xf0]  ;;  %v3330_v0 = vor.u32 %v4270_v61, %v3329_v59  ;;  %v3396_v2 = vld [vmem:[#allocation4 + $0xac] sm:$0xf]  ;;  %v4286_v3 = vld [vmem:[#allocation4 + $0xb8] sm:$0xf0] }
  0x22   :  { %v3364_v1 = vor.u32 %v4278_v63, %v3363_v62  ;;  %v3397_v5 = vor.u32 %v4286_v3, %v3396_v2  ;;  %v3291_v6 = vld [vmem:[#allocation4 + $0x80] sm:$0xf]  ;;  %v4261_v7 = vld [vmem:[#allocation4 + $0x8c] sm:$0xf0]  ;;  %v3325_v8 = vld [vmem:[#allocation4 + $0x84] sm:$0xf] }
  0x23   :  { %108 = vmatpush.bf16.msra.mxu0 %v3144_v25  ;;  %305 = vmatpush.bf16.msra.mxu2 %v3214_v26  ;;  %v3292_v9 = vor.u32 %v4261_v7, %v3291_v6  ;;  %v4269_v10 = vld [vmem:[#allocation4 + $0x90] sm:$0xf0]  ;;  %v3359_v11 = vld [vmem:[#allocation4 + $0x88] sm:$0xf]  ;;  %v4277_v12 = vld [vmem:[#allocation4 + $0x94] sm:$0xf0] }
  0x24   :  { %207 = vmatpush.bf16.msra.mxu1 %v3177_v27  ;;  %v3326_v13 = vor.u32 %v4269_v10, %v3325_v8  ;;  %v3360_v14 = vor.u32 %v4277_v12, %v3359_v11  ;;  %v3392_v15 = vld [vmem:[#allocation4 + $0x8c] sm:$0xf]  ;;  %v4285_v16 = vld [vmem:[#allocation4 + $0x98] sm:$0xf0]  ;;  %v3287_v20 = vld [vmem:[#allocation4 + $0x60] sm:$0xf] }
  0x25   :  { %387 = vmatpush.bf16.msra.mxu3 %v3242_v28  ;;  %v3393_v18 = vor.u32 %v4285_v16, %v3392_v15  ;;  %v4260_v21 = vld [vmem:[#allocation4 + $0x6c] sm:$0xf0]  ;;  %v3321_v22 = vld [vmem:[#allocation4 + $0x64] sm:$0xf]  ;;  %v4268_v24 = vld [vmem:[#allocation4 + $0x70] sm:$0xf0] }
  0x26   :  { %109 = vmatmul.bf16.vlgmr.msra.gmra.mxu0 %v4638_v32  ;;  %v3288_v23 = vor.u32 %v4260_v21, %v3287_v20  ;;  %v3355_v25 = vld [vmem:[#allocation4 + $0x68] sm:$0xf]  ;;  %v4276_v26 = vld [vmem:[#allocation4 + $0x74] sm:$0xf0]  ;;  %v3322_v28 = vor.u32 %v4268_v24, %v3321_v22  ;;  %v3388_v30 = vld [vmem:[#allocation4 + $0x6c] sm:$0xf] }
  0x27   :  { %208 = vmatmul.bf16.vlgmr.msra.gmra.mxu1 %v4638_v32  ;;  %306 = vmatpush.bf16.msra.mxu2 %v3210_v31  ;;  %v3356_v29 = vor.u32 %v4276_v26, %v3355_v25  ;;  %v4284_v31 = vld [vmem:[#allocation4 + $0x78] sm:$0xf0]  ;;  %v4663_v34 = vld [vmem:[%s4812_s0 + $0xc] sm:$0xff]   ;;  %v3283_v37 = vld [vmem:[#allocation4 + $0x40] sm:$0xf] }
  0x28   :  { %388 = vmatmul.bf16.vlgmr.msra.gmra.mxu3 %v4638_v32  ;;  %487 = vmatpush.bf16.msrb.mxu0 %v3304_v36  ;;  %v3389_v35 = vor.u32 %v4284_v31, %v3388_v30  ;;  %v4259_v38 = vld [vmem:[#allocation4 + $0x4c] sm:$0xf0]  ;;  %v3317_v39 = vld [vmem:[#allocation4 + $0x44] sm:$0xf]  ;;  %v4267_v42 = vld [vmem:[#allocation4 + $0x50] sm:$0xf0]  ;;  %v315_v45 = vunpack.c.l.bf16 %v4663_v34 }
  0x29   :  { %586 = vmatpush.bf16.msrb.mxu1 %v3338_v40  ;;  %766 = vmatpush.bf16.msrb.mxu3 %v3405_v44  ;;  %v3351_v43 = vld [vmem:[#allocation4 + $0x48] sm:$0xf]  ;;  %v3318_v46 = vor.u32 %v4267_v42, %v3317_v39  ;;  %v4275_v47 = vld [vmem:[#allocation4 + $0x54] sm:$0xf0]  ;;  %v4283_v50 = vld [vmem:[#allocation4 + $0x58] sm:$0xf0] }
  0x2a   :  { %307 = vmatmul.bf16.vlgmr.msra.gmra.mxu2 %v4638_v32  ;;  %v3352_v49 = vor.u32 %v4275_v47, %v3351_v43  ;;  %v3279_v51 = vld [vmem:[#allocation4 + $0x20] sm:$0xf]  ;;  %v3313_v55 = vld [vmem:[#allocation4 + $0x24] sm:$0xf]  ;;  %v3347_v57 = vld [vmem:[#allocation4 + $0x28] sm:$0xf] }
  0x2b   :  { %685 = vmatpush.bf16.msrb.mxu2 %v3372_v41  ;;  %v3284_v41 = vor.u32 %v4259_v38, %v3283_v37  ;;  %v3380_v61 = vld [vmem:[#allocation4 + $0x2c] sm:$0xf]  ;;  %v4282_v62 = vld [vmem:[#allocation4 + $0x38] sm:$0xf0]  ;;  %v3275_v3 = vld [vmem:[#allocation4] sm:$0xf] }
  0x2c   :  { %488 = vmatpush.bf16.msrb.mxu0 %v3300_v48  ;;  %v3384_v48 = vld [vmem:[#allocation4 + $0x4c] sm:$0xf]  ;;  %v3381_v2 = vor.u32 %v4282_v62, %v3380_v61  ;;  %v4257_v4 = vld [vmem:[#allocation4 + $0xc] sm:$0xf0]  ;;  %v4265_v8 = vld [vmem:[#allocation4 + $0x10] sm:$0xf0] }
  0x2d   :  { %587 = vmatpush.bf16.msrb.mxu1 %v3334_v52  ;;  %767 = vmatpush.bf16.msrb.mxu3 %v3401_v56  ;;  %v4258_v52 = vld [vmem:[#allocation4 + $0x2c] sm:$0xf0]  ;;  %v4266_v56 = vld [vmem:[#allocation4 + $0x30] sm:$0xf0]  ;;  %v3276_v7 = vor.u32 %v4257_v4, %v3275_v3  ;;  %v4273_v10 = vld [vmem:[#allocation4 + $0x14] sm:$0xf0] }
  0x2e   :  { %v3280_v54 = vor.u32 %v4258_v52, %v3279_v51  ;;  %v3314_v59 = vor.u32 %v4266_v56, %v3313_v55  ;;  %v233_v16 = vld [vmem:[%s4812_s0 + $0x8] sm:$0xf]  ;;  %v3439_v3 = vld [vmem:[#allocation4 + $0xe0] sm:$0xf]  ;;  %v4296_v4 = vld [vmem:[#allocation4 + $0xec] sm:$0xf0] }
  0x2f   :  { %686 = vmatpush.bf16.msrb.mxu2 %v3368_v53  ;;  %v3385_v53 = vor.u32 %v4283_v50, %v3384_v48 }
  0x30   :  { %489 = vmatpush.bf16.msrb.mxu0 %v3296_v60  ;;  %v4274_v60 = vld [vmem:[#allocation4 + $0x34] sm:$0xf0] }
  0x31   :  { %588 = vmatpush.bf16.msrb.mxu1 %v3330_v0  ;;  %768 = vmatpush.bf16.msrb.mxu3 %v3397_v5  ;;  %v3309_v5 = vld [vmem:[#allocation4 + $0x4] sm:$0xf] }
  0x32   :  { %v3310_v12 = vor.u32 %v4265_v8, %v3309_v5  ;;  %v3473_v5 = vld [vmem:[#allocation4 + $0xe4] sm:$0xf]  ;;  %v3507_v8 = vld [vmem:[#allocation4 + $0xe8] sm:$0xf] }
  0x33   :  { %687 = vmatpush.bf16.msrb.mxu2 %v3364_v1  ;;  %v3348_v1 = vor.u32 %v4274_v60, %v3347_v57 }
  0x34   :  { %490 = vmatpush.bf16.msrb.mxu0 %v3292_v9  ;;  %v3343_v9 = vld [vmem:[#allocation4 + $0x8] sm:$0xf] }
  0x35   :  { %589 = vmatpush.bf16.msrb.mxu1 %v3326_v13  ;;  %769 = vmatpush.bf16.msrb.mxu3 %v3393_v18  ;;  %v3376_v13 = vld [vmem:[#allocation4 + $0xc] sm:$0xf]  ;;  %v3344_v18 = vor.u32 %v4273_v10, %v3343_v9  ;;  %v4312_v9 = vld [vmem:[#allocation4 + $0xf4] sm:$0xf0] }
  0x37   :  { %688 = vmatpush.bf16.msrb.mxu2 %v3360_v14  ;;  %v4281_v14 = vld [vmem:[#allocation4 + $0x18] sm:$0xf0] }
  0x38   :  { %491 = vmatpush.bf16.msrb.mxu0 %v3288_v23  ;;  %v3377_v21 = vor.u32 %v4281_v14, %v3376_v13  ;;  %v234_v23 = vunpack.c.l.bf16 %v233_v16  ;;  %v4320_v13 = vld [vmem:[#allocation4 + $0xf8] sm:$0xf0]  ;;  %v4295_v16 = vld [vmem:[#allocation4 + $0xcc] sm:$0xf0] }
  0x39   :  { %590 = vmatpush.bf16.msrb.mxu1 %v3322_v28  ;;  %770 = vmatpush.bf16.msrb.mxu3 %v3389_v35 }
  0x3b   :  { %689 = vmatpush.bf16.msrb.mxu2 %v3356_v29 }
  0x3c   :  { %492 = vmatpush.bf16.msrb.mxu0 %v3284_v41 }
  0x3d   :  { %591 = vmatpush.bf16.msrb.mxu1 %v3318_v46  ;;  %771 = vmatpush.bf16.msrb.mxu3 %v3385_v53 }
  0x3f   :  { %690 = vmatpush.bf16.msrb.mxu2 %v3352_v49 }
  0x40   :  { %493 = vmatpush.bf16.msrb.mxu0 %v3280_v54 }
  0x41   :  { %592 = vmatpush.bf16.msrb.mxu1 %v3314_v59  ;;  %772 = vmatpush.bf16.msrb.mxu3 %v3381_v2 }
  0x43   :  { %691 = vmatpush.bf16.msrb.mxu2 %v3348_v1 }
  0x44   :  { %494 = vmatpush.bf16.msrb.mxu0 %v3276_v7  ;;  %v4304_v7 = vld [vmem:[#allocation4 + $0xf0] sm:$0xf0] }
  0x45   :  { %593 = vmatpush.bf16.msrb.mxu1 %v3310_v12  ;;  %773 = vmatpush.bf16.msrb.mxu3 %v3377_v21  ;;  %v3474_v10 = vor.u32 %v4304_v7, %v3473_v5  ;;  %v3540_v12 = vld [vmem:[#allocation4 + $0xec] sm:$0xf]  ;;  %v4311_v21 = vld [vmem:[#allocation4 + $0xd4] sm:$0xf0] }
  0x46   :  { %v3541_v14 = vor.u32 %v4320_v13, %v3540_v12 }
  0x47   :  { %692 = vmatpush.bf16.msrb.mxu2 %v3344_v18 }
  0x49   :  { %973 = vmatpush.bf16.msra.mxu1 %v3474_v10  ;;  %1153 = vmatpush.bf16.msra.mxu3 %v3541_v14  ;;  %v3453_v10 = vld [vmem:[#allocation4 + $0x44] sm:$0xf]  ;;  %v4299_v14 = vld [vmem:[#allocation4 + $0x50] sm:$0xf0] }
  0xa3   :  { %v110_v27 = vpop.f32.mrf.mxu0 }
  0xa4   :  { %v114_v32 = vadd.f32 %v110_v27, %v36_v17  ;;  %v209_v33 = vpop.f32.mrf.mxu1 }
  0xa5   :  { %v213_v36 = vadd.f32 %v209_v33, %v135_v19 }
  0xa6   :  { %v3173_v40 = vmul.f32 -1.442695, %v114_v32 }
  0xa7   :  { %v3206_v44 = vmul.f32 -1.442695, %v213_v36 }
  0xa8   :  { %4483 = vpow2.f32 %v3173_v40 }
  0xa9   :  { %4485 = vpow2.f32 %v3206_v44 }
  0xab   :  { %v389_v58 = vpop.f32.mrf.mxu3  ;;  %v112_v0 = vpop.f32.mrf.mxu0 }
  0xac   :  { %v393_v63 = vadd.f32 %v389_v58, %v315_v45  ;;  %v211_v6 = vpop.f32.mrf.mxu1 }
  0xad   :  { %v308_v17 = vpop.f32.mrf.mxu2  ;;  %v3440_v6 = vor.u32 %v4296_v4, %v3439_v3  ;;  %v3524_v3 = vld [vmem:[#allocation4 + $0x6c] sm:$0xf] }
  0xae   :  { %v3271_v11 = vmul.f32 -1.442695, %v393_v63  ;;  %v4484_v15 = vpop.eup %4483  ;;  %v312_v26 = vadd.f32 %v308_v17, %v234_v23  ;;  %v3469_v17 = vld [vmem:[#allocation4 + $0xc4] sm:$0xf] }
  0xaf   :  { %v4486_v19 = vpop.eup %4485  ;;  %v118_v20 = vadd.f32 1.0, %v4484_v15  ;;  %874 = vmatpush.bf16.msra.mxu0 %v3440_v6  ;;  %v3435_v15 = vld [vmem:[#allocation4 + $0xc0] sm:$0xf] }
  0xb0   :  { %4487 = vpow2.f32 %v3271_v11  ;;  %v217_v22 = vadd.f32 1.0, %v4486_v19  ;;  %v3508_v11 = vor.u32 %v4312_v9, %v3507_v8  ;;  %v3436_v18 = vor.u32 %v4295_v16, %v3435_v15  ;;  %v4303_v19 = vld [vmem:[#allocation4 + $0xd0] sm:$0xf0]  ;;  %v4685_v6 = vld [vmem:[%s4812_s0 + $0x1c] sm:$0xff]   ;;  %v4291_v9 = vld [vmem:[#allocation4 + $0x4c] sm:$0xf0] }
  0xb1   :  { %4489 = vrcp.f32 %v118_v20  ;;  %v130_v36 = vand.u32 2147483648, %v118_v20  ;;  %v128_v39 = vand.u32 2147483647, %v118_v20  ;;  %vm124_vm2 = vweird.f32 %v118_v20  ;;  %v3419_v8 = vld [vmem:[#allocation4 + $0x40] sm:$0xf] }
  0xb2   :  { %4491 = vrcp.f32 %v217_v22  ;;  %v229_v37 = vand.u32 2147483648, %v217_v22  ;;  %v227_v41 = vand.u32 2147483647, %v217_v22  ;;  %vm223_vm3 = vweird.f32 %v217_v22  ;;  %1072 = vmatpush.bf16.msra.mxu2 %v3508_v11 }
  0xb3   :  { %v391_v24 = vpop.f32.mrf.mxu3  ;;  %v131_v46 = vor.u32 1.1754944e-38, %v130_v36  ;;  %vm129_vm5 = vcmp.eq.f32.partialorder %v128_v39, 8.507059e+37  ;;  %875 = vmatpush.bf16.msra.mxu0 %v3436_v18  ;;  %v4678_v39 = vld [vmem:[%s4812_s0 + $0x14] sm:$0xff]   ;;  %v3420_v13 = vor.u32 %v4291_v9, %v3419_v8  ;;  %v701_v15 = vunpack.c.l.bf16 %v4685_v6 }
  0xb4   :  { %v230_v48 = vor.u32 1.1754944e-38, %v229_v37  ;;  %vm228_vm7 = vcmp.eq.f32.partialorder %v227_v41, 8.507059e+37  ;;  %v3536_v24 = vld [vmem:[#allocation4 + $0xcc] sm:$0xf]  ;;  %v3427_v41 = vld [vmem:[#allocation4 + $0x80] sm:$0xf]  ;;  %v3454_v16 = vor.u32 %v4299_v14, %v3453_v10 }
  0xb5   :  { %v310_v28 = vpop.f32.mrf.mxu2  ;;  %v3532_v37 = vld [vmem:[#allocation4 + $0xac] sm:$0xf]  ;;  %v4307_v18 = vld [vmem:[#allocation4 + $0x54] sm:$0xf0] }
  0xb6   :  { %v4488_v25 = vpop.eup %4487  ;;  %v4294_v28 = vld [vmem:[#allocation4 + $0xac] sm:$0xf0] }
  0xb7   :  { %v397_v27 = vadd.f32 1.0, %v4488_v25  ;;  %v4490_v29 = vpop.eup %4489  ;;  %v4319_v25 = vld [vmem:[#allocation4 + $0xd8] sm:$0xf0] }
  0xb8   :  { %v4492_v30 = vpop.eup %4491  ;;  %v120_v31 = vmul.f32 %v4490_v29, %v118_v20  ;;  %vm125_vm0 = vweird.f32 %v4490_v29  ;;  %v3503_v20 = vld [vmem:[#allocation4 + $0xc8] sm:$0xf] }
  0xb9   :  { %4493 = vrcp.f32 %v397_v27  ;;  %v219_v32 = vmul.f32 %v4492_v30, %v217_v22  ;;  %vm224_vm1 = vweird.f32 %v4492_v30  ;;  %vm126_vm4 = vmor %vm124_vm2, %vm125_vm0  ;;  %v409_v59 = vand.u32 2147483648, %v397_v27 }
  0xba   :  { %4495 = vtanh.f32 %v312_v26  ;;  %v121_v33 = vsub.f32 1.0, %v120_v31  ;;  %vm225_vm6 = vmor %vm223_vm3, %vm224_vm1  ;;  %vm403_vm9 = vweird.f32 %v397_v27  ;;  %v407_v60 = vand.u32 2147483647, %v397_v27  ;;  %v4302_v31 = vld [vmem:[#allocation4 + $0xb0] sm:$0xf0] }
  0xbb   :  { %v220_v35 = vsub.f32 1.0, %v219_v32  ;;  %v410_v62 = vor.u32 1.1754944e-38, %v409_v59  ;;  %v3470_v22 = vor.u32 %v4303_v19, %v3469_v17  ;;  %v3504_v23 = vor.u32 %v4311_v21, %v3503_v20  ;;  %v3499_v32 = vld [vmem:[#allocation4 + $0xa8] sm:$0xf]  ;;  %v3520_v19 = vld [vmem:[#allocation4 + $0x4c] sm:$0xf] }
  0xbc   :  { %v122_v38 = vmul.f32 %v4490_v29, %v121_v33  ;;  %vm408_vm11 = vcmp.eq.f32.partialorder %v407_v60, 8.507059e+37  ;;  %v3537_v26 = vor.u32 %v4319_v25, %v3536_v24  ;;  %v4310_v33 = vld [vmem:[#allocation4 + $0xb4] sm:$0xf0]  ;;  %v4300_v60 = vld [vmem:[#allocation4 + $0x70] sm:$0xf0] }
  0xbd   :  { %v221_v40 = vmul.f32 %v4492_v30, %v220_v35  ;;  %974 = vmatpush.bf16.msra.mxu1 %v3470_v22  ;;  %1073 = vmatpush.bf16.msra.mxu2 %v3504_v23  ;;  %v3500_v36 = vor.u32 %v4310_v33, %v3499_v32  ;;  %v3487_v17 = vld [vmem:[#allocation4 + $0x48] sm:$0xf]  ;;  %v4315_v21 = vld [vmem:[#allocation4 + $0x58] sm:$0xf0]  ;;  %v3415_v22 = vld [vmem:[#allocation4 + $0x20] sm:$0xf] }
  0xbe   :  { %v123_v43 = vadd.f32 %v4490_v29, %v122_v38  ;;  %1154 = vmatpush.bf16.msra.mxu3 %v3537_v26  ;;  %v4318_v38 = vld [vmem:[#allocation4 + $0xb8] sm:$0xf0]  ;;  %v3488_v20 = vor.u32 %v4307_v18, %v3487_v17  ;;  %v4290_v23 = vld [vmem:[#allocation4 + $0x2c] sm:$0xf0]  ;;  %v3521_v24 = vor.u32 %v4315_v21, %v3520_v19  ;;  %v3449_v26 = vld [vmem:[#allocation4 + $0x24] sm:$0xf] }
  0xbf   :  { %v4494_v42 = vpop.eup %4493  ;;  %v222_v47 = vadd.f32 %v4492_v30, %v221_v40  ;;  %v3533_v40 = vor.u32 %v4318_v38, %v3532_v37  ;;  %v3416_v25 = vor.u32 %v4290_v23, %v3415_v22  ;;  %v4306_v32 = vld [vmem:[#allocation4 + $0x34] sm:$0xf0]  ;;  %v3516_v33 = vld [vmem:[#allocation4 + $0x2c] sm:$0xf] }
  0xc0   :  { %v4496_v44 = vpop.eup %4495  ;;  %v399_v45 = vmul.f32 %v4494_v42, %v397_v27  ;;  %v127_v49 = vsel %vm126_vm4, %v4490_v29, %v123_v43  ;;  %vm404_vm8 = vweird.f32 %v4494_v42  ;;  %v3431_v27 = vld [vmem:[#allocation4 + $0xa0] sm:$0xf]  ;;  %v3465_v29 = vld [vmem:[#allocation4 + $0xa4] sm:$0xf] }
  0xc1   :  { %v132_v51 = vsel %vm129_vm5, %v131_v46, %v127_v49  ;;  %v226_v52 = vsel %vm225_vm6, %v4492_v30, %v222_v47  ;;  %vm405_vm10 = vmor %vm403_vm9, %vm404_vm8  ;;  %v3432_v30 = vor.u32 %v4294_v28, %v3431_v27  ;;  %v3466_v35 = vor.u32 %v4302_v31, %v3465_v29  ;;  %1074 = vmatpush.bf16.msra.mxu2 %v3500_v36  ;;  %v3461_v43 = vld [vmem:[#allocation4 + $0x84] sm:$0xf]  ;;  %v3495_v46 = vld [vmem:[#allocation4 + $0x88] sm:$0xf] }
  0xc2   :  { %v400_v50 = vsub.f32 1.0, %v399_v45  ;;  %v231_v53 = vsel %vm228_vm7, %v230_v48, %v226_v52  ;;  %v414_v54 = vmul.f32 %v4496_v44, %v132_v51  ;;  %1155 = vmatpush.bf16.msra.mxu3 %v3533_v40  ;;  %v4301_v45 = vld [vmem:[#allocation4 + $0x90] sm:$0xf0]  ;;  %v4309_v47 = vld [vmem:[#allocation4 + $0x94] sm:$0xf0]  ;;  %v422_v52 = vunpack.c.h.bf16 %v4663_v34 }
  0xc3   :  { %v413_v56 = vmul.f32 0.0, %v231_v53  ;;  %876 = vmatpush.bf16.msra.mxu0 %v3432_v30  ;;  %975 = vmatpush.bf16.msra.mxu1 %v3466_v35  ;;  %v3462_v48 = vor.u32 %v4301_v45, %v3461_v43  ;;  %v3496_v49 = vor.u32 %v4309_v47, %v3495_v46  ;;  %v4317_v51 = vld [vmem:[#allocation4 + $0x98] sm:$0xf0]  ;;  %v521_v53 = vunpack.c.l.bf16 %v4678_v39  ;;  %v4298_v27 = vld [vmem:[#allocation4 + $0x30] sm:$0xf0] }
  0xc4   :  { %v401_v55 = vmul.f32 %v4494_v42, %v400_v50  ;;  %v3528_v50 = vld [vmem:[#allocation4 + $0x8c] sm:$0xf]  ;;  %v4316_v34 = vld [vmem:[#allocation4 + $0x78] sm:$0xf0]  ;;  %v3483_v28 = vld [vmem:[#allocation4 + $0x28] sm:$0xf]  ;;  %v3450_v31 = vor.u32 %v4298_v27, %v3449_v26 }
  0xc5   :  { %v4669_v57 = vadd.f32 %v414_v54, %v413_v56  ;;  %v3529_v54 = vor.u32 %v4317_v51, %v3528_v50  ;;  %1075 = vmatpush.bf16.msra.mxu2 %v3496_v49  ;;  %v4292_v56 = vld [vmem:[#allocation4 + $0x6c] sm:$0xf0]  ;;  %v3525_v7 = vor.u32 %v4316_v34, %v3524_v3  ;;  %v4314_v35 = vld [vmem:[#allocation4 + $0x38] sm:$0xf0]  ;;  %v3484_v40 = vor.u32 %v4306_v32, %v3483_v28  ;;  %v4297_v46 = vld [vmem:[#allocation4 + $0x10] sm:$0xf0] }
  0xc6   :  { %v402_v58 = vadd.f32 %v4494_v42, %v401_v55  ;;  %v3423_v55 = vld [vmem:[#allocation4 + $0x60] sm:$0xf]  ;;  %v4289_v43 = vld [vmem:[#allocation4 + $0xc] sm:$0xf0]  ;;  %v3479_v47 = vld [vmem:[#allocation4 + $0x8] sm:$0xf] }
  0xc7   :  { %4497 = vtanh.f32 %v4669_v57  ;;  %976 = vmatpush.bf16.msra.mxu1 %v3462_v48  ;;  %1156 = vmatpush.bf16.msra.mxu3 %v3529_v54  ;;  %v3424_v59 = vor.u32 %v4292_v56, %v3423_v55  ;;  %v4305_v48 = vld [vmem:[#allocation4 + $0x14] sm:$0xf0]  ;;  %v3512_v51 = vld [vmem:[#allocation4 + $0xc] sm:$0xf] }
  0xc8   :  { %v406_v61 = vsel %vm405_vm10, %v4494_v42, %v402_v58  ;;  %v4293_v42 = vld [vmem:[#allocation4 + $0x8c] sm:$0xf0]  ;;  %v3457_v58 = vld [vmem:[#allocation4 + $0x64] sm:$0xf]  ;;  %v3480_v54 = vor.u32 %v4305_v48, %v3479_v47  ;;  %v3676_v48 = vld [vmem:[#allocation4 + $0xec] sm:$0xf] }
  0xc9   :  { %v411_v0 = vsel %vm408_vm11, %v410_v62, %v406_v61  ;;  %v3428_v44 = vor.u32 %v4293_v42, %v3427_v41  ;;  %v3491_v61 = vld [vmem:[#allocation4 + $0x68] sm:$0xf]  ;;  %v4308_v62 = vld [vmem:[#allocation4 + $0x74] sm:$0xf0]  ;;  %v3517_v41 = vor.u32 %v4314_v35, %v3516_v33  ;;  %v3411_v42 = vld [vmem:[#allocation4] sm:$0xf] }
  0xca   :  { %v3412_v45 = vor.u32 %v4289_v43, %v3411_v42  ;;  %v4336_v43 = vld [vmem:[#allocation4 + $0xf0] sm:$0xf0] }
  0xcb   :  { %877 = vmatpush.bf16.msra.mxu0 %v3428_v44  ;;  %1157 = vmatpush.bf16.msra.mxu3 %v3525_v7  ;;  %v3445_v44 = vld [vmem:[#allocation4 + $0x4] sm:$0xf] }
  0xcc   :  { %v3446_v50 = vor.u32 %v4297_v46, %v3445_v44  ;;  %v3643_v44 = vld [vmem:[#allocation4 + $0xe8] sm:$0xf] }
  0xcd   :  { %v4498_v63 = vpop.eup %4497 }
  0xce   :  { %v417_v1 = vmul.f32 %v4498_v63, %v411_v0 }
  0xcf   :  { %878 = vmatpush.bf16.msra.mxu0 %v3424_v59  ;;  %1158 = vmatpush.bf16.msra.mxu3 %v3521_v24 }
  0xd0   :  { %v418_v2 = vpack.c.bf16 %v417_v1, %v417_v1  ;;  %v3458_v1 = vor.u32 %v4300_v60, %v3457_v58 }
  0xd2   :  { %419 = vst [vmem:[%s4814_s2] sm:$0xf] %v418_v2  ;;  %495 = vmatmul.bf16.vlgmr.msrb.gmra.mxu0 %v418_v2  ;;  %594 = vmatmul.bf16.vlgmr.msrb.gmra.mxu1 %v418_v2 }
  0xd3   :  { %693 = vmatmul.bf16.vlgmr.msrb.gmra.mxu2 %v418_v2  ;;  %774 = vmatmul.bf16.vlgmr.msrb.gmra.mxu3 %v418_v2  ;;  %v3492_v2 = vor.u32 %v4308_v62, %v3491_v61  ;;  %v620_v62 = vunpack.c.h.bf16 %v4678_v39 }
  0xd4   :  { %977 = vmatpush.bf16.msra.mxu1 %v3458_v1  ;;  %879 = vmatpush.bf16.msra.mxu0 %v3420_v13 }
  0xd5   :  { %1076 = vmatpush.bf16.msra.mxu2 %v3492_v2  ;;  %1159 = vmatpush.bf16.msra.mxu3 %v3517_v41  ;;  %v3609_v41 = vld [vmem:[#allocation4 + $0xe4] sm:$0xf] }
  0xd6   :  { %v3610_v46 = vor.u32 %v4336_v43, %v3609_v41 }
  0xd8   :  { %978 = vmatpush.bf16.msra.mxu1 %v3454_v16  ;;  %880 = vmatpush.bf16.msra.mxu0 %v3416_v25 }
  0xd9   :  { %1077 = vmatpush.bf16.msra.mxu2 %v3488_v20 }
  0xdc   :  { %979 = vmatpush.bf16.msra.mxu1 %v3450_v31  ;;  %881 = vmatpush.bf16.msra.mxu0 %v3412_v45  ;;  %v4344_v45 = vld [vmem:[#allocation4 + $0xf4] sm:$0xf0] }
  0xdd   :  { %1078 = vmatpush.bf16.msra.mxu2 %v3484_v40  ;;  %v4328_v40 = vld [vmem:[#allocation4 + $0xec] sm:$0xf0]  ;;  %v3644_v47 = vor.u32 %v4344_v45, %v3643_v44  ;;  %v3555_v44 = vld [vmem:[#allocation4 + $0x40] sm:$0xf] }
  0xde   :  { %v4323_v45 = vld [vmem:[#allocation4 + $0x4c] sm:$0xf0] }
  0xe0   :  { %980 = vmatpush.bf16.msra.mxu1 %v3446_v50 }
  0xe1   :  { %1079 = vmatpush.bf16.msra.mxu2 %v3480_v54 }
  0xe4   :  { %1360 = vmatpush.bf16.msrb.mxu1 %v3610_v46  ;;  %v3589_v46 = vld [vmem:[#allocation4 + $0x44] sm:$0xf] }
  0xe5   :  { %1459 = vmatpush.bf16.msrb.mxu2 %v3644_v47 }
 0x14f   :  { %v496_v63 = vpop.f32.mrf.mxu0  ;;  %v595_v0 = vpop.f32.mrf.mxu1 }
 0x150   :  { %v500_v4 = vadd.f32 %v496_v63, %v422_v52  ;;  %v599_v5 = vadd.f32 %v595_v0, %v521_v53  ;;  %v4313_v52 = vld [vmem:[#allocation4 + $0x18] sm:$0xf0] }
 0x151   :  { %v3513_v58 = vor.u32 %v4313_v52, %v3512_v51  ;;  %v3571_v51 = vld [vmem:[#allocation4 + $0xc0] sm:$0xf]  ;;  %v4327_v52 = vld [vmem:[#allocation4 + $0xcc] sm:$0xf0] }
 0x152   :  { %v3305_v11 = vmul.f32 -1.442695, %v500_v4  ;;  %v3339_v12 = vmul.f32 -1.442695, %v599_v5  ;;  %v3572_v54 = vor.u32 %v4327_v52, %v3571_v51 }
 0x153   :  { %1160 = vmatpush.bf16.msra.mxu3 %v3513_v58  ;;  %v4343_v58 = vld [vmem:[#allocation4 + $0xd4] sm:$0xf0] }
 0x154   :  { %4499 = vpow2.f32 %v3305_v11 }
 0x155   :  { %4501 = vpow2.f32 %v3339_v12 }
 0x156   :  { %v694_v29 = vpop.f32.mrf.mxu2  ;;  %v775_v30 = vpop.f32.mrf.mxu3 }
 0x157   :  { %v779_v36 = vadd.f32 %v775_v30, %v701_v15  ;;  %v498_v37 = vpop.f32.mrf.mxu0  ;;  %v597_v38 = vpop.f32.mrf.mxu1  ;;  %v698_v2 = vadd.f32 %v694_v29, %v620_v62  ;;  %v4351_v62 = vld [vmem:[#allocation4 + $0xd8] sm:$0xf0] }
 0x159   :  { %v3406_v49 = vmul.f32 -1.442695, %v779_v36 }
 0x15a   :  { %v4500_v53 = vpop.eup %4499 }
 0x15b   :  { %v4502_v55 = vpop.eup %4501  ;;  %v504_v56 = vadd.f32 1.0, %v4500_v53  ;;  %4503 = vpow2.f32 %v3406_v49  ;;  %v4352_v49 = vld [vmem:[#allocation4 + $0xf8] sm:$0xf0]  ;;  %v3605_v53 = vld [vmem:[#allocation4 + $0xc4] sm:$0xf] }
 0x15c   :  { %v603_v59 = vadd.f32 1.0, %v4502_v55  ;;  %v3677_v50 = vor.u32 %v4352_v49, %v3676_v48  ;;  %v4335_v55 = vld [vmem:[#allocation4 + $0xd0] sm:$0xf0]  ;;  %v3556_v49 = vor.u32 %v4323_v45, %v3555_v44 }
 0x15d   :  { %4505 = vrcp.f32 %v504_v56  ;;  %v516_v8 = vand.u32 2147483648, %v504_v56  ;;  %v514_v11 = vand.u32 2147483647, %v504_v56  ;;  %vm510_vm14 = vweird.f32 %v504_v56 }
 0x15e   :  { %4507 = vrcp.f32 %v603_v59  ;;  %v696_v60 = vpop.f32.mrf.mxu2  ;;  %v777_v61 = vpop.f32.mrf.mxu3  ;;  %v615_v9 = vand.u32 2147483648, %v603_v59  ;;  %v613_v39 = vand.u32 2147483647, %v603_v59  ;;  %vm609_vm15 = vweird.f32 %v603_v59  ;;  %1540 = vmatpush.bf16.msrb.mxu3 %v3677_v50  ;;  %v4331_v50 = vld [vmem:[#allocation4 + $0x50] sm:$0xf0] }
 0x15f   :  { %v517_v15 = vor.u32 1.1754944e-38, %v516_v8  ;;  %vm515_vm2 = vcmp.eq.f32.partialorder %v514_v11, 8.507059e+37  ;;  %v3672_v61 = vld [vmem:[#allocation4 + $0xcc] sm:$0xf]  ;;  %v4699_v11 = vld [vmem:[%s4812_s0 + $0x24] sm:$0xff]   ;;  %v3590_v52 = vor.u32 %v4331_v50, %v3589_v46 }
 0x160   :  { %v616_v18 = vor.u32 1.1754944e-38, %v615_v9  ;;  %vm614_vm3 = vcmp.eq.f32.partialorder %v613_v39, 8.507059e+37  ;;  %v3668_v9 = vld [vmem:[#allocation4 + $0xac] sm:$0xf]  ;;  %v3563_v39 = vld [vmem:[#allocation4 + $0x80] sm:$0xf] }
 0x161   :  { %v4504_v63 = vpop.eup %4503 }
 0x162   :  { %v783_v0 = vadd.f32 1.0, %v4504_v63  ;;  %v3673_v63 = vor.u32 %v4351_v62, %v3672_v61 }
 0x163   :  { %v4506_v1 = vpop.eup %4505 }
 0x164   :  { %v4508_v3 = vpop.eup %4507  ;;  %v506_v34 = vmul.f32 %v4506_v1, %v504_v56  ;;  %4509 = vrcp.f32 %v783_v0  ;;  %vm511_vm12 = vweird.f32 %v4506_v1  ;;  %v795_v30 = vand.u32 2147483648, %v783_v0  ;;  %v3639_v56 = vld [vmem:[#allocation4 + $0xc8] sm:$0xf]  ;;  %1541 = vmatpush.bf16.msrb.mxu3 %v3673_v63  ;;  %v3585_v63 = vld [vmem:[#allocation4 + $0x24] sm:$0xf] }
 0x165   :  { %v605_v4 = vmul.f32 %v4508_v3, %v603_v59  ;;  %4511 = vtanh.f32 %v698_v2  ;;  %vm610_vm13 = vweird.f32 %v4508_v3  ;;  %vm512_vm0 = vmor %vm510_vm14, %vm511_vm12  ;;  %vm789_vm5 = vweird.f32 %v783_v0  ;;  %v3601_v2 = vld [vmem:[#allocation4 + $0xa4] sm:$0xf] }
 0x166   :  { %v507_v5 = vsub.f32 1.0, %v506_v34  ;;  %vm611_vm1 = vmor %vm609_vm15, %vm610_vm13  ;;  %v793_v31 = vand.u32 2147483647, %v783_v0  ;;  %v796_v33 = vor.u32 1.1754944e-38, %v795_v30  ;;  %v3606_v59 = vor.u32 %v4335_v55, %v3605_v53  ;;  %v4334_v34 = vld [vmem:[#allocation4 + $0xb0] sm:$0xf0] }
 0x167   :  { %v606_v7 = vsub.f32 1.0, %v605_v4  ;;  %v3640_v60 = vor.u32 %v4343_v58, %v3639_v56  ;;  %v3635_v4 = vld [vmem:[#allocation4 + $0xa8] sm:$0xf]  ;;  %v3656_v55 = vld [vmem:[#allocation4 + $0x4c] sm:$0xf] }
 0x168   :  { %v508_v10 = vmul.f32 %v4506_v1, %v507_v5  ;;  %vm794_vm7 = vcmp.eq.f32.partialorder %v793_v31, 8.507059e+37  ;;  %1361 = vmatpush.bf16.msrb.mxu1 %v3606_v59  ;;  %v4342_v5 = vld [vmem:[#allocation4 + $0xb4] sm:$0xf0]  ;;  %v4332_v31 = vld [vmem:[#allocation4 + $0x70] sm:$0xf0] }
 0x169   :  { %v607_v12 = vmul.f32 %v4508_v3, %v606_v7  ;;  %1460 = vmatpush.bf16.msrb.mxu2 %v3640_v60  ;;  %v3602_v7 = vor.u32 %v4334_v34, %v3601_v2  ;;  %v3636_v8 = vor.u32 %v4342_v5, %v3635_v4  ;;  %v3623_v53 = vld [vmem:[#allocation4 + $0x48] sm:$0xf]  ;;  %v4347_v58 = vld [vmem:[#allocation4 + $0x58] sm:$0xf0]  ;;  %v3551_v59 = vld [vmem:[#allocation4 + $0x20] sm:$0xf] }
 0x16a   :  { %v4510_v13 = vpop.eup %4509  ;;  %v509_v14 = vadd.f32 %v4506_v1, %v508_v10  ;;  %v4350_v10 = vld [vmem:[#allocation4 + $0xb8] sm:$0xf0]  ;;  %v4322_v60 = vld [vmem:[#allocation4 + $0x2c] sm:$0xf0]  ;;  %v3657_v61 = vor.u32 %v4347_v58, %v3656_v55  ;;  %v4338_v4 = vld [vmem:[#allocation4 + $0x34] sm:$0xf0] }
 0x16b   :  { %v608_v16 = vadd.f32 %v4508_v3, %v607_v12  ;;  %v785_v17 = vmul.f32 %v4510_v13, %v783_v0  ;;  %v4512_v20 = vpop.eup %4511  ;;  %vm790_vm4 = vweird.f32 %v4510_v13  ;;  %v3567_v0 = vld [vmem:[#allocation4 + $0xa0] sm:$0xf]  ;;  %v3669_v12 = vor.u32 %v4350_v10, %v3668_v9  ;;  %v3652_v5 = vld [vmem:[#allocation4 + $0x2c] sm:$0xf] }
 0x16c   :  { %v513_v19 = vsel %vm512_vm0, %v4506_v1, %v509_v14  ;;  %vm791_vm6 = vmor %vm789_vm5, %vm790_vm4  ;;  %v4326_v1 = vld [vmem:[#allocation4 + $0xac] sm:$0xf0]  ;;  %1362 = vmatpush.bf16.msrb.mxu1 %v3602_v7  ;;  %v3597_v14 = vld [vmem:[#allocation4 + $0x84] sm:$0xf]  ;;  %v3552_v62 = vor.u32 %v4322_v60, %v3551_v59 }
 0x16d   :  { %v518_v21 = vsel %vm515_vm2, %v517_v15, %v513_v19  ;;  %v612_v22 = vsel %vm611_vm1, %v4508_v3, %v608_v16  ;;  %v786_v23 = vsub.f32 1.0, %v785_v17  ;;  %v3568_v3 = vor.u32 %v4326_v1, %v3567_v0  ;;  %1461 = vmatpush.bf16.msrb.mxu2 %v3636_v8  ;;  %1542 = vmatpush.bf16.msrb.mxu3 %v3669_v12  ;;  %v4333_v16 = vld [vmem:[#allocation4 + $0x90] sm:$0xf0]  ;;  %v3631_v17 = vld [vmem:[#allocation4 + $0x88] sm:$0xf] }
 0x16e   :  { %v617_v24 = vsel %vm614_vm3, %v616_v18, %v612_v22  ;;  %v800_v25 = vmul.f32 %v4512_v20, %v518_v21  ;;  %v4341_v18 = vld [vmem:[#allocation4 + $0x94] sm:$0xf0]  ;;  %v3598_v19 = vor.u32 %v4333_v16, %v3597_v14  ;;  %v3664_v21 = vld [vmem:[#allocation4 + $0x8c] sm:$0xf]  ;;  %v4349_v22 = vld [vmem:[#allocation4 + $0x98] sm:$0xf0] }
 0x16f   :  { %v799_v26 = vmul.f32 %v617_v24, %v4669_v57  ;;  %v787_v27 = vmul.f32 %v4510_v13, %v786_v23  ;;  %v3575_v57 = vld [vmem:[#allocation4 + $0xe0] sm:$0xf]  ;;  %v3632_v20 = vor.u32 %v4341_v18, %v3631_v17  ;;  %v809_v23 = vunpack.c.h.bf16 %v4685_v6  ;;  %v4348_v6 = vld [vmem:[#allocation4 + $0x78] sm:$0xf0]  ;;  %v4330_v0 = vld [vmem:[#allocation4 + $0x30] sm:$0xf0] }
 0x170   :  { %v3576_v42 = vor.u32 %v4328_v40, %v3575_v57  ;;  %v908_v24 = vunpack.c.l.bf16 %v4699_v11  ;;  %1363 = vmatpush.bf16.msrb.mxu1 %v3598_v19  ;;  %v3660_v57 = vld [vmem:[#allocation4 + $0x6c] sm:$0xf]  ;;  %v3619_v1 = vld [vmem:[#allocation4 + $0x28] sm:$0xf]  ;;  %v3586_v34 = vor.u32 %v4330_v0, %v3585_v63  ;;  %v4346_v7 = vld [vmem:[#allocation4 + $0x38] sm:$0xf0] }
 0x171   :  { %v4690_v28 = vadd.f32 %v800_v25, %v799_v26  ;;  %v788_v29 = vadd.f32 %v4510_v13, %v787_v27  ;;  %v3665_v25 = vor.u32 %v4349_v22, %v3664_v21  ;;  %1462 = vmatpush.bf16.msrb.mxu2 %v3632_v20  ;;  %v3559_v26 = vld [vmem:[#allocation4 + $0x60] sm:$0xf]  ;;  %v4324_v27 = vld [vmem:[#allocation4 + $0x6c] sm:$0xf0]  ;;  %v3661_v43 = vor.u32 %v4348_v6, %v3660_v57  ;;  %v4329_v17 = vld [vmem:[#allocation4 + $0x10] sm:$0xf0] }
 0x172   :  { %1261 = vmatpush.bf16.msrb.mxu0 %v3576_v42  ;;  %v3560_v30 = vor.u32 %v4324_v27, %v3559_v26  ;;  %v4706_v42 = vld [vmem:[%s4812_s0 + $0x2c] sm:$0xff]   ;;  %v3620_v12 = vor.u32 %v4338_v4, %v3619_v1  ;;  %v3615_v18 = vld [vmem:[#allocation4 + $0x8] sm:$0xf]  ;;  %v4337_v19 = vld [vmem:[#allocation4 + $0x14] sm:$0xf0] }
 0x173   :  { %4513 = vtanh.f32 %v4690_v28  ;;  %v792_v32 = vsel %vm791_vm6, %v4510_v13, %v788_v29  ;;  %v4325_v13 = vld [vmem:[#allocation4 + $0x8c] sm:$0xf0]  ;;  %v3593_v29 = vld [vmem:[#allocation4 + $0x64] sm:$0xf]  ;;  %1543 = vmatpush.bf16.msrb.mxu3 %v3665_v25  ;;  %v1088_v51 = vunpack.c.l.bf16 %v4706_v42  ;;  %v3648_v22 = vld [vmem:[#allocation4 + $0xc] sm:$0xf]  ;;  %v3616_v25 = vor.u32 %v4337_v19, %v3615_v18 }
 0x174   :  { %v797_v36 = vsel %vm794_vm7, %v796_v33, %v792_v32  ;;  %v3564_v15 = vor.u32 %v4325_v13, %v3563_v39  ;;  %v3627_v32 = vld [vmem:[#allocation4 + $0x68] sm:$0xf]  ;;  %v4340_v33 = vld [vmem:[#allocation4 + $0x74] sm:$0xf0]  ;;  %v3653_v39 = vor.u32 %v4346_v7, %v3652_v5  ;;  %v3547_v13 = vld [vmem:[#allocation4] sm:$0xf] }
 0x175   :  { %v4321_v14 = vld [vmem:[#allocation4 + $0xc] sm:$0xf0]  ;;  %v3812_v19 = vld [vmem:[#allocation4 + $0xec] sm:$0xf] }
 0x176   :  { %1262 = vmatpush.bf16.msrb.mxu0 %v3572_v54  ;;  %v4339_v54 = vld [vmem:[#allocation4 + $0x54] sm:$0xf0]  ;;  %v3548_v16 = vor.u32 %v4321_v14, %v3547_v13  ;;  %v4368_v14 = vld [vmem:[#allocation4 + $0xf0] sm:$0xf0] }
 0x177   :  { %1544 = vmatpush.bf16.msrb.mxu3 %v3661_v43  ;;  %v3624_v56 = vor.u32 %v4339_v54, %v3623_v53 }
 0x179   :  { %v4514_v35 = vpop.eup %4513 }
 0x17a   :  { %v803_v37 = vmul.f32 %v4514_v35, %v797_v36  ;;  %1263 = vmatpush.bf16.msrb.mxu0 %v3568_v3 }
 0x17b   :  { %1545 = vmatpush.bf16.msrb.mxu3 %v3657_v61 }
 0x17c   :  { %v804_v38 = vpack.c.bf16 %v803_v37, %v803_v37  ;;  %v3594_v37 = vor.u32 %v4332_v31, %v3593_v29 }
 0x17e   :  { %3407 = vst [vmem:[%s4814_s2 + $0x4] sm:$0xf] %v804_v38  ;;  %882 = vmatmul.bf16.vlgmr.msra.gmra.mxu0 %v804_v38  ;;  %981 = vmatmul.bf16.vlgmr.msra.gmra.mxu1 %v804_v38 }
 0x17f   :  { %1080 = vmatmul.bf16.vlgmr.msra.gmra.mxu2 %v804_v38  ;;  %1161 = vmatmul.bf16.vlgmr.msra.gmra.mxu3 %v804_v38  ;;  %v3628_v38 = vor.u32 %v4340_v33, %v3627_v32  ;;  %v1007_v33 = vunpack.c.h.bf16 %v4699_v11 }
 0x180   :  { %1264 = vmatpush.bf16.msrb.mxu0 %v3564_v15  ;;  %1364 = vmatpush.bf16.msrb.mxu1 %v3594_v37  ;;  %v3581_v15 = vld [vmem:[#allocation4 + $0x4] sm:$0xf] }
 0x181   :  { %1463 = vmatpush.bf16.msrb.mxu2 %v3628_v38  ;;  %v3582_v21 = vor.u32 %v4329_v17, %v3581_v15  ;;  %1546 = vmatpush.bf16.msrb.mxu3 %v3653_v39  ;;  %v3745_v39 = vld [vmem:[#allocation4 + $0xe4] sm:$0xf]  ;;  %v3779_v15 = vld [vmem:[#allocation4 + $0xe8] sm:$0xf] }
 0x182   :  { %v3746_v17 = vor.u32 %v4368_v14, %v3745_v39 }
 0x184   :  { %1265 = vmatpush.bf16.msrb.mxu0 %v3560_v30  ;;  %1365 = vmatpush.bf16.msrb.mxu1 %v3590_v52 }
 0x185   :  { %1464 = vmatpush.bf16.msrb.mxu2 %v3624_v56 }
 0x188   :  { %1266 = vmatpush.bf16.msrb.mxu0 %v3556_v49  ;;  %1366 = vmatpush.bf16.msrb.mxu1 %v3586_v34 }
 0x189   :  { %1465 = vmatpush.bf16.msrb.mxu2 %v3620_v12  ;;  %v4360_v12 = vld [vmem:[#allocation4 + $0xec] sm:$0xf0] }
 0x18c   :  { %1267 = vmatpush.bf16.msrb.mxu0 %v3552_v62  ;;  %1367 = vmatpush.bf16.msrb.mxu1 %v3582_v21 }
 0x18d   :  { %1466 = vmatpush.bf16.msrb.mxu2 %v3616_v25 }
 0x190   :  { %1268 = vmatpush.bf16.msrb.mxu0 %v3548_v16  ;;  %v4376_v16 = vld [vmem:[#allocation4 + $0xf4] sm:$0xf0]  ;;  %1747 = vmatpush.bf16.msra.mxu1 %v3746_v17  ;;  %v3725_v17 = vld [vmem:[#allocation4 + $0x44] sm:$0xf] }
 0x191   :  { %v3780_v18 = vor.u32 %v4376_v16, %v3779_v15  ;;  %v3691_v15 = vld [vmem:[#allocation4 + $0x40] sm:$0xf]  ;;  %v4355_v16 = vld [vmem:[#allocation4 + $0x4c] sm:$0xf0] }
 0x193   :  { %1846 = vmatpush.bf16.msra.mxu2 %v3780_v18 }
 0x1fb   :  { %v883_v35 = vpop.f32.mrf.mxu0  ;;  %v982_v36 = vpop.f32.mrf.mxu1 }
 0x1fc   :  { %v887_v40 = vadd.f32 %v883_v35, %v809_v23  ;;  %v986_v41 = vadd.f32 %v982_v36, %v908_v24  ;;  %v4345_v23 = vld [vmem:[#allocation4 + $0x18] sm:$0xf0] }
 0x1fd   :  { %v3649_v29 = vor.u32 %v4345_v23, %v3648_v22  ;;  %v3707_v22 = vld [vmem:[#allocation4 + $0xc0] sm:$0xf]  ;;  %v4359_v23 = vld [vmem:[#allocation4 + $0xcc] sm:$0xf0] }
 0x1fe   :  { %v3441_v47 = vmul.f32 -1.442695, %v887_v40  ;;  %v3475_v48 = vmul.f32 -1.442695, %v986_v41  ;;  %v3708_v25 = vor.u32 %v4359_v23, %v3707_v22 }
 0x1ff   :  { %1547 = vmatpush.bf16.msrb.mxu3 %v3649_v29  ;;  %v4375_v29 = vld [vmem:[#allocation4 + $0xd4] sm:$0xf0] }
 0x200   :  { %4515 = vpow2.f32 %v3441_v47 }
 0x201   :  { %4517 = vpow2.f32 %v3475_v48 }
 0x202   :  { %v1081_v2 = vpop.f32.mrf.mxu2  ;;  %v1162_v3 = vpop.f32.mrf.mxu3 }
 0x203   :  { %v1166_v8 = vadd.f32 %v1162_v3, %v1088_v51  ;;  %v885_v9 = vpop.f32.mrf.mxu0  ;;  %v984_v10 = vpop.f32.mrf.mxu1  ;;  %v1085_v38 = vadd.f32 %v1081_v2, %v1007_v33  ;;  %v4383_v33 = vld [vmem:[#allocation4 + $0xd8] sm:$0xf0] }
 0x205   :  { %v3542_v20 = vmul.f32 -1.442695, %v1166_v8 }
 0x206   :  { %v4516_v24 = vpop.eup %4515 }
 0x207   :  { %v4518_v26 = vpop.eup %4517  ;;  %v891_v27 = vadd.f32 1.0, %v4516_v24  ;;  %4519 = vpow2.f32 %v3542_v20  ;;  %v4384_v20 = vld [vmem:[#allocation4 + $0xf8] sm:$0xf0]  ;;  %v3741_v24 = vld [vmem:[#allocation4 + $0xc4] sm:$0xf] }
 0x208   :  { %v990_v30 = vadd.f32 1.0, %v4518_v26  ;;  %v3813_v21 = vor.u32 %v4384_v20, %v3812_v19  ;;  %v4367_v26 = vld [vmem:[#allocation4 + $0xd0] sm:$0xf0]  ;;  %v3692_v20 = vor.u32 %v4355_v16, %v3691_v15 }
 0x209   :  { %4521 = vrcp.f32 %v891_v27  ;;  %v903_v44 = vand.u32 2147483648, %v891_v27  ;;  %v901_v47 = vand.u32 2147483647, %v891_v27  ;;  %vm897_vm10 = vweird.f32 %v891_v27 }
 0x20a   :  { %4523 = vrcp.f32 %v990_v30  ;;  %v1083_v31 = vpop.f32.mrf.mxu2  ;;  %v1164_v32 = vpop.f32.mrf.mxu3  ;;  %v1002_v45 = vand.u32 2147483648, %v990_v30  ;;  %v1000_v11 = vand.u32 2147483647, %v990_v30  ;;  %vm996_vm11 = vweird.f32 %v990_v30  ;;  %1927 = vmatpush.bf16.msra.mxu3 %v3813_v21  ;;  %v4363_v21 = vld [vmem:[#allocation4 + $0x50] sm:$0xf0] }
 0x20b   :  { %v904_v51 = vor.u32 1.1754944e-38, %v903_v44  ;;  %vm902_vm14 = vcmp.eq.f32.partialorder %v901_v47, 8.507059e+37  ;;  %v3808_v32 = vld [vmem:[#allocation4 + $0xcc] sm:$0xf]  ;;  %v4720_v47 = vld [vmem:[%s4812_s0 + $0x34] sm:$0xff]   ;;  %v3726_v23 = vor.u32 %v4363_v21, %v3725_v17 }
 0x20c   :  { %v1003_v54 = vor.u32 1.1754944e-38, %v1002_v45  ;;  %vm1001_vm15 = vcmp.eq.f32.partialorder %v1000_v11, 8.507059e+37  ;;  %v3804_v45 = vld [vmem:[#allocation4 + $0xac] sm:$0xf]  ;;  %v3699_v11 = vld [vmem:[#allocation4 + $0x80] sm:$0xf] }
 0x20d   :  { %v4520_v35 = vpop.eup %4519 }
 0x20e   :  { %v1170_v36 = vadd.f32 1.0, %v4520_v35  ;;  %v3809_v35 = vor.u32 %v4383_v33, %v3808_v32 }
 0x20f   :  { %v4522_v37 = vpop.eup %4521 }
 0x210   :  { %v4524_v57 = vpop.eup %4523  ;;  %v893_v6 = vmul.f32 %v4522_v37, %v891_v27  ;;  %4525 = vrcp.f32 %v1170_v36  ;;  %vm898_vm8 = vweird.f32 %v4522_v37  ;;  %v1182_v3 = vand.u32 2147483648, %v1170_v36  ;;  %v3775_v27 = vld [vmem:[#allocation4 + $0xc8] sm:$0xf]  ;;  %1928 = vmatpush.bf16.msra.mxu3 %v3809_v35  ;;  %v3721_v35 = vld [vmem:[#allocation4 + $0x24] sm:$0xf] }
 0x211   :  { %v992_v40 = vmul.f32 %v4524_v57, %v990_v30  ;;  %4527 = vtanh.f32 %v1085_v38  ;;  %vm997_vm9 = vweird.f32 %v4524_v57  ;;  %vm899_vm12 = vmor %vm897_vm10, %vm898_vm8  ;;  %vm1176_vm1 = vweird.f32 %v1170_v36  ;;  %v3737_v38 = vld [vmem:[#allocation4 + $0xa4] sm:$0xf] }
 0x212   :  { %v894_v41 = vsub.f32 1.0, %v893_v6  ;;  %vm998_vm13 = vmor %vm996_vm11, %vm997_vm9  ;;  %v1180_v34 = vand.u32 2147483647, %v1170_v36  ;;  %v1183_v5 = vor.u32 1.1754944e-38, %v1182_v3  ;;  %v3742_v30 = vor.u32 %v4367_v26, %v3741_v24  ;;  %v4366_v6 = vld [vmem:[#allocation4 + $0xb0] sm:$0xf0] }
 0x213   :  { %v993_v43 = vsub.f32 1.0, %v992_v40  ;;  %v3776_v31 = vor.u32 %v4375_v29, %v3775_v27  ;;  %v3771_v40 = vld [vmem:[#allocation4 + $0xa8] sm:$0xf]  ;;  %v3792_v26 = vld [vmem:[#allocation4 + $0x4c] sm:$0xf] }
 0x214   :  { %v895_v46 = vmul.f32 %v4522_v37, %v894_v41  ;;  %vm1181_vm3 = vcmp.eq.f32.partialorder %v1180_v34, 8.507059e+37  ;;  %1748 = vmatpush.bf16.msra.mxu1 %v3742_v30  ;;  %v4374_v41 = vld [vmem:[#allocation4 + $0xb4] sm:$0xf0]  ;;  %v4364_v34 = vld [vmem:[#allocation4 + $0x70] sm:$0xf0] }
 0x215   :  { %v994_v48 = vmul.f32 %v4524_v57, %v993_v43  ;;  %1847 = vmatpush.bf16.msra.mxu2 %v3776_v31  ;;  %v3738_v43 = vor.u32 %v4366_v6, %v3737_v38  ;;  %v3772_v44 = vor.u32 %v4374_v41, %v3771_v40  ;;  %v3759_v24 = vld [vmem:[#allocation4 + $0x48] sm:$0xf]  ;;  %v4379_v29 = vld [vmem:[#allocation4 + $0x58] sm:$0xf0]  ;;  %v3687_v30 = vld [vmem:[#allocation4 + $0x20] sm:$0xf] }
 0x216   :  { %v4526_v49 = vpop.eup %4525  ;;  %v896_v50 = vadd.f32 %v4522_v37, %v895_v46  ;;  %v4382_v46 = vld [vmem:[#allocation4 + $0xb8] sm:$0xf0]  ;;  %v4354_v31 = vld [vmem:[#allocation4 + $0x2c] sm:$0xf0]  ;;  %v3793_v32 = vor.u32 %v4379_v29, %v3792_v26  ;;  %v4370_v40 = vld [vmem:[#allocation4 + $0x34] sm:$0xf0] }
 0x217   :  { %v995_v52 = vadd.f32 %v4524_v57, %v994_v48  ;;  %v1172_v53 = vmul.f32 %v4526_v49, %v1170_v36  ;;  %v4528_v56 = vpop.eup %4527  ;;  %vm1177_vm0 = vweird.f32 %v4526_v49  ;;  %v3703_v36 = vld [vmem:[#allocation4 + $0xa0] sm:$0xf]  ;;  %v3805_v48 = vor.u32 %v4382_v46, %v3804_v45  ;;  %v3788_v41 = vld [vmem:[#allocation4 + $0x2c] sm:$0xf] }
 0x218   :  { %v900_v55 = vsel %vm899_vm12, %v4522_v37, %v896_v50  ;;  %vm1178_vm2 = vmor %vm1176_vm1, %vm1177_vm0  ;;  %v4358_v37 = vld [vmem:[#allocation4 + $0xac] sm:$0xf0]  ;;  %1749 = vmatpush.bf16.msra.mxu1 %v3738_v43  ;;  %v3733_v50 = vld [vmem:[#allocation4 + $0x84] sm:$0xf]  ;;  %v3688_v33 = vor.u32 %v4354_v31, %v3687_v30 }
 0x219   :  { %v905_v58 = vsel %vm902_vm14, %v904_v51, %v900_v55  ;;  %v999_v59 = vsel %vm998_vm13, %v4524_v57, %v995_v52  ;;  %v1173_v60 = vsub.f32 1.0, %v1172_v53  ;;  %v3704_v57 = vor.u32 %v4358_v37, %v3703_v36  ;;  %1848 = vmatpush.bf16.msra.mxu2 %v3772_v44  ;;  %1929 = vmatpush.bf16.msra.mxu3 %v3805_v48  ;;  %v4365_v52 = vld [vmem:[#allocation4 + $0x90] sm:$0xf0]  ;;  %v3767_v53 = vld [vmem:[#allocation4 + $0x88] sm:$0xf] }
 0x21a   :  { %v1004_v61 = vsel %vm1001_vm15, %v1003_v54, %v999_v59  ;;  %v1187_v62 = vmul.f32 %v4528_v56, %v905_v58  ;;  %v4373_v54 = vld [vmem:[#allocation4 + $0x94] sm:$0xf0]  ;;  %v3734_v55 = vor.u32 %v4365_v52, %v3733_v50  ;;  %v3800_v58 = vld [vmem:[#allocation4 + $0x8c] sm:$0xf]  ;;  %v4381_v59 = vld [vmem:[#allocation4 + $0x98] sm:$0xf0] }
 0x21b   :  { %v1186_v63 = vmul.f32 %v1004_v61, %v4690_v28  ;;  %v1174_v0 = vmul.f32 %v4526_v49, %v1173_v60  ;;  %v3711_v28 = vld [vmem:[#allocation4 + $0xe0] sm:$0xf]  ;;  %v3768_v56 = vor.u32 %v4373_v54, %v3767_v53  ;;  %v1196_v60 = vunpack.c.h.bf16 %v4706_v42  ;;  %v4380_v42 = vld [vmem:[#allocation4 + $0x78] sm:$0xf0]  ;;  %v4362_v36 = vld [vmem:[#allocation4 + $0x30] sm:$0xf0] }
 0x21c   :  { %v3712_v13 = vor.u32 %v4360_v12, %v3711_v28  ;;  %v1295_v61 = vunpack.c.l.bf16 %v4720_v47  ;;  %1750 = vmatpush.bf16.msra.mxu1 %v3734_v55  ;;  %v3796_v28 = vld [vmem:[#allocation4 + $0x6c] sm:$0xf]  ;;  %v3755_v37 = vld [vmem:[#allocation4 + $0x28] sm:$0xf]  ;;  %v3722_v6 = vor.u32 %v4362_v36, %v3721_v35  ;;  %v4378_v43 = vld [vmem:[#allocation4 + $0x38] sm:$0xf0] }
 0x21d   :  { %v4711_v1 = vadd.f32 %v1187_v62, %v1186_v63  ;;  %v1175_v2 = vadd.f32 %v4526_v49, %v1174_v0  ;;  %v3801_v62 = vor.u32 %v4381_v59, %v3800_v58  ;;  %1849 = vmatpush.bf16.msra.mxu2 %v3768_v56  ;;  %v3695_v63 = vld [vmem:[#allocation4 + $0x60] sm:$0xf]  ;;  %v4356_v0 = vld [vmem:[#allocation4 + $0x6c] sm:$0xf0]  ;;  %v3797_v14 = vor.u32 %v4380_v42, %v3796_v28  ;;  %v4361_v53 = vld [vmem:[#allocation4 + $0x10] sm:$0xf0] }
 0x21e   :  { %1648 = vmatpush.bf16.msra.mxu0 %v3712_v13  ;;  %v3696_v3 = vor.u32 %v4356_v0, %v3695_v63  ;;  %v4727_v13 = vld [vmem:[%s4812_s0 + $0x3c] sm:$0xff]   ;;  %v3756_v48 = vor.u32 %v4370_v40, %v3755_v37  ;;  %v4353_v50 = vld [vmem:[#allocation4 + $0xc] sm:$0xf0]  ;;  %v3751_v54 = vld [vmem:[#allocation4 + $0x8] sm:$0xf] }
 0x21f   :  { %4529 = vtanh.f32 %v4711_v1  ;;  %v1179_v4 = vsel %vm1178_vm2, %v4526_v49, %v1175_v2  ;;  %v4357_v49 = vld [vmem:[#allocation4 + $0x8c] sm:$0xf0]  ;;  %v3729_v2 = vld [vmem:[#allocation4 + $0x64] sm:$0xf]  ;;  %1930 = vmatpush.bf16.msra.mxu3 %v3801_v62  ;;  %v1475_v22 = vunpack.c.l.bf16 %v4727_v13  ;;  %v4369_v55 = vld [vmem:[#allocation4 + $0x14] sm:$0xf0] }
 0x220   :  { %v1184_v8 = vsel %vm1181_vm3, %v1183_v5, %v1179_v4  ;;  %v3700_v51 = vor.u32 %v4357_v49, %v3699_v11  ;;  %v3763_v4 = vld [vmem:[#allocation4 + $0x68] sm:$0xf]  ;;  %v4372_v5 = vld [vmem:[#allocation4 + $0x74] sm:$0xf0]  ;;  %v3789_v11 = vor.u32 %v4378_v43, %v3788_v41  ;;  %v3683_v49 = vld [vmem:[#allocation4] sm:$0xf]  ;;  %v3752_v62 = vor.u32 %v4369_v55, %v3751_v54 }
 0x221   :  { %v3684_v52 = vor.u32 %v4353_v50, %v3683_v49  ;;  %v3784_v59 = vld [vmem:[#allocation4 + $0xc] sm:$0xf]  ;;  %v4400_v50 = vld [vmem:[#allocation4 + $0xf0] sm:$0xf0] }
 0x222   :  { %1649 = vmatpush.bf16.msra.mxu0 %v3708_v25  ;;  %v4371_v25 = vld [vmem:[#allocation4 + $0x54] sm:$0xf0]  ;;  %v3948_v55 = vld [vmem:[#allocation4 + $0xec] sm:$0xf] }
 0x223   :  { %1931 = vmatpush.bf16.msra.mxu3 %v3797_v14  ;;  %v3760_v27 = vor.u32 %v4371_v25, %v3759_v24 }
 0x225   :  { %v4530_v7 = vpop.eup %4529 }
 0x226   :  { %v1190_v9 = vmul.f32 %v4530_v7, %v1184_v8  ;;  %1650 = vmatpush.bf16.msra.mxu0 %v3704_v57 }
 0x227   :  { %1932 = vmatpush.bf16.msra.mxu3 %v3793_v32 }
 0x228   :  { %v1191_v10 = vpack.c.bf16 %v1190_v9, %v1190_v9  ;;  %v3730_v9 = vor.u32 %v4364_v34, %v3729_v2 }
 0x22a   :  { %3543 = vst [vmem:[%s4814_s2 + $0x8] sm:$0xf] %v1191_v10  ;;  %1269 = vmatmul.bf16.vlgmr.msrb.gmra.mxu0 %v1191_v10  ;;  %1368 = vmatmul.bf16.vlgmr.msrb.gmra.mxu1 %v1191_v10 }
 0x22b   :  { %1467 = vmatmul.bf16.vlgmr.msrb.gmra.mxu2 %v1191_v10  ;;  %1548 = vmatmul.bf16.vlgmr.msrb.gmra.mxu3 %v1191_v10  ;;  %v3764_v10 = vor.u32 %v4372_v5, %v3763_v4  ;;  %v1394_v5 = vunpack.c.h.bf16 %v4720_v47 }
 0x22c   :  { %1651 = vmatpush.bf16.msra.mxu0 %v3700_v51  ;;  %1751 = vmatpush.bf16.msra.mxu1 %v3730_v9  ;;  %v3717_v51 = vld [vmem:[#allocation4 + $0x4] sm:$0xf] }
 0x22d   :  { %1850 = vmatpush.bf16.msra.mxu2 %v3764_v10  ;;  %v3718_v58 = vor.u32 %v4361_v53, %v3717_v51  ;;  %1933 = vmatpush.bf16.msra.mxu3 %v3789_v11  ;;  %v3881_v11 = vld [vmem:[#allocation4 + $0xe4] sm:$0xf]  ;;  %v3915_v51 = vld [vmem:[#allocation4 + $0xe8] sm:$0xf] }
 0x22e   :  { %v3882_v53 = vor.u32 %v4400_v50, %v3881_v11 }
 0x230   :  { %1652 = vmatpush.bf16.msra.mxu0 %v3696_v3  ;;  %1752 = vmatpush.bf16.msra.mxu1 %v3726_v23 }
 0x231   :  { %1851 = vmatpush.bf16.msra.mxu2 %v3760_v27 }
 0x234   :  { %1653 = vmatpush.bf16.msra.mxu0 %v3692_v20  ;;  %1753 = vmatpush.bf16.msra.mxu1 %v3722_v6 }
 0x235   :  { %1852 = vmatpush.bf16.msra.mxu2 %v3756_v48  ;;  %v4392_v48 = vld [vmem:[#allocation4 + $0xec] sm:$0xf0] }
 0x238   :  { %1654 = vmatpush.bf16.msra.mxu0 %v3688_v33  ;;  %1754 = vmatpush.bf16.msra.mxu1 %v3718_v58 }
 0x239   :  { %1853 = vmatpush.bf16.msra.mxu2 %v3752_v62 }
 0x23c   :  { %1655 = vmatpush.bf16.msra.mxu0 %v3684_v52  ;;  %v4408_v52 = vld [vmem:[#allocation4 + $0xf4] sm:$0xf0]  ;;  %2134 = vmatpush.bf16.msrb.mxu1 %v3882_v53  ;;  %v3861_v53 = vld [vmem:[#allocation4 + $0x44] sm:$0xf] }
 0x23d   :  { %v3916_v54 = vor.u32 %v4408_v52, %v3915_v51  ;;  %v3827_v51 = vld [vmem:[#allocation4 + $0x40] sm:$0xf]  ;;  %v4387_v52 = vld [vmem:[#allocation4 + $0x4c] sm:$0xf0] }
 0x23f   :  { %2233 = vmatpush.bf16.msrb.mxu2 %v3916_v54 }
 0x2a7   :  { %v1270_v7 = vpop.f32.mrf.mxu0  ;;  %v1369_v8 = vpop.f32.mrf.mxu1 }
 0x2a8   :  { %v1274_v12 = vadd.f32 %v1270_v7, %v1196_v60  ;;  %v1373_v39 = vadd.f32 %v1369_v8, %v1295_v61  ;;  %v4377_v60 = vld [vmem:[#allocation4 + $0x18] sm:$0xf0] }
 0x2a9   :  { %v3785_v2 = vor.u32 %v4377_v60, %v3784_v59  ;;  %v3843_v59 = vld [vmem:[#allocation4 + $0xc0] sm:$0xf]  ;;  %v4391_v60 = vld [vmem:[#allocation4 + $0xcc] sm:$0xf0] }
 0x2aa   :  { %v3577_v18 = vmul.f32 -1.442695, %v1274_v12  ;;  %v3611_v19 = vmul.f32 -1.442695, %v1373_v39  ;;  %v3844_v62 = vor.u32 %v4391_v60, %v3843_v59 }
 0x2ab   :  { %1934 = vmatpush.bf16.msra.mxu3 %v3785_v2  ;;  %v4407_v2 = vld [vmem:[#allocation4 + $0xd4] sm:$0xf0] }
 0x2ac   :  { %4531 = vpow2.f32 %v3577_v18 }
 0x2ad   :  { %4533 = vpow2.f32 %v3611_v19 }
 0x2ae   :  { %v1468_v38 = vpop.f32.mrf.mxu2  ;;  %v1549_v57 = vpop.f32.mrf.mxu3 }
 0x2af   :  { %v1553_v44 = vadd.f32 %v1549_v57, %v1475_v22  ;;  %v1272_v45 = vpop.f32.mrf.mxu0  ;;  %v1371_v46 = vpop.f32.mrf.mxu1  ;;  %v1472_v10 = vadd.f32 %v1468_v38, %v1394_v5  ;;  %v4415_v5 = vld [vmem:[#allocation4 + $0xd8] sm:$0xf0] }
 0x2b1   :  { %v3678_v56 = vmul.f32 -1.442695, %v1553_v44 }
 0x2b2   :  { %v4532_v61 = vpop.eup %4531 }
 0x2b3   :  { %v4534_v63 = vpop.eup %4533  ;;  %v1278_v0 = vadd.f32 1.0, %v4532_v61  ;;  %4535 = vpow2.f32 %v3678_v56  ;;  %v4416_v56 = vld [vmem:[#allocation4 + $0xf8] sm:$0xf0]  ;;  %v3877_v61 = vld [vmem:[#allocation4 + $0xc4] sm:$0xf] }
 0x2b4   :  { %v1377_v3 = vadd.f32 1.0, %v4534_v63  ;;  %v3949_v58 = vor.u32 %v4416_v56, %v3948_v55  ;;  %v4399_v63 = vld [vmem:[#allocation4 + $0xd0] sm:$0xf0]  ;;  %v3828_v56 = vor.u32 %v4387_v52, %v3827_v51 }
 0x2b5   :  { %4537 = vrcp.f32 %v1278_v0  ;;  %v1290_v15 = vand.u32 2147483648, %v1278_v0  ;;  %v1288_v18 = vand.u32 2147483647, %v1278_v0  ;;  %vm1284_vm6 = vweird.f32 %v1278_v0 }
 0x2b6   :  { %4539 = vrcp.f32 %v1377_v3  ;;  %v1470_v34 = vpop.f32.mrf.mxu2  ;;  %v1551_v4 = vpop.f32.mrf.mxu3  ;;  %v1389_v16 = vand.u32 2147483648, %v1377_v3  ;;  %v1387_v47 = vand.u32 2147483647, %v1377_v3  ;;  %vm1383_vm7 = vweird.f32 %v1377_v3  ;;  %2314 = vmatpush.bf16.msrb.mxu3 %v3949_v58  ;;  %v4395_v58 = vld [vmem:[#allocation4 + $0x50] sm:$0xf0] }
 0x2b7   :  { %v1291_v22 = vor.u32 1.1754944e-38, %v1290_v15  ;;  %vm1289_vm10 = vcmp.eq.f32.partialorder %v1288_v18, 8.507059e+37  ;;  %v3944_v4 = vld [vmem:[#allocation4 + $0xcc] sm:$0xf]  ;;  %v4741_v18 = vld [vmem:[%s4812_s0 + $0x44] sm:$0xff]   ;;  %v3862_v60 = vor.u32 %v4395_v58, %v3861_v53 }
 0x2b8   :  { %v1390_v25 = vor.u32 1.1754944e-38, %v1389_v16  ;;  %vm1388_vm11 = vcmp.eq.f32.partialorder %v1387_v47, 8.507059e+37  ;;  %v3940_v16 = vld [vmem:[#allocation4 + $0xac] sm:$0xf]  ;;  %v3835_v47 = vld [vmem:[#allocation4 + $0x80] sm:$0xf] }
 0x2b9   :  { %v4536_v7 = vpop.eup %4535 }
 0x2ba   :  { %v1557_v8 = vadd.f32 1.0, %v4536_v7  ;;  %v3945_v7 = vor.u32 %v4415_v5, %v3944_v4 }
 0x2bb   :  { %v4538_v9 = vpop.eup %4537 }
 0x2bc   :  { %v4540_v28 = vpop.eup %4539  ;;  %v1280_v42 = vmul.f32 %v4538_v9, %v1278_v0  ;;  %4541 = vrcp.f32 %v1557_v8  ;;  %vm1285_vm4 = vweird.f32 %v4538_v9  ;;  %v1569_v57 = vand.u32 2147483648, %v1557_v8  ;;  %v3911_v0 = vld [vmem:[#allocation4 + $0xc8] sm:$0xf]  ;;  %2315 = vmatpush.bf16.msrb.mxu3 %v3945_v7  ;;  %v3857_v7 = vld [vmem:[#allocation4 + $0x24] sm:$0xf] }
 0x2bd   :  { %v1379_v12 = vmul.f32 %v4540_v28, %v1377_v3  ;;  %4543 = vtanh.f32 %v1472_v10  ;;  %vm1384_vm5 = vweird.f32 %v4540_v28  ;;  %vm1286_vm8 = vmor %vm1284_vm6, %vm1285_vm4  ;;  %vm1563_vm13 = vweird.f32 %v1557_v8  ;;  %v3873_v10 = vld [vmem:[#allocation4 + $0xa4] sm:$0xf] }
 0x2be   :  { %v1281_v39 = vsub.f32 1.0, %v1280_v42  ;;  %vm1385_vm9 = vmor %vm1383_vm7, %vm1384_vm5  ;;  %v1567_v6 = vand.u32 2147483647, %v1557_v8  ;;  %v1570_v41 = vor.u32 1.1754944e-38, %v1569_v57  ;;  %v3878_v3 = vor.u32 %v4399_v63, %v3877_v61  ;;  %v4398_v42 = vld [vmem:[#allocation4 + $0xb0] sm:$0xf0] }
 0x2bf   :  { %v1380_v14 = vsub.f32 1.0, %v1379_v12  ;;  %v3912_v34 = vor.u32 %v4407_v2, %v3911_v0  ;;  %v3907_v12 = vld [vmem:[#allocation4 + $0xa8] sm:$0xf]  ;;  %v3928_v63 = vld [vmem:[#allocation4 + $0x4c] sm:$0xf] }
 0x2c0   :  { %v1282_v17 = vmul.f32 %v4538_v9, %v1281_v39  ;;  %vm1568_vm15 = vcmp.eq.f32.partialorder %v1567_v6, 8.507059e+37  ;;  %2135 = vmatpush.bf16.msrb.mxu1 %v3878_v3  ;;  %v4406_v39 = vld [vmem:[#allocation4 + $0xb4] sm:$0xf0]  ;;  %v4396_v6 = vld [vmem:[#allocation4 + $0x70] sm:$0xf0] }
 0x2c1   :  { %v1381_v19 = vmul.f32 %v4540_v28, %v1380_v14  ;;  %2234 = vmatpush.bf16.msrb.mxu2 %v3912_v34  ;;  %v3874_v14 = vor.u32 %v4398_v42, %v3873_v10  ;;  %v3908_v15 = vor.u32 %v4406_v39, %v3907_v12  ;;  %v3895_v61 = vld [vmem:[#allocation4 + $0x48] sm:$0xf]  ;;  %v4411_v2 = vld [vmem:[#allocation4 + $0x58] sm:$0xf0]  ;;  %v3823_v3 = vld [vmem:[#allocation4 + $0x20] sm:$0xf] }
 0x2c2   :  { %v4542_v20 = vpop.eup %4541  ;;  %v1283_v21 = vadd.f32 %v4538_v9, %v1282_v17  ;;  %v4414_v17 = vld [vmem:[#allocation4 + $0xb8] sm:$0xf0]  ;;  %v4386_v34 = vld [vmem:[#allocation4 + $0x2c] sm:$0xf0]  ;;  %v3929_v4 = vor.u32 %v4411_v2, %v3928_v63  ;;  %v4402_v12 = vld [vmem:[#allocation4 + $0x34] sm:$0xf0] }
 0x2c3   :  { %v1382_v23 = vadd.f32 %v4540_v28, %v1381_v19  ;;  %v1559_v24 = vmul.f32 %v4542_v20, %v1557_v8  ;;  %v4544_v27 = vpop.eup %4543  ;;  %vm1564_vm12 = vweird.f32 %v4542_v20  ;;  %v3839_v8 = vld [vmem:[#allocation4 + $0xa0] sm:$0xf]  ;;  %v3941_v19 = vor.u32 %v4414_v17, %v3940_v16  ;;  %v3924_v39 = vld [vmem:[#allocation4 + $0x2c] sm:$0xf] }
 0x2c4   :  { %v1287_v26 = vsel %vm1286_vm8, %v4538_v9, %v1283_v21  ;;  %vm1565_vm14 = vmor %vm1563_vm13, %vm1564_vm12  ;;  %v4390_v9 = vld [vmem:[#allocation4 + $0xac] sm:$0xf0]  ;;  %2136 = vmatpush.bf16.msrb.mxu1 %v3874_v14  ;;  %v3869_v21 = vld [vmem:[#allocation4 + $0x84] sm:$0xf]  ;;  %v3824_v5 = vor.u32 %v4386_v34, %v3823_v3 }
 0x2c5   :  { %v1292_v29 = vsel %vm1289_vm10, %v1291_v22, %v1287_v26  ;;  %v1386_v30 = vsel %vm1385_vm9, %v4540_v28, %v1382_v23  ;;  %v1560_v31 = vsub.f32 1.0, %v1559_v24  ;;  %v3840_v28 = vor.u32 %v4390_v9, %v3839_v8  ;;  %2235 = vmatpush.bf16.msrb.mxu2 %v3908_v15  ;;  %2316 = vmatpush.bf16.msrb.mxu3 %v3941_v19  ;;  %v4397_v23 = vld [vmem:[#allocation4 + $0x90] sm:$0xf0]  ;;  %v3903_v24 = vld [vmem:[#allocation4 + $0x88] sm:$0xf] }
 0x2c6   :  { %v1391_v32 = vsel %vm1388_vm11, %v1390_v25, %v1386_v30  ;;  %v1574_v33 = vmul.f32 %v4544_v27, %v1292_v29  ;;  %v4405_v25 = vld [vmem:[#allocation4 + $0x94] sm:$0xf0]  ;;  %v3870_v26 = vor.u32 %v4397_v23, %v3869_v21  ;;  %v3936_v29 = vld [vmem:[#allocation4 + $0x8c] sm:$0xf]  ;;  %v4413_v30 = vld [vmem:[#allocation4 + $0x98] sm:$0xf0] }
 0x2c7   :  { %v1573_v35 = vmul.f32 %v1391_v32, %v4711_v1  ;;  %v1561_v36 = vmul.f32 %v4542_v20, %v1560_v31  ;;  %v3847_v1 = vld [vmem:[#allocation4 + $0xe0] sm:$0xf]  ;;  %v3904_v27 = vor.u32 %v4405_v25, %v3903_v24  ;;  %v1583_v31 = vunpack.c.h.bf16 %v4727_v13  ;;  %v4412_v13 = vld [vmem:[#allocation4 + $0x78] sm:$0xf0]  ;;  %v4394_v8 = vld [vmem:[#allocation4 + $0x30] sm:$0xf0] }
 0x2c8   :  { %v3848_v49 = vor.u32 %v4392_v48, %v3847_v1  ;;  %v1682_v32 = vunpack.c.l.bf16 %v4741_v18  ;;  %2137 = vmatpush.bf16.msrb.mxu1 %v3870_v26  ;;  %v3932_v1 = vld [vmem:[#allocation4 + $0x6c] sm:$0xf]  ;;  %v3891_v9 = vld [vmem:[#allocation4 + $0x28] sm:$0xf]  ;;  %v3858_v42 = vor.u32 %v4394_v8, %v3857_v7  ;;  %v4410_v14 = vld [vmem:[#allocation4 + $0x38] sm:$0xf0] }
 0x2c9   :  { %v4732_v37 = vadd.f32 %v1574_v33, %v1573_v35  ;;  %v1562_v38 = vadd.f32 %v4542_v20, %v1561_v36  ;;  %v3937_v33 = vor.u32 %v4413_v30, %v3936_v29  ;;  %2236 = vmatpush.bf16.msrb.mxu2 %v3904_v27  ;;  %v3831_v35 = vld [vmem:[#allocation4 + $0x60] sm:$0xf]  ;;  %v4388_v36 = vld [vmem:[#allocation4 + $0x6c] sm:$0xf0]  ;;  %v3933_v50 = vor.u32 %v4412_v13, %v3932_v1  ;;  %v4393_v24 = vld [vmem:[#allocation4 + $0x10] sm:$0xf0] }
 0x2ca   :  { %2035 = vmatpush.bf16.msrb.mxu0 %v3848_v49  ;;  %v3832_v57 = vor.u32 %v4388_v36, %v3831_v35  ;;  %v4748_v49 = vld [vmem:[%s4812_s0 + $0x4c] sm:$0xff]   ;;  %v3892_v19 = vor.u32 %v4402_v12, %v3891_v9  ;;  %v3887_v25 = vld [vmem:[#allocation4 + $0x8] sm:$0xf]  ;;  %v4401_v26 = vld [vmem:[#allocation4 + $0x14] sm:$0xf0] }
 0x2cb   :  { %4545 = vtanh.f32 %v4732_v37  ;;  %v1566_v40 = vsel %vm1565_vm14, %v4542_v20, %v1562_v38  ;;  %v4389_v20 = vld [vmem:[#allocation4 + $0x8c] sm:$0xf0]  ;;  %v3865_v38 = vld [vmem:[#allocation4 + $0x64] sm:$0xf]  ;;  %2317 = vmatpush.bf16.msrb.mxu3 %v3937_v33  ;;  %v1862_v59 = vunpack.c.l.bf16 %v4748_v49  ;;  %v3920_v30 = vld [vmem:[#allocation4 + $0xc] sm:$0xf]  ;;  %v3888_v33 = vor.u32 %v4401_v26, %v3887_v25 }
 0x2cc   :  { %v1571_v44 = vsel %vm1568_vm15, %v1570_v41, %v1566_v40  ;;  %v3836_v22 = vor.u32 %v4389_v20, %v3835_v47  ;;  %v3899_v40 = vld [vmem:[#allocation4 + $0x68] sm:$0xf]  ;;  %v4404_v41 = vld [vmem:[#allocation4 + $0x74] sm:$0xf0]  ;;  %v3925_v47 = vor.u32 %v4410_v14, %v3924_v39  ;;  %v3819_v20 = vld [vmem:[#allocation4] sm:$0xf] }
 0x2cd   :  { %v4385_v21 = vld [vmem:[#allocation4 + $0xc] sm:$0xf0]  ;;  %v4084_v26 = vld [vmem:[#allocation4 + $0xec] sm:$0xf] }
 0x2ce   :  { %2036 = vmatpush.bf16.msrb.mxu0 %v3844_v62  ;;  %v4403_v62 = vld [vmem:[#allocation4 + $0x54] sm:$0xf0]  ;;  %v3820_v23 = vor.u32 %v4385_v21, %v3819_v20  ;;  %v4432_v21 = vld [vmem:[#allocation4 + $0xf0] sm:$0xf0] }
 0x2cf   :  { %2318 = vmatpush.bf16.msrb.mxu3 %v3933_v50  ;;  %v3896_v0 = vor.u32 %v4403_v62, %v3895_v61 }
 0x2d1   :  { %v4546_v43 = vpop.eup %4545 }
 0x2d2   :  { %v1577_v45 = vmul.f32 %v4546_v43, %v1571_v44  ;;  %2037 = vmatpush.bf16.msrb.mxu0 %v3840_v28 }
 0x2d3   :  { %2319 = vmatpush.bf16.msrb.mxu3 %v3929_v4 }
 0x2d4   :  { %v1578_v46 = vpack.c.bf16 %v1577_v45, %v1577_v45  ;;  %v3866_v45 = vor.u32 %v4396_v6, %v3865_v38 }
 0x2d6   :  { %3679 = vst [vmem:[%s4814_s2 + $0xc] sm:$0xf] %v1578_v46  ;;  %1656 = vmatmul.bf16.vlgmr.msra.gmra.mxu0 %v1578_v46  ;;  %1755 = vmatmul.bf16.vlgmr.msra.gmra.mxu1 %v1578_v46 }
 0x2d7   :  { %1854 = vmatmul.bf16.vlgmr.msra.gmra.mxu2 %v1578_v46  ;;  %1935 = vmatmul.bf16.vlgmr.msra.gmra.mxu3 %v1578_v46  ;;  %v3900_v46 = vor.u32 %v4404_v41, %v3899_v40  ;;  %v1781_v41 = vunpack.c.h.bf16 %v4741_v18 }
 0x2d8   :  { %2038 = vmatpush.bf16.msrb.mxu0 %v3836_v22  ;;  %2138 = vmatpush.bf16.msrb.mxu1 %v3866_v45  ;;  %v3853_v22 = vld [vmem:[#allocation4 + $0x4] sm:$0xf] }
 0x2d9   :  { %2237 = vmatpush.bf16.msrb.mxu2 %v3900_v46  ;;  %v3854_v29 = vor.u32 %v4393_v24, %v3853_v22  ;;  %2320 = vmatpush.bf16.msrb.mxu3 %v3925_v47  ;;  %v4017_v47 = vld [vmem:[#allocation4 + $0xe4] sm:$0xf]  ;;  %v4051_v22 = vld [vmem:[#allocation4 + $0xe8] sm:$0xf] }
 0x2da   :  { %v4018_v24 = vor.u32 %v4432_v21, %v4017_v47 }
 0x2dc   :  { %2039 = vmatpush.bf16.msrb.mxu0 %v3832_v57  ;;  %2139 = vmatpush.bf16.msrb.mxu1 %v3862_v60 }
 0x2dd   :  { %2238 = vmatpush.bf16.msrb.mxu2 %v3896_v0 }
 0x2e0   :  { %2040 = vmatpush.bf16.msrb.mxu0 %v3828_v56  ;;  %2140 = vmatpush.bf16.msrb.mxu1 %v3858_v42 }
 0x2e1   :  { %2239 = vmatpush.bf16.msrb.mxu2 %v3892_v19  ;;  %v4424_v19 = vld [vmem:[#allocation4 + $0xec] sm:$0xf0] }
 0x2e4   :  { %2041 = vmatpush.bf16.msrb.mxu0 %v3824_v5  ;;  %2141 = vmatpush.bf16.msrb.mxu1 %v3854_v29 }
 0x2e5   :  { %2240 = vmatpush.bf16.msrb.mxu2 %v3888_v33 }
 0x2e8   :  { %2042 = vmatpush.bf16.msrb.mxu0 %v3820_v23  ;;  %v4440_v23 = vld [vmem:[#allocation4 + $0xf4] sm:$0xf0]  ;;  %2521 = vmatpush.bf16.msra.mxu1 %v4018_v24  ;;  %v3997_v24 = vld [vmem:[#allocation4 + $0x44] sm:$0xf] }
 0x2e9   :  { %v4052_v25 = vor.u32 %v4440_v23, %v4051_v22  ;;  %v3963_v22 = vld [vmem:[#allocation4 + $0x40] sm:$0xf]  ;;  %v4419_v23 = vld [vmem:[#allocation4 + $0x4c] sm:$0xf0] }
 0x2eb   :  { %2620 = vmatpush.bf16.msra.mxu2 %v4052_v25 }
 0x353   :  { %v1657_v43 = vpop.f32.mrf.mxu0  ;;  %v1756_v44 = vpop.f32.mrf.mxu1 }
 0x354   :  { %v1661_v48 = vadd.f32 %v1657_v43, %v1583_v31  ;;  %v1760_v11 = vadd.f32 %v1756_v44, %v1682_v32  ;;  %v4409_v31 = vld [vmem:[#allocation4 + $0x18] sm:$0xf0] }
 0x355   :  { %v3921_v38 = vor.u32 %v4409_v31, %v3920_v30  ;;  %v3979_v30 = vld [vmem:[#allocation4 + $0xc0] sm:$0xf]  ;;  %v4423_v31 = vld [vmem:[#allocation4 + $0xcc] sm:$0xf0] }
 0x356   :  { %v3713_v54 = vmul.f32 -1.442695, %v1661_v48  ;;  %v3747_v55 = vmul.f32 -1.442695, %v1760_v11  ;;  %v3980_v33 = vor.u32 %v4423_v31, %v3979_v30 }
 0x357   :  { %2321 = vmatpush.bf16.msrb.mxu3 %v3921_v38  ;;  %v4439_v38 = vld [vmem:[#allocation4 + $0xd4] sm:$0xf0] }
 0x358   :  { %4547 = vpow2.f32 %v3713_v54 }
 0x359   :  { %4549 = vpow2.f32 %v3747_v55 }
 0x35a   :  { %v1855_v10 = vpop.f32.mrf.mxu2  ;;  %v1936_v28 = vpop.f32.mrf.mxu3 }
 0x35b   :  { %v1940_v15 = vadd.f32 %v1936_v28, %v1862_v59  ;;  %v1659_v16 = vpop.f32.mrf.mxu0  ;;  %v1758_v17 = vpop.f32.mrf.mxu1  ;;  %v1859_v46 = vadd.f32 %v1855_v10, %v1781_v41  ;;  %v4447_v41 = vld [vmem:[#allocation4 + $0xd8] sm:$0xf0] }
 0x35d   :  { %v3814_v27 = vmul.f32 -1.442695, %v1940_v15 }
 0x35e   :  { %v4548_v32 = vpop.eup %4547 }
 0x35f   :  { %v4550_v35 = vpop.eup %4549  ;;  %v1665_v36 = vadd.f32 1.0, %v4548_v32  ;;  %4551 = vpow2.f32 %v3814_v27  ;;  %v4448_v27 = vld [vmem:[#allocation4 + $0xf8] sm:$0xf0]  ;;  %v4013_v32 = vld [vmem:[#allocation4 + $0xc4] sm:$0xf] }
 0x360   :  { %v1764_v57 = vadd.f32 1.0, %v4550_v35  ;;  %v4085_v29 = vor.u32 %v4448_v27, %v4084_v26  ;;  %v4431_v35 = vld [vmem:[#allocation4 + $0xd0] sm:$0xf0]  ;;  %v3964_v27 = vor.u32 %v4419_v23, %v3963_v22 }
 0x361   :  { %4553 = vrcp.f32 %v1665_v36  ;;  %v1677_v51 = vand.u32 2147483648, %v1665_v36  ;;  %v1675_v54 = vand.u32 2147483647, %v1665_v36  ;;  %vm1671_vm2 = vweird.f32 %v1665_v36 }
 0x362   :  { %4555 = vrcp.f32 %v1764_v57  ;;  %v1857_v6 = vpop.f32.mrf.mxu2  ;;  %v1938_v40 = vpop.f32.mrf.mxu3  ;;  %v1776_v52 = vand.u32 2147483648, %v1764_v57  ;;  %v1774_v18 = vand.u32 2147483647, %v1764_v57  ;;  %vm1770_vm3 = vweird.f32 %v1764_v57  ;;  %2701 = vmatpush.bf16.msra.mxu3 %v4085_v29  ;;  %v4427_v29 = vld [vmem:[#allocation4 + $0x50] sm:$0xf0] }
 0x363   :  { %v1678_v59 = vor.u32 1.1754944e-38, %v1677_v51  ;;  %vm1676_vm6 = vcmp.eq.f32.partialorder %v1675_v54, 8.507059e+37  ;;  %v4080_v40 = vld [vmem:[#allocation4 + $0xcc] sm:$0xf]  ;;  %v4762_v54 = vld [vmem:[%s4812_s0 + $0x54] sm:$0xff]   ;;  %v3998_v31 = vor.u32 %v4427_v29, %v3997_v24 }
 0x364   :  { %v1777_v62 = vor.u32 1.1754944e-38, %v1776_v52  ;;  %vm1775_vm7 = vcmp.eq.f32.partialorder %v1774_v18, 8.507059e+37  ;;  %v4076_v52 = vld [vmem:[#allocation4 + $0xac] sm:$0xf]  ;;  %v3971_v18 = vld [vmem:[#allocation4 + $0x80] sm:$0xf] }
 0x365   :  { %v4552_v43 = vpop.eup %4551 }
 0x366   :  { %v1944_v44 = vadd.f32 1.0, %v4552_v43  ;;  %v4081_v43 = vor.u32 %v4447_v41, %v4080_v40 }
 0x367   :  { %v4554_v45 = vpop.eup %4553 }
 0x368   :  { %v4556_v1 = vpop.eup %4555  ;;  %v1667_v13 = vmul.f32 %v4554_v45, %v1665_v36  ;;  %4557 = vrcp.f32 %v1944_v44  ;;  %vm1672_vm0 = vweird.f32 %v4554_v45  ;;  %v1956_v28 = vand.u32 2147483648, %v1944_v44  ;;  %v4047_v36 = vld [vmem:[#allocation4 + $0xc8] sm:$0xf]  ;;  %2702 = vmatpush.bf16.msra.mxu3 %v4081_v43  ;;  %v3993_v43 = vld [vmem:[#allocation4 + $0x24] sm:$0xf] }
 0x369   :  { %v1766_v48 = vmul.f32 %v4556_v1, %v1764_v57  ;;  %4559 = vtanh.f32 %v1859_v46  ;;  %vm1771_vm1 = vweird.f32 %v4556_v1  ;;  %vm1673_vm4 = vmor %vm1671_vm2, %vm1672_vm0  ;;  %vm1950_vm9 = vweird.f32 %v1944_v44  ;;  %v4009_v46 = vld [vmem:[#allocation4 + $0xa4] sm:$0xf] }
 0x36a   :  { %v1668_v11 = vsub.f32 1.0, %v1667_v13  ;;  %vm1772_vm5 = vmor %vm1770_vm3, %vm1771_vm1  ;;  %v1954_v42 = vand.u32 2147483647, %v1944_v44  ;;  %v1957_v39 = vor.u32 1.1754944e-38, %v1956_v28  ;;  %v4014_v57 = vor.u32 %v4431_v35, %v4013_v32  ;;  %v4430_v13 = vld [vmem:[#allocation4 + $0xb0] sm:$0xf0] }
 0x36b   :  { %v1767_v50 = vsub.f32 1.0, %v1766_v48  ;;  %v4048_v6 = vor.u32 %v4439_v38, %v4047_v36  ;;  %v4043_v48 = vld [vmem:[#allocation4 + $0xa8] sm:$0xf]  ;;  %v4064_v35 = vld [vmem:[#allocation4 + $0x4c] sm:$0xf] }
 0x36c   :  { %v1669_v53 = vmul.f32 %v4554_v45, %v1668_v11  ;;  %vm1955_vm11 = vcmp.eq.f32.partialorder %v1954_v42, 8.507059e+37  ;;  %2522 = vmatpush.bf16.msra.mxu1 %v4014_v57  ;;  %v4438_v11 = vld [vmem:[#allocation4 + $0xb4] sm:$0xf0]  ;;  %v4428_v42 = vld [vmem:[#allocation4 + $0x70] sm:$0xf0] }
 0x36d   :  { %v1768_v55 = vmul.f32 %v4556_v1, %v1767_v50  ;;  %2621 = vmatpush.bf16.msra.mxu2 %v4048_v6  ;;  %v4010_v50 = vor.u32 %v4430_v13, %v4009_v46  ;;  %v4044_v51 = vor.u32 %v4438_v11, %v4043_v48  ;;  %v4031_v32 = vld [vmem:[#allocation4 + $0x48] sm:$0xf]  ;;  %v4443_v38 = vld [vmem:[#allocation4 + $0x58] sm:$0xf0]  ;;  %v3959_v57 = vld [vmem:[#allocation4 + $0x20] sm:$0xf] }
 0x36e   :  { %v4558_v56 = vpop.eup %4557  ;;  %v1670_v58 = vadd.f32 %v4554_v45, %v1669_v53  ;;  %v4446_v53 = vld [vmem:[#allocation4 + $0xb8] sm:$0xf0]  ;;  %v4418_v6 = vld [vmem:[#allocation4 + $0x2c] sm:$0xf0]  ;;  %v4065_v40 = vor.u32 %v4443_v38, %v4064_v35  ;;  %v4434_v48 = vld [vmem:[#allocation4 + $0x34] sm:$0xf0] }
 0x36f   :  { %v1769_v60 = vadd.f32 %v4556_v1, %v1768_v55  ;;  %v1946_v61 = vmul.f32 %v4558_v56, %v1944_v44  ;;  %v4560_v0 = vpop.eup %4559  ;;  %vm1951_vm8 = vweird.f32 %v4558_v56  ;;  %v3975_v44 = vld [vmem:[#allocation4 + $0xa0] sm:$0xf]  ;;  %v4077_v55 = vor.u32 %v4446_v53, %v4076_v52  ;;  %v4060_v11 = vld [vmem:[#allocation4 + $0x2c] sm:$0xf] }
 0x370   :  { %v1674_v63 = vsel %vm1673_vm4, %v4554_v45, %v1670_v58  ;;  %vm1952_vm10 = vmor %vm1950_vm9, %vm1951_vm8  ;;  %v4422_v45 = vld [vmem:[#allocation4 + $0xac] sm:$0xf0]  ;;  %2523 = vmatpush.bf16.msra.mxu1 %v4010_v50  ;;  %v4005_v58 = vld [vmem:[#allocation4 + $0x84] sm:$0xf]  ;;  %v3960_v41 = vor.u32 %v4418_v6, %v3959_v57 }
 0x371   :  { %v1679_v2 = vsel %vm1676_vm6, %v1678_v59, %v1674_v63  ;;  %v1773_v3 = vsel %vm1772_vm5, %v4556_v1, %v1769_v60  ;;  %v1947_v34 = vsub.f32 1.0, %v1946_v61  ;;  %v3976_v1 = vor.u32 %v4422_v45, %v3975_v44  ;;  %2622 = vmatpush.bf16.msra.mxu2 %v4044_v51  ;;  %2703 = vmatpush.bf16.msra.mxu3 %v4077_v55  ;;  %v4429_v60 = vld [vmem:[#allocation4 + $0x90] sm:$0xf0]  ;;  %v4039_v61 = vld [vmem:[#allocation4 + $0x88] sm:$0xf] }
 0x372   :  { %v1778_v4 = vsel %vm1775_vm7, %v1777_v62, %v1773_v3  ;;  %v1961_v5 = vmul.f32 %v4560_v0, %v1679_v2  ;;  %v4437_v62 = vld [vmem:[#allocation4 + $0x94] sm:$0xf0]  ;;  %v4006_v63 = vor.u32 %v4429_v60, %v4005_v58  ;;  %v4072_v2 = vld [vmem:[#allocation4 + $0x8c] sm:$0xf]  ;;  %v4445_v3 = vld [vmem:[#allocation4 + $0x98] sm:$0xf0] }
 0x373   :  { %v1960_v7 = vmul.f32 %v1778_v4, %v4732_v37  ;;  %v1948_v8 = vmul.f32 %v4558_v56, %v1947_v34  ;;  %v3983_v37 = vld [vmem:[#allocation4 + $0xe0] sm:$0xf]  ;;  %v4040_v0 = vor.u32 %v4437_v62, %v4039_v61  ;;  %v1970_v34 = vunpack.c.h.bf16 %v4748_v49  ;;  %v4444_v49 = vld [vmem:[#allocation4 + $0x78] sm:$0xf0]  ;;  %v4426_v44 = vld [vmem:[#allocation4 + $0x30] sm:$0xf0] }
 0x374   :  { %v3984_v20 = vor.u32 %v4424_v19, %v3983_v37  ;;  %v2069_v4 = vunpack.c.l.bf16 %v4762_v54  ;;  %2524 = vmatpush.bf16.msra.mxu1 %v4006_v63  ;;  %v4068_v37 = vld [vmem:[#allocation4 + $0x6c] sm:$0xf]  ;;  %v4027_v45 = vld [vmem:[#allocation4 + $0x28] sm:$0xf]  ;;  %v3994_v13 = vor.u32 %v4426_v44, %v3993_v43  ;;  %v4442_v50 = vld [vmem:[#allocation4 + $0x38] sm:$0xf0] }
 0x375   :  { %v4753_v9 = vadd.f32 %v1961_v5, %v1960_v7  ;;  %v1949_v10 = vadd.f32 %v4558_v56, %v1948_v8  ;;  %v4073_v5 = vor.u32 %v4445_v3, %v4072_v2  ;;  %2623 = vmatpush.bf16.msra.mxu2 %v4040_v0  ;;  %v3967_v7 = vld [vmem:[#allocation4 + $0x60] sm:$0xf]  ;;  %v4420_v8 = vld [vmem:[#allocation4 + $0x6c] sm:$0xf0]  ;;  %v4069_v21 = vor.u32 %v4444_v49, %v4068_v37  ;;  %v4425_v61 = vld [vmem:[#allocation4 + $0x10] sm:$0xf0] }
 0x376   :  { %2422 = vmatpush.bf16.msra.mxu0 %v3984_v20  ;;  %v3968_v28 = vor.u32 %v4420_v8, %v3967_v7  ;;  %v4769_v20 = vld [vmem:[%s4812_s0 + $0x5c] sm:$0xff]   ;;  %v4028_v55 = vor.u32 %v4434_v48, %v4027_v45  ;;  %v4417_v58 = vld [vmem:[#allocation4 + $0xc] sm:$0xf0]  ;;  %v4023_v62 = vld [vmem:[#allocation4 + $0x8] sm:$0xf] }
 0x377   :  { %4561 = vtanh.f32 %v4753_v9  ;;  %v1953_v12 = vsel %vm1952_vm10, %v4558_v56, %v1949_v10  ;;  %v4421_v56 = vld [vmem:[#allocation4 + $0x8c] sm:$0xf0]  ;;  %v4001_v10 = vld [vmem:[#allocation4 + $0x64] sm:$0xf]  ;;  %2704 = vmatpush.bf16.msra.mxu3 %v4073_v5  ;;  %v2249_v30 = vunpack.c.l.bf16 %v4769_v20  ;;  %v4433_v63 = vld [vmem:[#allocation4 + $0x14] sm:$0xf0] }
 0x378   :  { %v1958_v15 = vsel %vm1955_vm11, %v1957_v39, %v1953_v12  ;;  %v3972_v59 = vor.u32 %v4421_v56, %v3971_v18  ;;  %v4035_v12 = vld [vmem:[#allocation4 + $0x68] sm:$0xf]  ;;  %v4436_v39 = vld [vmem:[#allocation4 + $0x74] sm:$0xf0]  ;;  %v4061_v18 = vor.u32 %v4442_v50, %v4060_v11  ;;  %v3955_v56 = vld [vmem:[#allocation4] sm:$0xf]  ;;  %v4024_v5 = vor.u32 %v4433_v63, %v4023_v62 }
 0x379   :  { %v3956_v60 = vor.u32 %v4417_v58, %v3955_v56  ;;  %v4056_v3 = vld [vmem:[#allocation4 + $0xc] sm:$0xf]  ;;  %v4464_v58 = vld [vmem:[#allocation4 + $0xf0] sm:$0xf0] }
 0x37a   :  { %2423 = vmatpush.bf16.msra.mxu0 %v3980_v33  ;;  %v4435_v33 = vld [vmem:[#allocation4 + $0x54] sm:$0xf0]  ;;  %v4220_v63 = vld [vmem:[#allocation4 + $0xec] sm:$0xf] }
 0x37b   :  { %2705 = vmatpush.bf16.msra.mxu3 %v4069_v21  ;;  %v4032_v36 = vor.u32 %v4435_v33, %v4031_v32 }
 0x37d   :  { %v4562_v14 = vpop.eup %4561 }
 0x37e   :  { %v1964_v16 = vmul.f32 %v4562_v14, %v1958_v15  ;;  %2424 = vmatpush.bf16.msra.mxu0 %v3976_v1 }
 0x37f   :  { %2706 = vmatpush.bf16.msra.mxu3 %v4065_v40 }
 0x380   :  { %v1965_v17 = vpack.c.bf16 %v1964_v16, %v1964_v16  ;;  %v4002_v16 = vor.u32 %v4428_v42, %v4001_v10 }
 0x382   :  { %3815 = vst [vmem:[%s4814_s2 + $0x10] sm:$0xf] %v1965_v17  ;;  %2043 = vmatmul.bf16.vlgmr.msrb.gmra.mxu0 %v1965_v17  ;;  %2142 = vmatmul.bf16.vlgmr.msrb.gmra.mxu1 %v1965_v17 }
 0x383   :  { %2241 = vmatmul.bf16.vlgmr.msrb.gmra.mxu2 %v1965_v17  ;;  %2322 = vmatmul.bf16.vlgmr.msrb.gmra.mxu3 %v1965_v17  ;;  %v4036_v17 = vor.u32 %v4436_v39, %v4035_v12  ;;  %v2168_v39 = vunpack.c.h.bf16 %v4762_v54 }
 0x384   :  { %2425 = vmatpush.bf16.msra.mxu0 %v3972_v59  ;;  %2525 = vmatpush.bf16.msra.mxu1 %v4002_v16  ;;  %v3989_v59 = vld [vmem:[#allocation4 + $0x4] sm:$0xf] }
 0x385   :  { %2624 = vmatpush.bf16.msra.mxu2 %v4036_v17  ;;  %v3990_v2 = vor.u32 %v4425_v61, %v3989_v59  ;;  %2707 = vmatpush.bf16.msra.mxu3 %v4061_v18  ;;  %v4153_v18 = vld [vmem:[#allocation4 + $0xe4] sm:$0xf]  ;;  %v4187_v59 = vld [vmem:[#allocation4 + $0xe8] sm:$0xf] }
 0x386   :  { %v4154_v61 = vor.u32 %v4464_v58, %v4153_v18 }
 0x388   :  { %2426 = vmatpush.bf16.msra.mxu0 %v3968_v28  ;;  %2526 = vmatpush.bf16.msra.mxu1 %v3998_v31 }
 0x389   :  { %2625 = vmatpush.bf16.msra.mxu2 %v4032_v36 }
 0x38c   :  { %2427 = vmatpush.bf16.msra.mxu0 %v3964_v27  ;;  %2527 = vmatpush.bf16.msra.mxu1 %v3994_v13 }
 0x38d   :  { %2626 = vmatpush.bf16.msra.mxu2 %v4028_v55  ;;  %v4456_v55 = vld [vmem:[#allocation4 + $0xec] sm:$0xf0] }
 0x390   :  { %2428 = vmatpush.bf16.msra.mxu0 %v3960_v41  ;;  %2528 = vmatpush.bf16.msra.mxu1 %v3990_v2 }
 0x391   :  { %2627 = vmatpush.bf16.msra.mxu2 %v4024_v5 }
 0x394   :  { %2429 = vmatpush.bf16.msra.mxu0 %v3956_v60  ;;  %v4472_v60 = vld [vmem:[#allocation4 + $0xf4] sm:$0xf0]  ;;  %2908 = vmatpush.bf16.msrb.mxu1 %v4154_v61  ;;  %v4133_v61 = vld [vmem:[#allocation4 + $0x44] sm:$0xf] }
 0x395   :  { %v4188_v62 = vor.u32 %v4472_v60, %v4187_v59  ;;  %v4099_v59 = vld [vmem:[#allocation4 + $0x40] sm:$0xf]  ;;  %v4451_v60 = vld [vmem:[#allocation4 + $0x4c] sm:$0xf0] }
 0x397   :  { %3007 = vmatpush.bf16.msrb.mxu2 %v4188_v62 }
 0x3ff   :  { %v2044_v14 = vpop.f32.mrf.mxu0  ;;  %v2143_v15 = vpop.f32.mrf.mxu1 }
 0x400   :  { %v2048_v19 = vadd.f32 %v2044_v14, %v1970_v34  ;;  %v2147_v47 = vadd.f32 %v2143_v15, %v2069_v4  ;;  %v4441_v34 = vld [vmem:[#allocation4 + $0x18] sm:$0xf0] }
 0x401   :  { %v4057_v10 = vor.u32 %v4441_v34, %v4056_v3  ;;  %v4115_v3 = vld [vmem:[#allocation4 + $0xc0] sm:$0xf]  ;;  %v4455_v34 = vld [vmem:[#allocation4 + $0xcc] sm:$0xf0] }
 0x402   :  { %v3849_v25 = vmul.f32 -1.442695, %v2048_v19  ;;  %v3883_v26 = vmul.f32 -1.442695, %v2147_v47  ;;  %v4116_v5 = vor.u32 %v4455_v34, %v4115_v3 }
 0x403   :  { %2708 = vmatpush.bf16.msra.mxu3 %v4057_v10  ;;  %v4471_v10 = vld [vmem:[#allocation4 + $0xd4] sm:$0xf0] }
 0x404   :  { %4563 = vpow2.f32 %v3849_v25 }
 0x405   :  { %4565 = vpow2.f32 %v3883_v26 }
 0x406   :  { %v2242_v46 = vpop.f32.mrf.mxu2  ;;  %v2323_v1 = vpop.f32.mrf.mxu3 }
 0x407   :  { %v2327_v51 = vadd.f32 %v2323_v1, %v2249_v30  ;;  %v2046_v52 = vpop.f32.mrf.mxu0  ;;  %v2145_v53 = vpop.f32.mrf.mxu1  ;;  %v2246_v17 = vadd.f32 %v2242_v46, %v2168_v39  ;;  %v4479_v39 = vld [vmem:[#allocation4 + $0xd8] sm:$0xf0] }
 0x409   :  { %v3950_v0 = vmul.f32 -1.442695, %v2327_v51 }
 0x40a   :  { %v4564_v4 = vpop.eup %4563 }
 0x40b   :  { %v4566_v7 = vpop.eup %4565  ;;  %v2052_v8 = vadd.f32 1.0, %v4564_v4  ;;  %4567 = vpow2.f32 %v3950_v0  ;;  %v4480_v0 = vld [vmem:[#allocation4 + $0xf8] sm:$0xf0]  ;;  %v4149_v4 = vld [vmem:[#allocation4 + $0xc4] sm:$0xf] }
 0x40c   :  { %v2151_v28 = vadd.f32 1.0, %v4566_v7  ;;  %v4221_v2 = vor.u32 %v4480_v0, %v4220_v63  ;;  %v4463_v7 = vld [vmem:[#allocation4 + $0xd0] sm:$0xf0]  ;;  %v4100_v0 = vor.u32 %v4451_v60, %v4099_v59 }
 0x40d   :  { %4569 = vrcp.f32 %v2052_v8  ;;  %v2064_v22 = vand.u32 2147483648, %v2052_v8  ;;  %v2062_v25 = vand.u32 2147483647, %v2052_v8  ;;  %vm2058_vm14 = vweird.f32 %v2052_v8 }
 0x40e   :  { %4571 = vrcp.f32 %v2151_v28  ;;  %v2244_v42 = vpop.f32.mrf.mxu2  ;;  %v2325_v12 = vpop.f32.mrf.mxu3  ;;  %v2163_v23 = vand.u32 2147483648, %v2151_v28  ;;  %v2161_v54 = vand.u32 2147483647, %v2151_v28  ;;  %vm2157_vm15 = vweird.f32 %v2151_v28  ;;  %3088 = vmatpush.bf16.msrb.mxu3 %v4221_v2  ;;  %v4459_v2 = vld [vmem:[#allocation4 + $0x50] sm:$0xf0] }
 0x40f   :  { %v2065_v30 = vor.u32 1.1754944e-38, %v2064_v22  ;;  %vm2063_vm2 = vcmp.eq.f32.partialorder %v2062_v25, 8.507059e+37  ;;  %v4216_v12 = vld [vmem:[#allocation4 + $0xcc] sm:$0xf]  ;;  %v4783_v25 = vld [vmem:[%s4812_s0 + $0x64] sm:$0xff]   ;;  %v4134_v34 = vor.u32 %v4459_v2, %v4133_v61 }
 0x410   :  { %v2164_v33 = vor.u32 1.1754944e-38, %v2163_v23  ;;  %vm2162_vm3 = vcmp.eq.f32.partialorder %v2161_v54, 8.507059e+37  ;;  %v4212_v23 = vld [vmem:[#allocation4 + $0xac] sm:$0xf]  ;;  %v4107_v54 = vld [vmem:[#allocation4 + $0x80] sm:$0xf] }
 0x411   :  { %v4568_v14 = vpop.eup %4567 }
 0x412   :  { %v2331_v15 = vadd.f32 1.0, %v4568_v14  ;;  %v4217_v14 = vor.u32 %v4479_v39, %v4216_v12 }
 0x413   :  { %v4570_v16 = vpop.eup %4569 }
 0x414   :  { %v4572_v37 = vpop.eup %4571  ;;  %v2054_v49 = vmul.f32 %v4570_v16, %v2052_v8  ;;  %4573 = vrcp.f32 %v2331_v15  ;;  %vm2059_vm12 = vweird.f32 %v4570_v16  ;;  %v2343_v1 = vand.u32 2147483648, %v2331_v15  ;;  %v4183_v8 = vld [vmem:[#allocation4 + $0xc8] sm:$0xf]  ;;  %3089 = vmatpush.bf16.msrb.mxu3 %v4217_v14  ;;  %v4129_v14 = vld [vmem:[#allocation4 + $0x24] sm:$0xf] }
 0x415   :  { %v2153_v19 = vmul.f32 %v4572_v37, %v2151_v28  ;;  %4575 = vtanh.f32 %v2246_v17  ;;  %vm2158_vm13 = vweird.f32 %v4572_v37  ;;  %vm2060_vm0 = vmor %vm2058_vm14, %vm2059_vm12  ;;  %vm2337_vm5 = vweird.f32 %v2331_v15  ;;  %v4145_v17 = vld [vmem:[#allocation4 + $0xa4] sm:$0xf] }
 0x416   :  { %v2055_v47 = vsub.f32 1.0, %v2054_v49  ;;  %vm2159_vm1 = vmor %vm2157_vm15, %vm2158_vm13  ;;  %v2341_v13 = vand.u32 2147483647, %v2331_v15  ;;  %v2344_v11 = vor.u32 1.1754944e-38, %v2343_v1  ;;  %v4150_v28 = vor.u32 %v4463_v7, %v4149_v4  ;;  %v4462_v49 = vld [vmem:[#allocation4 + $0xb0] sm:$0xf0] }
 0x417   :  { %v2154_v21 = vsub.f32 1.0, %v2153_v19  ;;  %v4184_v42 = vor.u32 %v4471_v10, %v4183_v8  ;;  %v4179_v19 = vld [vmem:[#allocation4 + $0xa8] sm:$0xf]  ;;  %v4200_v7 = vld [vmem:[#allocation4 + $0x4c] sm:$0xf] }
 0x418   :  { %v2056_v24 = vmul.f32 %v4570_v16, %v2055_v47  ;;  %vm2342_vm7 = vcmp.eq.f32.partialorder %v2341_v13, 8.507059e+37  ;;  %2909 = vmatpush.bf16.msrb.mxu1 %v4150_v28  ;;  %v4470_v47 = vld [vmem:[#allocation4 + $0xb4] sm:$0xf0]  ;;  %v4460_v13 = vld [vmem:[#allocation4 + $0x70] sm:$0xf0] }
 0x419   :  { %v2155_v26 = vmul.f32 %v4572_v37, %v2154_v21  ;;  %3008 = vmatpush.bf16.msrb.mxu2 %v4184_v42  ;;  %v4146_v21 = vor.u32 %v4462_v49, %v4145_v17  ;;  %v4180_v22 = vor.u32 %v4470_v47, %v4179_v19  ;;  %v4167_v4 = vld [vmem:[#allocation4 + $0x48] sm:$0xf]  ;;  %v4475_v10 = vld [vmem:[#allocation4 + $0x58] sm:$0xf0]  ;;  %v4095_v28 = vld [vmem:[#allocation4 + $0x20] sm:$0xf] }
 0x41a   :  { %v4574_v27 = vpop.eup %4573  ;;  %v2057_v29 = vadd.f32 %v4570_v16, %v2056_v24  ;;  %v4478_v24 = vld [vmem:[#allocation4 + $0xb8] sm:$0xf0]  ;;  %v4450_v42 = vld [vmem:[#allocation4 + $0x2c] sm:$0xf0]  ;;  %v4201_v12 = vor.u32 %v4475_v10, %v4200_v7  ;;  %v4466_v19 = vld [vmem:[#allocation4 + $0x34] sm:$0xf0] }
 0x41b   :  { %v2156_v31 = vadd.f32 %v4572_v37, %v2155_v26  ;;  %v2333_v32 = vmul.f32 %v4574_v27, %v2331_v15  ;;  %v4576_v36 = vpop.eup %4575  ;;  %vm2338_vm4 = vweird.f32 %v4574_v27  ;;  %v4111_v15 = vld [vmem:[#allocation4 + $0xa0] sm:$0xf]  ;;  %v4213_v26 = vor.u32 %v4478_v24, %v4212_v23  ;;  %v4196_v47 = vld [vmem:[#allocation4 + $0x2c] sm:$0xf] }
 0x41c   :  { %v2061_v35 = vsel %vm2060_vm0, %v4570_v16, %v2057_v29  ;;  %vm2339_vm6 = vmor %vm2337_vm5, %vm2338_vm4  ;;  %v4454_v16 = vld [vmem:[#allocation4 + $0xac] sm:$0xf0]  ;;  %2910 = vmatpush.bf16.msrb.mxu1 %v4146_v21  ;;  %v4141_v29 = vld [vmem:[#allocation4 + $0x84] sm:$0xf]  ;;  %v4096_v39 = vor.u32 %v4450_v42, %v4095_v28 }
 0x41d   :  { %v2066_v38 = vsel %vm2063_vm2, %v2065_v30, %v2061_v35  ;;  %v2160_v57 = vsel %vm2159_vm1, %v4572_v37, %v2156_v31  ;;  %v2334_v6 = vsub.f32 1.0, %v2333_v32  ;;  %v4112_v37 = vor.u32 %v4454_v16, %v4111_v15  ;;  %3009 = vmatpush.bf16.msrb.mxu2 %v4180_v22  ;;  %3090 = vmatpush.bf16.msrb.mxu3 %v4213_v26  ;;  %v4461_v31 = vld [vmem:[#allocation4 + $0x90] sm:$0xf0]  ;;  %v4175_v32 = vld [vmem:[#allocation4 + $0x88] sm:$0xf] }
 0x41e   :  { %v2165_v40 = vsel %vm2162_vm3, %v2164_v33, %v2160_v57  ;;  %v2348_v41 = vmul.f32 %v4576_v36, %v2066_v38  ;;  %v4469_v33 = vld [vmem:[#allocation4 + $0x94] sm:$0xf0]  ;;  %v4142_v35 = vor.u32 %v4461_v31, %v4141_v29  ;;  %v4208_v38 = vld [vmem:[#allocation4 + $0x8c] sm:$0xf]  ;;  %v4477_v57 = vld [vmem:[#allocation4 + $0x98] sm:$0xf0] }
 0x41f   :  { %v2347_v43 = vmul.f32 %v2165_v40, %v4753_v9  ;;  %v2335_v44 = vmul.f32 %v4574_v27, %v2334_v6  ;;  %v4119_v9 = vld [vmem:[#allocation4 + $0xe0] sm:$0xf]  ;;  %v4176_v36 = vor.u32 %v4469_v33, %v4175_v32  ;;  %v2357_v6 = vunpack.c.h.bf16 %v4769_v20  ;;  %v4476_v20 = vld [vmem:[#allocation4 + $0x78] sm:$0xf0]  ;;  %v4458_v15 = vld [vmem:[#allocation4 + $0x30] sm:$0xf0] }
 0x420   :  { %v4120_v56 = vor.u32 %v4456_v55, %v4119_v9  ;;  %v2456_v40 = vunpack.c.l.bf16 %v4783_v25  ;;  %2911 = vmatpush.bf16.msrb.mxu1 %v4142_v35  ;;  %v4204_v9 = vld [vmem:[#allocation4 + $0x6c] sm:$0xf]  ;;  %v4163_v16 = vld [vmem:[#allocation4 + $0x28] sm:$0xf]  ;;  %v4130_v49 = vor.u32 %v4458_v15, %v4129_v14  ;;  %v4474_v21 = vld [vmem:[#allocation4 + $0x38] sm:$0xf0] }
 0x421   :  { %v4774_v45 = vadd.f32 %v2348_v41, %v2347_v43  ;;  %v2336_v46 = vadd.f32 %v4574_v27, %v2335_v44  ;;  %v4209_v41 = vor.u32 %v4477_v57, %v4208_v38  ;;  %3010 = vmatpush.bf16.msrb.mxu2 %v4176_v36  ;;  %v4103_v43 = vld [vmem:[#allocation4 + $0x60] sm:$0xf]  ;;  %v4452_v44 = vld [vmem:[#allocation4 + $0x6c] sm:$0xf0]  ;;  %v4205_v58 = vor.u32 %v4476_v20, %v4204_v9  ;;  %v4457_v32 = vld [vmem:[#allocation4 + $0x10] sm:$0xf0] }
 0x422   :  { %2809 = vmatpush.bf16.msrb.mxu0 %v4120_v56  ;;  %v4104_v1 = vor.u32 %v4452_v44, %v4103_v43  ;;  %v4790_v56 = vld [vmem:[%s4812_s0 + $0x6c] sm:$0xff]   ;;  %v4164_v26 = vor.u32 %v4466_v19, %v4163_v16  ;;  %v4159_v33 = vld [vmem:[#allocation4 + $0x8] sm:$0xf]  ;;  %v4465_v35 = vld [vmem:[#allocation4 + $0x14] sm:$0xf0] }
 0x423   :  { %4577 = vtanh.f32 %v4774_v45  ;;  %v2340_v48 = vsel %vm2339_vm6, %v4574_v27, %v2336_v46  ;;  %v4453_v27 = vld [vmem:[#allocation4 + $0x8c] sm:$0xf0]  ;;  %v4137_v46 = vld [vmem:[#allocation4 + $0x64] sm:$0xf]  ;;  %3091 = vmatpush.bf16.msrb.mxu3 %v4209_v41  ;;  %v2636_v3 = vunpack.c.l.bf16 %v4790_v56  ;;  %v4192_v57 = vld [vmem:[#allocation4 + $0xc] sm:$0xf]  ;;  %v4160_v41 = vor.u32 %v4465_v35, %v4159_v33 }
 0x424   :  { %v2345_v51 = vsel %vm2342_vm7, %v2344_v11, %v2340_v48  ;;  %v4108_v30 = vor.u32 %v4453_v27, %v4107_v54  ;;  %v4171_v48 = vld [vmem:[#allocation4 + $0x68] sm:$0xf]  ;;  %v4468_v11 = vld [vmem:[#allocation4 + $0x74] sm:$0xf0]  ;;  %v4197_v54 = vor.u32 %v4474_v21, %v4196_v47  ;;  %v4091_v27 = vld [vmem:[#allocation4] sm:$0xf] }
 0x425   :  { %v4449_v29 = vld [vmem:[#allocation4 + $0xc] sm:$0xf0] }
 0x426   :  { %2810 = vmatpush.bf16.msrb.mxu0 %v4116_v5  ;;  %v4467_v5 = vld [vmem:[#allocation4 + $0x54] sm:$0xf0]  ;;  %v4092_v31 = vor.u32 %v4449_v29, %v4091_v27 }
 0x427   :  { %3092 = vmatpush.bf16.msrb.mxu3 %v4205_v58  ;;  %v4168_v8 = vor.u32 %v4467_v5, %v4167_v4 }
 0x429   :  { %v4578_v50 = vpop.eup %4577 }
 0x42a   :  { %v2351_v52 = vmul.f32 %v4578_v50, %v2345_v51  ;;  %2811 = vmatpush.bf16.msrb.mxu0 %v4112_v37 }
 0x42b   :  { %3093 = vmatpush.bf16.msrb.mxu3 %v4201_v12 }
 0x42c   :  { %v2352_v53 = vpack.c.bf16 %v2351_v52, %v2351_v52  ;;  %v4138_v52 = vor.u32 %v4460_v13, %v4137_v46 }
 0x42e   :  { %3951 = vst [vmem:[%s4814_s2 + $0x14] sm:$0xf] %v2352_v53  ;;  %2430 = vmatmul.bf16.vlgmr.msra.gmra.mxu0 %v2352_v53  ;;  %2529 = vmatmul.bf16.vlgmr.msra.gmra.mxu1 %v2352_v53 }
 0x42f   :  { %2628 = vmatmul.bf16.vlgmr.msra.gmra.mxu2 %v2352_v53  ;;  %2709 = vmatmul.bf16.vlgmr.msra.gmra.mxu3 %v2352_v53  ;;  %v4172_v53 = vor.u32 %v4468_v11, %v4171_v48  ;;  %v2555_v11 = vunpack.c.h.bf16 %v4783_v25 }
 0x430   :  { %2812 = vmatpush.bf16.msrb.mxu0 %v4108_v30  ;;  %2912 = vmatpush.bf16.msrb.mxu1 %v4138_v52  ;;  %v4125_v30 = vld [vmem:[#allocation4 + $0x4] sm:$0xf] }
 0x431   :  { %3011 = vmatpush.bf16.msrb.mxu2 %v4172_v53  ;;  %v4126_v38 = vor.u32 %v4457_v32, %v4125_v30  ;;  %3094 = vmatpush.bf16.msrb.mxu3 %v4197_v54  ;;  %v4189_v32 = vld [vmem:[%s4812_s0 + $0x7c] sm:$0xf] }
 0x434   :  { %2813 = vmatpush.bf16.msrb.mxu0 %v4104_v1  ;;  %2913 = vmatpush.bf16.msrb.mxu1 %v4134_v34 }
 0x435   :  { %3012 = vmatpush.bf16.msrb.mxu2 %v4168_v8 }
 0x438   :  { %2814 = vmatpush.bf16.msrb.mxu0 %v4100_v0  ;;  %2914 = vmatpush.bf16.msrb.mxu1 %v4130_v49 }
 0x439   :  { %3013 = vmatpush.bf16.msrb.mxu2 %v4164_v26  ;;  %v2744_v26 = vunpack.c.h.bf16 %v4790_v56 }
 0x43c   :  { %2815 = vmatpush.bf16.msrb.mxu0 %v4096_v39  ;;  %2915 = vmatpush.bf16.msrb.mxu1 %v4126_v38 }
 0x43d   :  { %3014 = vmatpush.bf16.msrb.mxu2 %v4160_v41 }
 0x440   :  { %2816 = vmatpush.bf16.msrb.mxu0 %v4092_v31 }
 0x4ab   :  { %v2431_v50 = vpop.f32.mrf.mxu0  ;;  %v2530_v51 = vpop.f32.mrf.mxu1 }
 0x4ac   :  { %v2435_v55 = vadd.f32 %v2431_v50, %v2357_v6  ;;  %v2534_v18 = vadd.f32 %v2530_v51, %v2456_v40  ;;  %v4473_v6 = vld [vmem:[#allocation4 + $0x18] sm:$0xf0] }
 0x4ad   :  { %v4193_v46 = vor.u32 %v4473_v6, %v4192_v57 }
 0x4ae   :  { %v3985_v62 = vmul.f32 -1.442695, %v2435_v55  ;;  %v4019_v63 = vmul.f32 -1.442695, %v2534_v18 }
 0x4af   :  { %3095 = vmatpush.bf16.msrb.mxu3 %v4193_v46 }
 0x4b0   :  { %4579 = vpow2.f32 %v3985_v62 }
 0x4b1   :  { %4581 = vpow2.f32 %v4019_v63 }
 0x4b2   :  { %v2629_v17 = vpop.f32.mrf.mxu2  ;;  %v2710_v37 = vpop.f32.mrf.mxu3 }
 0x4b3   :  { %v2714_v22 = vadd.f32 %v2710_v37, %v2636_v3  ;;  %v2433_v23 = vpop.f32.mrf.mxu0  ;;  %v2532_v24 = vpop.f32.mrf.mxu1  ;;  %v2633_v53 = vadd.f32 %v2629_v17, %v2555_v11 }
 0x4b5   :  { %v4086_v36 = vmul.f32 -1.442695, %v2714_v22 }
 0x4b6   :  { %v4580_v40 = vpop.eup %4579 }
 0x4b7   :  { %v4582_v43 = vpop.eup %4581  ;;  %v2439_v44 = vadd.f32 1.0, %v4580_v40  ;;  %4583 = vpow2.f32 %v4086_v36  ;;  %v3023_v36 = vunpack.c.l.bf16 %v4189_v32 }
 0x4b8   :  { %v2538_v1 = vadd.f32 1.0, %v4582_v43 }
 0x4b9   :  { %4585 = vrcp.f32 %v2439_v44  ;;  %v2451_v59 = vand.u32 2147483648, %v2439_v44  ;;  %v2449_v62 = vand.u32 2147483647, %v2439_v44  ;;  %vm2445_vm10 = vweird.f32 %v2439_v44 }
 0x4ba   :  { %4587 = vrcp.f32 %v2538_v1  ;;  %v2631_v13 = vpop.f32.mrf.mxu2  ;;  %v2712_v48 = vpop.f32.mrf.mxu3  ;;  %v2550_v60 = vand.u32 2147483648, %v2538_v1  ;;  %v2548_v25 = vand.u32 2147483647, %v2538_v1  ;;  %vm2544_vm11 = vweird.f32 %v2538_v1 }
 0x4bb   :  { %v2452_v3 = vor.u32 1.1754944e-38, %v2451_v59  ;;  %vm2450_vm14 = vcmp.eq.f32.partialorder %v2449_v62, 8.507059e+37 }
 0x4bc   :  { %v2551_v5 = vor.u32 1.1754944e-38, %v2550_v60  ;;  %vm2549_vm15 = vcmp.eq.f32.partialorder %v2548_v25, 8.507059e+37 }
 0x4bd   :  { %v4584_v50 = vpop.eup %4583 }
 0x4be   :  { %v2718_v51 = vadd.f32 1.0, %v4584_v50 }
 0x4bf   :  { %v4586_v52 = vpop.eup %4585 }
 0x4c0   :  { %v4588_v9 = vpop.eup %4587  ;;  %v2441_v20 = vmul.f32 %v4586_v52, %v2439_v44  ;;  %4589 = vrcp.f32 %v2718_v51  ;;  %vm2446_vm8 = vweird.f32 %v4586_v52  ;;  %v2730_v37 = vand.u32 2147483648, %v2718_v51 }
 0x4c1   :  { %v2540_v55 = vmul.f32 %v4588_v9, %v2538_v1  ;;  %4591 = vtanh.f32 %v2633_v53  ;;  %vm2545_vm9 = vweird.f32 %v4588_v9  ;;  %vm2447_vm12 = vmor %vm2445_vm10, %vm2446_vm8  ;;  %vm2724_vm1 = vweird.f32 %v2718_v51 }
 0x4c2   :  { %v2442_v18 = vsub.f32 1.0, %v2441_v20  ;;  %vm2546_vm13 = vmor %vm2544_vm11, %vm2545_vm9  ;;  %v2728_v49 = vand.u32 2147483647, %v2718_v51  ;;  %v2731_v47 = vor.u32 1.1754944e-38, %v2730_v37 }
 0x4c3   :  { %v2541_v58 = vsub.f32 1.0, %v2540_v55 }
 0x4c4   :  { %v2443_v61 = vmul.f32 %v4586_v52, %v2442_v18  ;;  %vm2729_vm3 = vcmp.eq.f32.partialorder %v2728_v49, 8.507059e+37 }
 0x4c5   :  { %v2542_v63 = vmul.f32 %v4588_v9, %v2541_v58 }
 0x4c6   :  { %v4590_v0 = vpop.eup %4589  ;;  %v2444_v2 = vadd.f32 %v4586_v52, %v2443_v61 }
 0x4c7   :  { %v2543_v34 = vadd.f32 %v4588_v9, %v2542_v63  ;;  %v2720_v4 = vmul.f32 %v4590_v0, %v2718_v51  ;;  %v4592_v8 = vpop.eup %4591  ;;  %vm2725_vm0 = vweird.f32 %v4590_v0 }
 0x4c8   :  { %v2448_v7 = vsel %vm2447_vm12, %v4586_v52, %v2444_v2  ;;  %vm2726_vm2 = vmor %vm2724_vm1, %vm2725_vm0 }
 0x4c9   :  { %v2453_v10 = vsel %vm2450_vm14, %v2452_v3, %v2448_v7  ;;  %v2547_v28 = vsel %vm2546_vm13, %v4588_v9, %v2543_v34  ;;  %v2721_v42 = vsub.f32 1.0, %v2720_v4 }
 0x4ca   :  { %v2552_v12 = vsel %vm2549_vm15, %v2551_v5, %v2547_v28  ;;  %v2735_v39 = vmul.f32 %v4592_v8, %v2453_v10 }
 0x4cb   :  { %v2734_v14 = vmul.f32 %v2552_v12, %v4774_v45  ;;  %v2722_v15 = vmul.f32 %v4590_v0, %v2721_v42  ;;  %v4122_v45 = vld [vmem:[%s4812_s0 + $0x74] sm:$0xff]  }
 0x4cc   :  { %v2843_v54 = vunpack.c.l.bf16 %v4122_v45  ;;  %v2942_v11 = vunpack.c.h.bf16 %v4122_v45 }
 0x4cd   :  { %v4795_v16 = vadd.f32 %v2735_v39, %v2734_v14  ;;  %v2723_v17 = vadd.f32 %v4590_v0, %v2722_v15 }
 0x4cf   :  { %4593 = vtanh.f32 %v4795_v16  ;;  %v2727_v19 = vsel %vm2726_vm2, %v4590_v0, %v2723_v17 }
 0x4d0   :  { %v2732_v22 = vsel %vm2729_vm3, %v2731_v47, %v2727_v19 }
 0x4d5   :  { %v4594_v21 = vpop.eup %4593 }
 0x4d6   :  { %v2738_v23 = vmul.f32 %v4594_v21, %v2732_v22 }
 0x4d8   :  { %v2739_v24 = vpack.c.bf16 %v2738_v23, %v2738_v23 }
 0x4da   :  { %4087 = vst [vmem:[%s4814_s2 + $0x18] sm:$0xf] %v2739_v24  ;;  %2817 = vmatmul.bf16.vlgmr.msrb.gmra.mxu0 %v2739_v24  ;;  %2916 = vmatmul.bf16.vlgmr.msrb.gmra.mxu1 %v2739_v24 }
 0x4db   :  { %3015 = vmatmul.bf16.vlgmr.msrb.gmra.mxu2 %v2739_v24  ;;  %3096 = vmatmul.bf16.vlgmr.msrb.gmra.mxu3 %v2739_v24 }
 0x557   :  { %v2818_v27 = vpop.f32.mrf.mxu0  ;;  %v2917_v29 = vpop.f32.mrf.mxu1 }
 0x558   :  { %v2822_v30 = vadd.f32 %v2818_v27, %v2744_v26  ;;  %v2921_v31 = vadd.f32 %v2917_v29, %v2843_v54 }
 0x55a   :  { %v4121_v33 = vmul.f32 -1.442695, %v2822_v30  ;;  %v4155_v35 = vmul.f32 -1.442695, %v2921_v31 }
 0x55c   :  { %4595 = vpow2.f32 %v4121_v33 }
 0x55d   :  { %4597 = vpow2.f32 %v4155_v35 }
 0x55e   :  { %v3016_v38 = vpop.f32.mrf.mxu2  ;;  %v3097_v57 = vpop.f32.mrf.mxu3 }
 0x55f   :  { %v3101_v6 = vadd.f32 %v3097_v57, %v3023_v36  ;;  %v2820_v40 = vpop.f32.mrf.mxu0  ;;  %v2919_v41 = vpop.f32.mrf.mxu1  ;;  %v3020_v53 = vadd.f32 %v3016_v38, %v2942_v11 }
 0x561   :  { %v4222_v56 = vmul.f32 -1.442695, %v3101_v6 }
 0x562   :  { %v4596_v43 = vpop.eup %4595 }
 0x563   :  { %v4598_v44 = vpop.eup %4597  ;;  %v2826_v46 = vadd.f32 1.0, %v4596_v43  ;;  %4599 = vpow2.f32 %v4222_v56 }
 0x564   :  { %v2925_v1 = vadd.f32 1.0, %v4598_v44 }
 0x565   :  { %4601 = vrcp.f32 %v2826_v46  ;;  %v2838_v59 = vand.u32 2147483648, %v2826_v46  ;;  %v2836_v62 = vand.u32 2147483647, %v2826_v46  ;;  %vm2832_vm6 = vweird.f32 %v2826_v46 }
 0x566   :  { %4603 = vrcp.f32 %v2925_v1  ;;  %v3018_v13 = vpop.f32.mrf.mxu2  ;;  %v3099_v48 = vpop.f32.mrf.mxu3  ;;  %v2937_v60 = vand.u32 2147483648, %v2925_v1  ;;  %v2935_v25 = vand.u32 2147483647, %v2925_v1  ;;  %vm2931_vm7 = vweird.f32 %v2925_v1 }
 0x567   :  { %v2839_v3 = vor.u32 1.1754944e-38, %v2838_v59  ;;  %vm2837_vm10 = vcmp.eq.f32.partialorder %v2836_v62, 8.507059e+37 }
 0x568   :  { %v2938_v5 = vor.u32 1.1754944e-38, %v2937_v60  ;;  %vm2936_vm11 = vcmp.eq.f32.partialorder %v2935_v25, 8.507059e+37 }
 0x569   :  { %v4600_v50 = vpop.eup %4599 }
 0x56a   :  { %v3105_v51 = vadd.f32 1.0, %v4600_v50 }
 0x56b   :  { %v4602_v52 = vpop.eup %4601 }
 0x56c   :  { %v4604_v9 = vpop.eup %4603  ;;  %v2828_v20 = vmul.f32 %v4602_v52, %v2826_v46  ;;  %4605 = vrcp.f32 %v3105_v51  ;;  %vm2833_vm4 = vweird.f32 %v4602_v52  ;;  %v3117_v49 = vand.u32 2147483648, %v3105_v51 }
 0x56d   :  { %v2927_v55 = vmul.f32 %v4604_v9, %v2925_v1  ;;  %4607 = vtanh.f32 %v3020_v53  ;;  %vm2932_vm5 = vweird.f32 %v4604_v9  ;;  %vm2834_vm8 = vmor %vm2832_vm6, %vm2833_vm4  ;;  %vm3111_vm13 = vweird.f32 %v3105_v51 }
 0x56e   :  { %v2829_v18 = vsub.f32 1.0, %v2828_v20  ;;  %vm2933_vm9 = vmor %vm2931_vm7, %vm2932_vm5  ;;  %v3115_v19 = vand.u32 2147483647, %v3105_v51  ;;  %v3118_v21 = vor.u32 1.1754944e-38, %v3117_v49 }
 0x56f   :  { %v2928_v58 = vsub.f32 1.0, %v2927_v55 }
 0x570   :  { %v2830_v61 = vmul.f32 %v4602_v52, %v2829_v18  ;;  %vm3116_vm15 = vcmp.eq.f32.partialorder %v3115_v19, 8.507059e+37 }
 0x571   :  { %v2929_v63 = vmul.f32 %v4604_v9, %v2928_v58 }
 0x572   :  { %v4606_v0 = vpop.eup %4605  ;;  %v2831_v2 = vadd.f32 %v4602_v52, %v2830_v61 }
 0x573   :  { %v2930_v34 = vadd.f32 %v4604_v9, %v2929_v63  ;;  %v3107_v4 = vmul.f32 %v4606_v0, %v3105_v51  ;;  %v4608_v8 = vpop.eup %4607  ;;  %vm3112_vm12 = vweird.f32 %v4606_v0 }
 0x574   :  { %v2835_v7 = vsel %vm2834_vm8, %v4602_v52, %v2831_v2  ;;  %vm3113_vm14 = vmor %vm3111_vm13, %vm3112_vm12 }
 0x575   :  { %v2840_v10 = vsel %vm2837_vm10, %v2839_v3, %v2835_v7  ;;  %v2934_v28 = vsel %vm2933_vm9, %v4604_v9, %v2930_v34  ;;  %v3108_v42 = vsub.f32 1.0, %v3107_v4 }
 0x576   :  { %v2939_v12 = vsel %vm2936_vm11, %v2938_v5, %v2934_v28  ;;  %v3122_v39 = vmul.f32 %v4608_v8, %v2840_v10 }
 0x577   :  { %v3121_v14 = vmul.f32 %v2939_v12, %v4795_v16  ;;  %v3109_v15 = vmul.f32 %v4606_v0, %v3108_v42 }
 0x579   :  { %v3123_v17 = vadd.f32 %v3122_v39, %v3121_v14  ;;  %v3110_v37 = vadd.f32 %v4606_v0, %v3109_v15 }
 0x57b   :  { %4609 = vtanh.f32 %v3123_v17  ;;  %v3114_v47 = vsel %vm3113_vm14, %v4606_v0, %v3110_v37 }
 0x57c   :  { %v3119_v23 = vsel %vm3116_vm15, %v3118_v21, %v3114_v47 }
 0x581   :  { %v4610_v22 = vpop.eup %4609 }
 0x582   :  { %v3125_v24 = vmul.f32 %v4610_v22, %v3119_v23 }
 0x584   :  { %v3126_v45 = vpack.c.bf16 %v3125_v24, %v3125_v24 }
 0x586   :  { %4223 = vst [vmem:[%s4814_s2 + $0x1c] sm:$0xf] %v3126_v45 }
 0x587   :  { %3135 = vsyncmov [#allocation5] }
 0x58a   :  { %s3136_s5 = vpop.sfrf %3135 }
 0x58b   :  { %p4224_p0 = scmp.ne.s32.totalorder %s3136_s5, 0 }
 0x58d   :  { %3140 = shalt.err (%p4224_p0)  }

</bundles_post_ra>
